<compile_context>
chip_gen: v5e
topology: v5e:2x2
jax: 0.10.0
libtpu: 0.0.40
codegen_flags: <defaults>
</compile_context>

<pallas_src>
import functools

import jax
import jax.numpy as jnp
from jax import lax
from jax.experimental import pallas as pl
from jax.experimental.pallas import tpu as pltpu


def basic_block_kernel(x_ref, w1_ref, b1_ref, w2_ref, b2_ref, o_ref, *,
                       compute_dtype):
    # x_ref : (H, W, C)  f32    one input image (residual source)
    # w1_ref: (9*C, P)   bf16   conv1 weight, BN1 scale folded, (ky,kx,cin) flat
    # b1_ref: (1, P)     f32    folded BN1 bias
    # w2_ref: (9*P, P)   bf16   conv2 weight, BN2 scale folded
    # b2_ref: (1, P)     f32    folded BN2 bias
    # o_ref : (H, W, P)         one output image (lane-dense store, P = lanes)
    H, W, C = x_ref.shape
    P = o_ref.shape[-1]
    cd = compute_dtype

    x_f32 = x_ref[...]                      # f32, kept for the identity residual
    xb = x_f32.astype(cd)

    # ---- zero-padded (pad=1) input slab, built in-register --------------------
    zr = jnp.zeros((1, W, C), cd)
    zc = jnp.zeros((H + 2, 1, C), cd)
    xp = jnp.concatenate([zr, xb, zr], axis=0)          # (H+2, W,   C)
    xp = jnp.concatenate([zc, xp, zc], axis=1)          # (H+2, W+2, C)

    # ---- conv1 (3x3, pad 1) + bn1 bias + ReLU: ONE K = 9*C MXU matmul ---------
    col1 = jnp.concatenate(
        [xp[dy:dy + H, dx:dx + W, :] for dy in range(3) for dx in range(3)],
        axis=-1).reshape(H * W, 9 * C)
    mid = jnp.dot(col1, w1_ref[...], preferred_element_type=jnp.float32)
    mid = jnp.maximum(mid + b1_ref[...], 0.0).astype(cd).reshape(H, W, P)

    # ---- zero-padded intermediate so conv2's padding=1 sees zeros -------------
    zr2 = jnp.zeros((1, W, P), cd)
    zc2 = jnp.zeros((H + 2, 1, P), cd)
    mp = jnp.concatenate([zr2, mid, zr2], axis=0)       # (H+2, W,   P)
    mp = jnp.concatenate([zc2, mp, zc2], axis=1)        # (H+2, W+2, P)

    # ---- conv2 (3x3, pad 1) + bn2 bias: ONE K = 9*P MXU matmul ----------------
    col2 = jnp.concatenate(
        [mp[dy:dy + H, dx:dx + W, :] for dy in range(3) for dx in range(3)],
        axis=-1).reshape(H * W, 9 * P)
    out = jnp.dot(col2, w2_ref[...], preferred_element_type=jnp.float32)
    out = (out + b2_ref[...]).reshape(H, W, P)

    # ---- identity residual (downsample=None) + final ReLU ---------------------
    o_ref[...] = jnp.maximum(out + x_f32, 0.0).astype(o_ref.dtype)


def fold_bn_into_conv(w_hwio, gamma, beta, mean, var, eps=1e-5):
    """Fold inference-mode BatchNorm into the preceding (bias-free) conv.
    w_hwio: (3, 3, Cin, Cout).  Returns (folded weight, bias[Cout])."""
    scale = gamma / jnp.sqrt(var + eps)
    return w_hwio * scale[None, None, None, :], beta - mean * scale


def _vmem_limit_bytes(H, W, C, P, cbytes, out_bytes):
    """Per-step VMEM footprint estimate with headroom, clamped to a value that
    is legal on every generation (v7x has 64 MiB physical VMEM)."""
    x_blk = H * W * C * 4 * 2                 # f32 input image, double-buffered
    o_blk = H * W * P * out_bytes * 2         # output image, double-buffered
    wts = (9 * C * P + 9 * P * P) * cbytes * 2
    pads = (H + 2) * (W + 2) * (C + P) * cbytes
    cols = H * W * 9 * (C + P) * cbytes       # im2col slabs
    f32_tmp = 2 * H * W * P * 4               # conv1/conv2 f32 accum values
    est = x_blk + o_blk + wts + pads + cols + f32_tmp
    est = int(est * 1.5) + (1 << 20)
    return max(32 << 20, min(est, 56 << 20))


def basic_block(x, w1f, b1, w2f, b2, *, compute_dtype=jnp.bfloat16,
                out_dtype=jnp.float32):
    """Fused BasicBlock forward (stride=1, downsample=None).

    x   : (N, H, W, C) NHWC f32.
    w*f : (3, 3, Cin, Cout) HWIO conv weights with the BN scale already folded
          in (torch OIHW maps via weight.transpose(2, 3, 1, 0)).
    b*  : (Cout,) f32 folded BN bias.
    """
    N, H, W, C = x.shape
    P = w1f.shape[-1]
    if w1f.shape != (3, 3, C, P) or w2f.shape != (3, 3, P, P):
        raise ValueError("expected 3x3 HWIO conv weights")
    if C != P:
        raise ValueError("identity residual requires inplanes == planes "
                         "(stride>1 / downsample path not implemented)")
    if C % 8 or P % 8:
        raise ValueError("channels must be multiples of 8 "
                         "(pad to 128 for fully lane-dense vregs)")

    w1r = w1f.reshape(9 * C, P).astype(compute_dtype)
    w2r = w2f.reshape(9 * P, P).astype(compute_dtype)
    b1r = jnp.asarray(b1, jnp.float32).reshape(1, P)
    b2r = jnp.asarray(b2, jnp.float32).reshape(1, P)

    cbytes = jnp.dtype(compute_dtype).itemsize
    obytes = jnp.dtype(out_dtype).itemsize
    vmem = _vmem_limit_bytes(H, W, C, P, cbytes, obytes)

    kern = functools.partial(basic_block_kernel, compute_dtype=compute_dtype)
    return pl.pallas_call(
        kern,
        out_shape=jax.ShapeDtypeStruct((N, H, W, P), out_dtype),
        grid=(N,),
        in_specs=[
            # one whole image per step (batch dim squeezed away)
            pl.BlockSpec((None, H, W, C), lambda n: (n, 0, 0, 0)),
            # weights / biases: constant index map, resident across the grid
            pl.BlockSpec((9 * C, P), lambda n: (0, 0)),
            pl.BlockSpec((1, P), lambda n: (0, 0)),
            pl.BlockSpec((9 * P, P), lambda n: (0, 0)),
            pl.BlockSpec((1, P), lambda n: (0, 0)),
        ],
        out_specs=pl.BlockSpec((None, H, W, P), lambda n: (n, 0, 0, 0)),
        compiler_params=pltpu.CompilerParams(
            dimension_semantics=("parallel",),   # batch steps are independent
            vmem_limit_bytes=vmem),
    )(x, w1r, b1r, w2r, b2r)


def reference_nhwc(x, w1f, b1, w2f, b2, compute_dtype=jnp.bfloat16):
    """Pure-JAX reference mirroring the kernel's numeric recipe (folded BN,
    bf16 conv inputs, f32 accumulation, f32 bias/residual/ReLU)."""
    cd = compute_dtype
    dn = ('NHWC', 'HWIO', 'NHWC')
    h = lax.conv_general_dilated(x.astype(cd), w1f.astype(cd), (1, 1), 'SAME',
                                 dimension_numbers=dn,
                                 preferred_element_type=jnp.float32)
    h = jnp.maximum(h + b1[None, None, None, :], 0.0)
    h = lax.conv_general_dilated(h.astype(cd), w2f.astype(cd), (1, 1), 'SAME',
                                 dimension_numbers=dn,
                                 preferred_element_type=jnp.float32)
    h = h + b2[None, None, None, :]
    return jnp.maximum(h + x.astype(jnp.float32), 0.0)


if __name__ == "__main__":
    # Small but lane-dense shapes: 128 channels fills the 128-lane vregs exactly.
    N, H, W, C = 2, 16, 16, 128
    P = C  # planes == inplanes, stride=1, downsample=None

    key = jax.random.PRNGKey(0)
    ks = jax.random.split(key, 11)
    x = jax.random.normal(ks[0], (N, H, W, C), jnp.float32)
    w1 = jax.random.normal(ks[1], (3, 3, C, P), jnp.float32) * (2.0 / (9 * C)) ** 0.5
    w2 = jax.random.normal(ks[2], (3, 3, P, P), jnp.float32) * (2.0 / (9 * P)) ** 0.5

    g1 = 1.0 + 0.1 * jax.random.normal(ks[3], (P,), jnp.float32)
    be1 = 0.1 * jax.random.normal(ks[4], (P,), jnp.float32)
    rm1 = 0.1 * jax.random.normal(ks[5], (P,), jnp.float32)
    rv1 = jax.random.uniform(ks[6], (P,), jnp.float32, 0.5, 1.5)
    g2 = 1.0 + 0.1 * jax.random.normal(ks[7], (P,), jnp.float32)
    be2 = 0.1 * jax.random.normal(ks[8], (P,), jnp.float32)
    rm2 = 0.1 * jax.random.normal(ks[9], (P,), jnp.float32)
    rv2 = jax.random.uniform(ks[10], (P,), jnp.float32, 0.5, 1.5)

    w1f, b1 = fold_bn_into_conv(w1, g1, be1, rm1, rv1)
    w2f, b2 = fold_bn_into_conv(w2, g2, be2, rm2, rv2)

    out = basic_block(x, w1f, b1, w2f, b2, compute_dtype=jnp.bfloat16,
                      out_dtype=jnp.float32)
    out = jax.block_until_ready(out)

    ref = reference_nhwc(x, w1f, b1, w2f, b2, compute_dtype=jnp.bfloat16)
    assert out.shape == (N, H, W, P)
    assert out.dtype == jnp.float32
    # Both sides use identical bf16 conv inputs with f32 accumulation; only
    # reduction-order / intermediate-rounding differences remain.
    assert jnp.allclose(out, ref, rtol=5e-3, atol=5e-3), "mismatch vs JAX reference"

    print("KERNEL_OK")
</pallas_src>

<mosaic_0001>
module attributes {stable_mosaic.version = 11 : i64} {
  func.func @basic_block_kernel(%arg0: i32, %arg1: memref<1x16x16x128xf32, #tpu.memory_space<vmem>>, %arg2: memref<1152x128xbf16, #tpu.memory_space<vmem>>, %arg3: memref<1x128xf32, #tpu.memory_space<vmem>>, %arg4: memref<1152x128xbf16, #tpu.memory_space<vmem>>, %arg5: memref<1x128xf32, #tpu.memory_space<vmem>>, %arg6: memref<1x16x16x128xf32, #tpu.memory_space<vmem>>) attributes {dimension_semantics = [#tpu.dimension_semantics<parallel>], iteration_bounds = array<i64: 2>, scalar_prefetch = 0 : i64, scratch_operands = 0 : i64, tpu.core_type = #tpu.core_type<tc>, window_params = [{transform_indices = @transform_0, window_bounds = array<i64: 1, 16, 16, 128>}, {pipeline_mode = #tpu.pipeline_mode<synchronous>, transform_indices = @transform_1, window_bounds = array<i64: 1152, 128>}, {pipeline_mode = #tpu.pipeline_mode<synchronous>, transform_indices = @transform_2, window_bounds = array<i64: 1, 128>}, {pipeline_mode = #tpu.pipeline_mode<synchronous>, transform_indices = @transform_3, window_bounds = array<i64: 1152, 128>}, {pipeline_mode = #tpu.pipeline_mode<synchronous>, transform_indices = @transform_4, window_bounds = array<i64: 1, 128>}, {transform_indices = @transform_5, window_bounds = array<i64: 1, 16, 16, 128>}]} {
    %c0 = arith.constant 0 : index
    %c0_0 = arith.constant 0 : index
    %c0_1 = arith.constant 0 : index
    %c0_2 = arith.constant 0 : index
    %0 = vector.load %arg1[%c0, %c0_0, %c0_1, %c0_2] : memref<1x16x16x128xf32, #tpu.memory_space<vmem>>, vector<1x16x16x128xf32>
    %1 = vector.shape_cast %0 : vector<1x16x16x128xf32> to vector<16x16x128xf32>
    %2 = arith.truncf %1 : vector<16x16x128xf32> to vector<16x16x128xbf16>
    %cst = arith.constant 0.000000e+00 : bf16
    %3 = vector.broadcast %cst : bf16 to vector<1x16x128xbf16>
    %cst_3 = arith.constant 0.000000e+00 : bf16
    %4 = vector.broadcast %cst_3 : bf16 to vector<18x1x128xbf16>
    %5 = tpu.concatenate %3, %2, %3 in 0 : vector<1x16x128xbf16>, vector<16x16x128xbf16>, vector<1x16x128xbf16> -> vector<18x16x128xbf16>
    %6 = tpu.concatenate %4, %5, %4 in 1 : vector<18x1x128xbf16>, vector<18x16x128xbf16>, vector<18x1x128xbf16> -> vector<18x18x128xbf16>
    %7 = vector.extract_strided_slice %6 {offsets = [0, 0, 0], sizes = [16, 16, 128], strides = [1, 1, 1]} : vector<18x18x128xbf16> to vector<16x16x128xbf16>
    %8 = vector.extract_strided_slice %6 {offsets = [0, 1, 0], sizes = [16, 16, 128], strides = [1, 1, 1]} : vector<18x18x128xbf16> to vector<16x16x128xbf16>
    %9 = vector.extract_strided_slice %6 {offsets = [0, 2, 0], sizes = [16, 16, 128], strides = [1, 1, 1]} : vector<18x18x128xbf16> to vector<16x16x128xbf16>
    %10 = vector.extract_strided_slice %6 {offsets = [1, 0, 0], sizes = [16, 16, 128], strides = [1, 1, 1]} : vector<18x18x128xbf16> to vector<16x16x128xbf16>
    %11 = vector.extract_strided_slice %6 {offsets = [1, 1, 0], sizes = [16, 16, 128], strides = [1, 1, 1]} : vector<18x18x128xbf16> to vector<16x16x128xbf16>
    %12 = vector.extract_strided_slice %6 {offsets = [1, 2, 0], sizes = [16, 16, 128], strides = [1, 1, 1]} : vector<18x18x128xbf16> to vector<16x16x128xbf16>
    %13 = vector.extract_strided_slice %6 {offsets = [2, 0, 0], sizes = [16, 16, 128], strides = [1, 1, 1]} : vector<18x18x128xbf16> to vector<16x16x128xbf16>
    %14 = vector.extract_strided_slice %6 {offsets = [2, 1, 0], sizes = [16, 16, 128], strides = [1, 1, 1]} : vector<18x18x128xbf16> to vector<16x16x128xbf16>
    %15 = vector.extract_strided_slice %6 {offsets = [2, 2, 0], sizes = [16, 16, 128], strides = [1, 1, 1]} : vector<18x18x128xbf16> to vector<16x16x128xbf16>
    %16 = tpu.concatenate %7, %8, %9, %10, %11, %12, %13, %14, %15 in 2 : vector<16x16x128xbf16>, vector<16x16x128xbf16>, vector<16x16x128xbf16>, vector<16x16x128xbf16>, vector<16x16x128xbf16>, vector<16x16x128xbf16>, vector<16x16x128xbf16>, vector<16x16x128xbf16>, vector<16x16x128xbf16> -> vector<16x16x1152xbf16>
    %17 = vector.shape_cast %16 : vector<16x16x1152xbf16> to vector<256x1152xbf16>
    %c0_4 = arith.constant 0 : index
    %c0_5 = arith.constant 0 : index
    %18 = vector.load %arg2[%c0_4, %c0_5] : memref<1152x128xbf16, #tpu.memory_space<vmem>>, vector<1152x128xbf16>
    %cst_6 = arith.constant dense<0.000000e+00> : vector<256x128xf32>
    %19 = tpu.matmul %17, %18, %cst_6 {dimension_numbers = #tpu.dot_dimension_numbers<[1], [0], [0], [1], [0, 0, 1, 1], [], []>} : vector<256x1152xbf16>, vector<1152x128xbf16>, vector<256x128xf32> -> vector<256x128xf32>
    %c0_7 = arith.constant 0 : index
    %c0_8 = arith.constant 0 : index
    %20 = vector.load %arg3[%c0_7, %c0_8] : memref<1x128xf32, #tpu.memory_space<vmem>>, vector<1x128xf32>
    %21 = vector.broadcast %20 : vector<1x128xf32> to vector<256x128xf32>
    %22 = arith.addf %19, %21 : vector<256x128xf32>
    %cst_9 = arith.constant 0.000000e+00 : f32
    %23 = vector.broadcast %cst_9 : f32 to vector<256x128xf32>
    %24 = arith.maximumf %22, %23 : vector<256x128xf32>
    %25 = arith.truncf %24 : vector<256x128xf32> to vector<256x128xbf16>
    %26 = vector.shape_cast %25 : vector<256x128xbf16> to vector<16x16x128xbf16>
    %cst_10 = arith.constant 0.000000e+00 : bf16
    %27 = vector.broadcast %cst_10 : bf16 to vector<1x16x128xbf16>
    %cst_11 = arith.constant 0.000000e+00 : bf16
    %28 = vector.broadcast %cst_11 : bf16 to vector<18x1x128xbf16>
    %29 = tpu.concatenate %27, %26, %27 in 0 : vector<1x16x128xbf16>, vector<16x16x128xbf16>, vector<1x16x128xbf16> -> vector<18x16x128xbf16>
    %30 = tpu.concatenate %28, %29, %28 in 1 : vector<18x1x128xbf16>, vector<18x16x128xbf16>, vector<18x1x128xbf16> -> vector<18x18x128xbf16>
    %31 = vector.extract_strided_slice %30 {offsets = [0, 0, 0], sizes = [16, 16, 128], strides = [1, 1, 1]} : vector<18x18x128xbf16> to vector<16x16x128xbf16>
    %32 = vector.extract_strided_slice %30 {offsets = [0, 1, 0], sizes = [16, 16, 128], strides = [1, 1, 1]} : vector<18x18x128xbf16> to vector<16x16x128xbf16>
    %33 = vector.extract_strided_slice %30 {offsets = [0, 2, 0], sizes = [16, 16, 128], strides = [1, 1, 1]} : vector<18x18x128xbf16> to vector<16x16x128xbf16>
    %34 = vector.extract_strided_slice %30 {offsets = [1, 0, 0], sizes = [16, 16, 128], strides = [1, 1, 1]} : vector<18x18x128xbf16> to vector<16x16x128xbf16>
    %35 = vector.extract_strided_slice %30 {offsets = [1, 1, 0], sizes = [16, 16, 128], strides = [1, 1, 1]} : vector<18x18x128xbf16> to vector<16x16x128xbf16>
    %36 = vector.extract_strided_slice %30 {offsets = [1, 2, 0], sizes = [16, 16, 128], strides = [1, 1, 1]} : vector<18x18x128xbf16> to vector<16x16x128xbf16>
    %37 = vector.extract_strided_slice %30 {offsets = [2, 0, 0], sizes = [16, 16, 128], strides = [1, 1, 1]} : vector<18x18x128xbf16> to vector<16x16x128xbf16>
    %38 = vector.extract_strided_slice %30 {offsets = [2, 1, 0], sizes = [16, 16, 128], strides = [1, 1, 1]} : vector<18x18x128xbf16> to vector<16x16x128xbf16>
    %39 = vector.extract_strided_slice %30 {offsets = [2, 2, 0], sizes = [16, 16, 128], strides = [1, 1, 1]} : vector<18x18x128xbf16> to vector<16x16x128xbf16>
    %40 = tpu.concatenate %31, %32, %33, %34, %35, %36, %37, %38, %39 in 2 : vector<16x16x128xbf16>, vector<16x16x128xbf16>, vector<16x16x128xbf16>, vector<16x16x128xbf16>, vector<16x16x128xbf16>, vector<16x16x128xbf16>, vector<16x16x128xbf16>, vector<16x16x128xbf16>, vector<16x16x128xbf16> -> vector<16x16x1152xbf16>
    %41 = vector.shape_cast %40 : vector<16x16x1152xbf16> to vector<256x1152xbf16>
    %c0_12 = arith.constant 0 : index
    %c0_13 = arith.constant 0 : index
    %42 = vector.load %arg4[%c0_12, %c0_13] : memref<1152x128xbf16, #tpu.memory_space<vmem>>, vector<1152x128xbf16>
    %cst_14 = arith.constant dense<0.000000e+00> : vector<256x128xf32>
    %43 = tpu.matmul %41, %42, %cst_14 {dimension_numbers = #tpu.dot_dimension_numbers<[1], [0], [0], [1], [0, 0, 1, 1], [], []>} : vector<256x1152xbf16>, vector<1152x128xbf16>, vector<256x128xf32> -> vector<256x128xf32>
    %c0_15 = arith.constant 0 : index
    %c0_16 = arith.constant 0 : index
    %44 = vector.load %arg5[%c0_15, %c0_16] : memref<1x128xf32, #tpu.memory_space<vmem>>, vector<1x128xf32>
    %45 = vector.broadcast %44 : vector<1x128xf32> to vector<256x128xf32>
    %46 = arith.addf %43, %45 : vector<256x128xf32>
    %47 = vector.shape_cast %46 : vector<256x128xf32> to vector<16x16x128xf32>
    %48 = arith.addf %47, %1 : vector<16x16x128xf32>
    %cst_17 = arith.constant 0.000000e+00 : f32
    %49 = vector.broadcast %cst_17 : f32 to vector<16x16x128xf32>
    %50 = arith.maximumf %48, %49 : vector<16x16x128xf32>
    %c0_18 = arith.constant 0 : index
    %c0_19 = arith.constant 0 : index
    %c0_20 = arith.constant 0 : index
    %c0_21 = arith.constant 0 : index
    %51 = vector.load %arg6[%c0_18, %c0_19, %c0_20, %c0_21] : memref<1x16x16x128xf32, #tpu.memory_space<vmem>>, vector<1x16x16x128xf32>
    %52 = vector.shape_cast %51 : vector<1x16x16x128xf32> to vector<16x16x128xf32>
    %53 = vector.shape_cast %50 : vector<16x16x128xf32> to vector<1x16x16x128xf32>
    tpu.vector_store %arg6[%c0_18, %c0_19, %c0_20, %c0_21], %53 {strides = array<i32>} : memref<1x16x16x128xf32, #tpu.memory_space<vmem>>, vector<1x16x16x128xf32>,
    return
  }
  func.func @transform_0(%arg0: i32) -> (i32, i32, i32, i32) {
    %c0_i32 = arith.constant 0 : i32
    %c0_i32_0 = arith.constant 0 : i32
    %c0_i32_1 = arith.constant 0 : i32
    %c0_i32_2 = arith.constant 0 : i32
    return %arg0, %c0_i32, %c0_i32_0, %c0_i32_1 : i32, i32, i32, i32
  }
  func.func @transform_1(%arg0: i32) -> (i32, i32) {
    %c0_i32 = arith.constant 0 : i32
    %c0_i32_0 = arith.constant 0 : i32
    %c0_i32_1 = arith.constant 0 : i32
    return %c0_i32, %c0_i32_0 : i32, i32
  }
  func.func @transform_2(%arg0: i32) -> (i32, i32) {
    %c0_i32 = arith.constant 0 : i32
    %c0_i32_0 = arith.constant 0 : i32
    %c0_i32_1 = arith.constant 0 : i32
    return %c0_i32, %c0_i32_0 : i32, i32
  }
  func.func @transform_3(%arg0: i32) -> (i32, i32) {
    %c0_i32 = arith.constant 0 : i32
    %c0_i32_0 = arith.constant 0 : i32
    %c0_i32_1 = arith.constant 0 : i32
    return %c0_i32, %c0_i32_0 : i32, i32
  }
  func.func @transform_4(%arg0: i32) -> (i32, i32) {
    %c0_i32 = arith.constant 0 : i32
    %c0_i32_0 = arith.constant 0 : i32
    %c0_i32_1 = arith.constant 0 : i32
    return %c0_i32, %c0_i32_0 : i32, i32
  }
  func.func @transform_5(%arg0: i32) -> (i32, i32, i32, i32) {
    %c0_i32 = arith.constant 0 : i32
    %c0_i32_0 = arith.constant 0 : i32
    %c0_i32_1 = arith.constant 0 : i32
    %c0_i32_2 = arith.constant 0 : i32
    return %arg0, %c0_i32, %c0_i32_0, %c0_i32_1 : i32, i32, i32, i32
  }
}

</mosaic_0001>

<bundles_post_ra>
// kernel: tpu_custom_call.1
= control target key start
LH: loop header
LB: loop body
LE: loop exit
PB: predicated region body
PF: predicated region fallthrough
CT: control target
= control target key end

     0   :  { %10 = vsyncpa [#allocation3], 0  ;;  %s7373_s0 = inlined_call_operand.hbm [shape: f32[2,16,16,128], index: 0, kind: input, shape index: {}]   ;;  %s7374_s1 = inlined_call_operand.hbm [shape: bf16[1152,128], index: 1, kind: input, shape index: {}]   ;;  %s7375_s2 = inlined_call_operand.vmem [shape: f32[1,128], index: 2, kind: input, shape index: {}]   ;;  %s7376_s3 = inlined_call_operand.hbm [shape: bf16[1152,128], index: 3, kind: input, shape index: {}]   ;;  %s7377_s4 = inlined_call_operand.vmem [shape: f32[1,128], index: 4, kind: input, shape index: {}]   ;;  %s7378_s5 = inlined_call_operand.hbm [shape: f32[2,16,16,128], index: 5, kind: output, shape index: {}]  }
   0x1   :  { %12 = vsyncpa [#allocation3 + $0x1], 0 }
   0x2   :  { %13 = vsyncpa [#allocation6], 0 }
   0x3   :  { %14 = vsyncpa [#allocation4], 0 }
   0x4   :  { %16 = vsyncpa [#allocation4 + $0x1], 0  ;;  %s5593_s18 = smov 0   ;;  %s5595_s19 = smov 0  }
   0x5   :  { %s5597_s20 = smov 0   ;;  %s5599_s21 = smov 0  }
   0x6 LB: > { %s5614_s22 = sadd.s32 4294967295, %s5552_s21   ;;  %s4528_s23 = sadd.s32 4294967294, %s5552_s21   ;;  %s5552_s21 = sphi %s5599_s21, %s7625_s21   ;;  %s5548_s20 = sphi %s5597_s20, %s7624_s20   ;;  %s5544_s19 = sphi %s5595_s19, %s7623_s19   ;;  %s5540_s18 = sphi %s5593_s18, %s7622_s18  }
   0x7   : > { %p42_p0 = scmp.ne.s32.totalorder %s5544_s19, %s5540_s18  ;;  %p43_p1 = scmp.eq.s32.totalorder %s5614_s22, 0 }
   0x8   : > { %p150_p2 = scmp.eq.s32.totalorder %s5614_s22, 1  ;;  %p156_p3 = scmp.eq.s32.totalorder %s4528_s23, 1 }
   0x9   : > { %p5623_p4 = por %p43_p1, %p42_p0  ;;  %p4529_p5 = scmp.ge.s32.totalorder %s5552_s21, 1 }
   0xa   : > { %p5628_p6 = por %p156_p3, %p42_p0  ;;  %p163_p7 = scmp.lt.s32.totalorder %s5552_s21, 3 }
   0xb   : > { %s174_s28 = sshll.u32 %s7374_s1, 4  ;;  %s5554_s30 = smov [#allocation5]   ;;  %s175_s28 = int_to_ptr.hbm [resolvable:$true] %s174_s28 }
   0xc   : > { %p5636_p8 = pnand %p4529_p5, %p163_p7  ;;  %s176_s6 = sshll.u32 %s5554_s30, 4  ;;  %s177_s6 = int_to_ptr.vmem [resolvable:$true] %s176_s6 }
   0xd   : > { %s191_s9 = sshll.u32 %s7376_s3, 4  ;;  %s5555_s10 = smov 64   ;;  %s192_s9 = int_to_ptr.hbm [resolvable:$true] %s191_s9 }
   0xe   : > { %p5296_p9 = pneg %p5636_p8  ;;  %s5556_s11 = smov 4  }
   0xf   : > { %s5557_s12 = smov [#allocation7]   ;;  %s5649_s14 = sadd.s32 1, %s5552_s21  }
  0x10   : > { %p5297_p10 = pnand %p5296_p9, %p43_p1  ;;  %s193_s13 = sshll.u32 %s5557_s12, 4  ;;  %s194_s13 = int_to_ptr.vmem [resolvable:$true] %s193_s13 }
  0x11   : > { %s29_s15 = sadd.s32 1, %s5548_s20  ;;  %s26_s16 = ssub.s32 %s5552_s21, %s5649_s14 }
  0x12   : > { %5299 = dma.hbm_to_vmem [thread:$0]  (!%p5297_p10), %s175_s28, 9216, %s177_s6, [#allocation6], %s5555_s10, %s5555_s10, %s5556_s11  }
  0x13   : > { %5302 = dma.hbm_to_vmem [thread:$0]  (!%p5297_p10), %s192_s9, 9216, %s194_s13, [#allocation6], %s5555_s10, %s5555_s10, %s5556_s11  }
  0x14   : > { %p36_p12 = scmp.ne.s32.totalorder %s5548_s20, %s5544_s19  ;;  %p27_p13 = scmp.eq.s32.totalorder %s26_s16, 0 }
  0x15   : > { %p37_p0 = scmp.eq.s32.totalorder %s5552_s21, 0  ;;  %p5313_p5 = scmp.lt.s32.totalorder %s5552_s21, 2 }
  0x16   : > { %p5659_p3 = por %p150_p2, %p36_p12  ;;  %s210_s26 = sand.u32 1, %s5548_s20  }
  0x17   : > { %s5665_s23 = scalar_select %p27_p13, %s5548_s20, %s29_s15  }
  0x18   : > { %p38_p7 = por %p37_p0, %p36_p12  ;;  %s4533_s27 = sshll.u32 %s210_s26, 8 }
  0x19   : > { %s5122_s28 = sshll.u32 %s5552_s21, 8  ;;  %s214_s8 = scalar_lea.vmem [#allocation2], %s4533_s27 }
  0x1a   : > { %s219_s7 = scalar_lea.hbm %s7373_s0, %s5122_s28  ;;  %s222_s9 = sshll.u32 %s214_s8, 4  ;;  %s223_s9 = int_to_ptr.vmem [resolvable:$true] %s222_s9 }
  0x1b   : > { %s220_s10 = sshll.u32 %s219_s7, 4  ;;  %p5672_p2 = pnand %p5313_p5, %p38_p7  ;;  %s221_s10 = int_to_ptr.hbm [resolvable:$true] %s220_s10 }
  0x1c   : > { %s211_s12 = scalar_lea.sflag [#allocation3], %s210_s26  ;;  %s5452_s13 = sshra.s32 %s221_s10, 4  ;;  %s5453_s13 = int_to_ptr.hbm [resolvable:$true] %s5452_s13 }
  0x1d   : > { %s5454_s15 = scalar_lea.hbm %s5453_s13, 256  ;;  %p5456_p10 = pneg %p5672_p2 }
  0x1e   : > { %p5455_p9 = scmp.ne.s32.totalorder %s5453_s13, %s5454_s15  ;;  %s5459_s28 = scalar_lea.hbm %s7373_s0, 512 }
  0x1f   : > { %p5460_p0 = scmp.lt.s32.totalorder %s5453_s13, %s7373_s0  ;;  %p5461_p5 = scmp.lt.s32.totalorder %s5459_s28, %s5454_s15 }
  0x20   : > { %p5457_p12 = pnand %p5456_p10, %p5455_p9 }
  0x21   : > { %p5462_p7 = por %p5461_p5, %p5460_p0 }
  0x22   : > { %p5458_p13 = pneg %p5457_p12 }
  0x24   : > { %p5463_p11 = pnand %p5462_p7, %p5458_p13 }
  0x26   : > { %5466 = shalt.err (!%p5463_p11)
}
  0x27   : > { %s5558_s26 = smov 128   ;;  %s5559_s7 = smov 8  }
  0x28   : > { %5306 = dma.hbm_to_vmem [thread:$0]  (!%p5672_p2), %s221_s10, 4096, %s223_s9, %s211_s12, %s5558_s26, %s5558_s26, %s5559_s7  }
  0x29   : > { %234 = sbr.rel (%p5636_p8) target bundleno = 1509 (0x5e5), region = 40 }
  0x2e   : > { %s5689_s8 = sand.u32 1, %s5544_s19  }
  0x2f   : > { %s4537_s13 = sshll.u32 %s5689_s8, 8  ;;  %s237_s15 = scalar_lea.sflag [#allocation3], %s5689_s8 }
  0x30   : > { %s5695_s16 = scalar_lea.vmem [#allocation2], %s4537_s13 }
  0x31   : > { %5527 = dma.done.wait (%p5623_p4), %s237_s15, 4096  }
  0x32   : > { %5529 = vsyncadd (%p5623_p4), %s237_s15, 4294963200 }
  0x33   : > { %5531 = dma.done.wait (%p43_p1), [#allocation6], 18432  }
  0x34   : > { %5533 = vsyncadd (%p43_p1), [#allocation6], 4294948864  ;;  %v5130_v0 = vld [vmem:[#allocation5 + $0x38] sm:$0xff]  ;;  %v5129_v2 = vld [vmem:[#allocation5 + $0x30] sm:$0xff]  ;;  %vm576_vm0 = vcmask 1040384   ;;  %v5560_v27 = vmov 0  }
  0x35   : > { %v5138_v1 = vld [vmem:[#allocation5 + $0x78] sm:$0xff]  ;;  %1518 = vmatpush.bf16.msra.mxu0 %v5130_v0  ;;  %5268 = vmatpush.bf16.msra.mxu2 %v5130_v0  ;;  %v5137_v3 = vld [vmem:[#allocation5 + $0x70] sm:$0xff]  ;;  %v5128_v6 = vld [vmem:[#allocation5 + $0x28] sm:$0xff]  ;;  %vm577_vm1 = vsmask.f32 256  ;;  %v426_v28 = vrot.slane %v5560_v27, 7 }
  0x36   : > { %5276 = vmatpush.bf16.msra.mxu3 %v5138_v1  ;;  %1607 = vmatpush.bf16.msra.mxu1 %v5138_v1  ;;  %v293_v4 = vld [vmem:[%s5695_s16 + $0x70] sm:$0xff]  ;;  %v294_v5 = vld [vmem:[%s5695_s16 + $0x78] sm:$0xff]  ;;  %v5136_v7 = vld [vmem:[#allocation5 + $0x68] sm:$0xff]  ;;  %vm613_vm3 = vsmask.f32 7424  ;;  %vm854_vm4 = vcmask 1046528  }
  0x37   : > { %v325_v8 = vpack.c.bf16 %v293_v4, %v293_v4  ;;  %v326_v9 = vpack.c.bf16 %v294_v5, %v294_v5  ;;  %v279_v10 = vld [vmem:[%s5695_s16] sm:$0xff]  ;;  %v280_v11 = vld [vmem:[%s5695_s16 + $0x8] sm:$0xff]  ;;  %v5126_v31 = vld [vmem:[#allocation5 + $0x18] sm:$0xff]  ;;  %s7236_s11 = scalar_lea.vmem [#allocation8], %s4537_s13  ;;  %s5267_s12 = sshll.u32 %s5614_s22, 8 }
  0x38   : > { %v295_v12 = vld [vmem:[%s5695_s16 + $0x80] sm:$0xff]  ;;  %v296_v15 = vld [vmem:[%s5695_s16 + $0x88] sm:$0xff]  ;;  %v311_v16 = vpack.c.bf16 %v279_v10, %v279_v10  ;;  %v312_v17 = vpack.c.bf16 %v280_v11, %v280_v11  ;;  %v5134_v33 = vld [vmem:[#allocation5 + $0x58] sm:$0xff]  ;;  %s4432_s30 = scalar_lea.hbm %s7378_s5, %s5267_s12  ;;  %s4433_s6 = sshll.u32 %s7236_s11, 4  ;;  %s4434_s6 = int_to_ptr.vmem [resolvable:$true] %s4433_s6 }
  0x39   : > { %1519 = vmatpush.bf16.msra.mxu0 %v5129_v2  ;;  %5269 = vmatpush.bf16.msra.mxu2 %v5129_v2  ;;  %v389_v13 = vunpack.c.l.b16 %v325_v8  ;;  %v390_v14 = vunpack.c.l.b16 %v326_v9  ;;  %v327_v18 = vpack.c.bf16 %v295_v12, %v295_v12  ;;  %v328_v19 = vpack.c.bf16 %v296_v15, %v296_v15  ;;  %v5127_v20 = vld [vmem:[#allocation5 + $0x20] sm:$0xff]  ;;  %vm5712_vm2 = vmand %vm576_vm0, %vm577_vm1  ;;  %v5125_v39 = vld [vmem:[#allocation5 + $0x10] sm:$0xff]  ;;  %s4435_s26 = sshll.u32 %s4432_s30, 4  ;;  %s4421_s22 = scalar_lea.sflag [#allocation4], %s5689_s8  ;;  %s4436_s26 = int_to_ptr.hbm [resolvable:$true] %s4435_s26 }
  0x3a   : > { %5277 = vmatpush.bf16.msra.mxu3 %v5137_v3  ;;  %1608 = vmatpush.bf16.msra.mxu1 %v5137_v3  ;;  %v5135_v22 = vld [vmem:[#allocation5 + $0x60] sm:$0xff]  ;;  %v375_v29 = vunpack.c.l.b16 %v311_v16  ;;  %v376_v30 = vunpack.c.l.b16 %v312_v17  ;;  %v5718_v37 = vsel %vm5712_vm2, 0, %v426_v28  ;;  %v5133_v41 = vld [vmem:[#allocation5 + $0x50] sm:$0xff]  ;;  %v298_v45 = vld [vmem:[%s5695_s16 + $0x98] sm:$0xff]  ;;  %v5734_v48 = vsel %vm5712_vm2, %v426_v28, 0  ;;  %s5496_s7 = sshra.s32 %s4436_s26, 4  ;;  %s5497_s7 = int_to_ptr.hbm [resolvable:$true] %s5496_s7 }
  0x3b   : > { %v414_v21 = vpack.c.b16 %v390_v14, %v389_v13  ;;  %v391_v23 = vunpack.c.l.b16 %v327_v18  ;;  %v392_v24 = vunpack.c.l.b16 %v328_v19  ;;  %7453 = vst [vmem:[#allocation12_spill] sm:$0xff] %v5718_v37  ;;  %v297_v44 = vld [vmem:[%s5695_s16 + $0x90] sm:$0xff]  ;;  %v617_v47 = vshll.u32 %v5718_v37, 16  ;;  %v5124_v50 = vld [vmem:[#allocation5 + $0x8] sm:$0xff]  ;;  %v282_v53 = vld [vmem:[%s5695_s16 + $0x18] sm:$0xff]  ;;  %s5498_s13 = scalar_lea.hbm %s5497_s7, 256  ;;  %p5503_p11 = scmp.lt.s32.totalorder %s5497_s7, %s7378_s5 }
  0x3c   : > { %v407_v38 = vpack.c.b16 %v376_v30, %v375_v29  ;;  %v281_v52 = vld [vmem:[%s5695_s16 + $0x10] sm:$0xff]  ;;  %v329_v54 = vpack.c.bf16 %v297_v44, %v297_v44  ;;  %v330_v55 = vpack.c.bf16 %v298_v45, %v298_v45  ;;  %v5132_v56 = vld [vmem:[#allocation5 + $0x48] sm:$0xff]  ;;  %v615_v61 = vshrl.u32 %v5718_v37, 16  ;;  %v5123_v4 = vld [vmem:[#allocation5] sm:$0xff]  ;;  %p5499_p1 = scmp.ne.s32.totalorder %s5497_s7, %s5498_s13  ;;  %s5502_s29 = scalar_lea.hbm %s7378_s5, 512 }
  0x3d   : > { %1520 = vmatpush.bf16.msra.mxu0 %v5128_v6  ;;  %5270 = vmatpush.bf16.msra.mxu2 %v5128_v6  ;;  %v480_v25 = vshrl.u32 %v414_v21, 16  ;;  %v483_v26 = vshll.u32 %v414_v21, 16  ;;  %v415_v35 = vpack.c.b16 %v392_v24, %v391_v23  ;;  %v619_v62 = vrot.slane %v617_v47, 1  ;;  %v5131_v6 = vld [vmem:[#allocation5 + $0x40] sm:$0xff]  ;;  %v5146_v9 = vld [vmem:[#allocation5 + $0xb8] sm:$0xff]  ;;  %v5145_v21 = vld [vmem:[#allocation5 + $0xb0] sm:$0xff]  ;;  %p5504_p2 = scmp.lt.s32.totalorder %s5502_s29, %s5498_s13 }
  0x3e   : > { %5278 = vmatpush.bf16.msra.mxu3 %v5136_v7  ;;  %1609 = vmatpush.bf16.msra.mxu1 %v5136_v7  ;;  %v431_v49 = vshrl.u32 %v407_v38, 16  ;;  %v622_v63 = vshll.u32 %v5734_v48, 16  ;;  %v434_v1 = vshll.u32 %v407_v38, 16  ;;  %v313_v2 = vpack.c.bf16 %v281_v52, %v281_v52  ;;  %v5154_v12 = vld [vmem:[#allocation5 + $0xf8] sm:$0xff]  ;;  %v5153_v24 = vld [vmem:[#allocation5 + $0xf0] sm:$0xff]  ;;  %v283_v38 = vld [vmem:[%s5695_s16 + $0x20] sm:$0xff]  ;;  %p5500_p4 = pnand %p5499_p1, %p5659_p3 }
  0x3f   : > { %v482_v32 = vrot.slane %v480_v25, 7  ;;  %v487_v43 = vshrl.u32 %v415_v35, 16  ;;  %v490_v51 = vshll.u32 %v415_v35, 16  ;;  %v314_v3 = vpack.c.bf16 %v282_v53, %v282_v53  ;;  %v5162_v18 = vld [vmem:[#allocation5 + $0x138] sm:$0xff]  ;;  %v5161_v29 = vld [vmem:[#allocation5 + $0x130] sm:$0xff]  ;;  %v5160_v47 = vld [vmem:[#allocation5 + $0x128] sm:$0xff]  ;;  %p5505_p9 = por %p5504_p2, %p5503_p11 }
  0x40   : > { %v433_v0 = vrot.slane %v431_v49, 7  ;;  %v393_v5 = vunpack.c.l.b16 %v329_v54  ;;  %v394_v11 = vunpack.c.l.b16 %v330_v55  ;;  %v620_v13 = vor.u32 %v619_v62, %v615_v61  ;;  %p5501_p8 = pneg %p5500_p4 }
  0x41   : > { %1521 = vmatpush.bf16.msra.mxu0 %v5127_v20  ;;  %5271 = vmatpush.bf16.msra.mxu2 %v5127_v20  ;;  %v485_v36 = vor.u32 %v483_v26, %v482_v32  ;;  %v5729_v46 = vsel %vm5712_vm2, %v482_v32, 0  ;;  %v489_v60 = vrot.slane %v487_v43, 7  ;;  %v624_v14 = vrot.slane %v622_v63, 1  ;;  %v299_v32 = vld [vmem:[%s5695_s16 + $0xa0] sm:$0xff] }
  0x42   : > { %5279 = vmatpush.bf16.msra.mxu3 %v5135_v22  ;;  %1610 = vmatpush.bf16.msra.mxu1 %v5135_v22  ;;  %v718_v59 = vshll.u32 %v5729_v46, 16  ;;  %v436_v15 = vor.u32 %v434_v1, %v433_v0  ;;  %v377_v16 = vunpack.c.l.b16 %v313_v2  ;;  %v378_v17 = vunpack.c.l.b16 %v314_v3  ;;  %p5506_p10 = pnand %p5505_p9, %p5501_p8 }
  0x43   : > { %v5722_v40 = vsel %vm5712_vm2, 0, %v485_v36  ;;  %v492_v10 = vor.u32 %v490_v51, %v489_v60  ;;  %v416_v22 = vpack.c.b16 %v394_v11, %v393_v5  ;;  %v5750_v23 = vsel %vm613_vm3, %v620_v13, %v624_v14  ;;  %v5152_v36 = vld [vmem:[#allocation5 + $0xe8] sm:$0xff] }
  0x44   : > { %7454 = vst [vmem:[#allocation13_spill] sm:$0xff] %v5722_v40  ;;  %v713_v42 = vshll.u32 %v5722_v40, 16  ;;  %v711_v57 = vshrl.u32 %v5722_v40, 16  ;;  %v720_v8 = vrot.slane %v718_v59, 1  ;;  %v5756_v25 = vsel %vm5712_vm2, 0, %v436_v15  ;;  %v5143_v15 = vld [vmem:[#allocation5 + $0xa0] sm:$0xff] }
  0x45   : > { %1522 = vmatpush.bf16.msra.mxu0 %v5126_v31  ;;  %5272 = vmatpush.bf16.msra.mxu2 %v5126_v31  ;;  %v5747_v20 = vsel %vm5712_vm2, 0, %v492_v10  ;;  %7457 = vst [vmem:[#allocation16_spill] sm:$0xff] %v5750_v23  ;;  %v408_v26 = vpack.c.b16 %v378_v17, %v377_v16  ;;  %v5761_v27 = vsel %vm5712_vm2, %v489_v60, 0  ;;  %v494_v30 = vshrl.u32 %v416_v22, 16  ;;  %v5144_v31 = vld [vmem:[#allocation5 + $0xa8] sm:$0xff]  ;;  %v5151_v16 = vld [vmem:[#allocation5 + $0xe0] sm:$0xff] }
  0x46   : > { %5280 = vmatpush.bf16.msra.mxu3 %v5134_v33  ;;  %1611 = vmatpush.bf16.msra.mxu1 %v5134_v33  ;;  %v715_v58 = vrot.slane %v713_v42, 1  ;;  %7456 = vst [vmem:[#allocation15_spill] sm:$0xff] %v5747_v20  ;;  %v725_v28 = vshll.u32 %v5747_v20, 16  ;;  %v300_v33 = vld [vmem:[%s5695_s16 + $0xa8] sm:$0xff]  ;;  %v629_v35 = vshll.u32 %v5756_v25, 16  ;;  %v5773_v42 = vsel %vm5712_vm2, %v433_v0, 0 }
  0x47   : > { %v438_v43 = vshrl.u32 %v408_v26, 16  ;;  %v723_v44 = vshrl.u32 %v5747_v20, 16  ;;  %v331_v49 = vpack.c.bf16 %v299_v32, %v299_v32  ;;  %v496_v51 = vrot.slane %v494_v30, 7  ;;  %v285_v30 = vld [vmem:[%s5695_s16 + $0x30] sm:$0xff] }
  0x48   : > { %v716_v7 = vor.u32 %v715_v58, %v711_v57  ;;  %v727_v45 = vrot.slane %v725_v28, 1  ;;  %v497_v52 = vshll.u32 %v416_v22, 16  ;;  %v315_v53 = vpack.c.bf16 %v283_v38, %v283_v38  ;;  %v301_v22 = vld [vmem:[%s5695_s16 + $0xb0] sm:$0xff] }
  0x49   : > { %1523 = vmatpush.bf16.msra.mxu0 %v5125_v39  ;;  %5273 = vmatpush.bf16.msra.mxu2 %v5125_v39  ;;  %v284_v39 = vld [vmem:[%s5695_s16 + $0x28] sm:$0xff]  ;;  %v627_v55 = vshrl.u32 %v5756_v25, 16  ;;  %v634_v57 = vshll.u32 %v5773_v42, 16  ;;  %v440_v58 = vrot.slane %v438_v43, 7  ;;  %v441_v59 = vshll.u32 %v408_v26, 16 }
  0x4a   : > { %5281 = vmatpush.bf16.msra.mxu3 %v5133_v41  ;;  %1612 = vmatpush.bf16.msra.mxu1 %v5133_v41  ;;  %v5743_v19 = vsel %vm613_vm3, %v716_v7, %v720_v8  ;;  %v730_v41 = vshll.u32 %v5761_v27, 16  ;;  %v316_v54 = vpack.c.bf16 %v284_v39, %v284_v39  ;;  %v395_v61 = vunpack.c.l.b16 %v331_v49 }
  0x4b   : > { %7455 = vst [vmem:[#allocation14_spill] sm:$0xff] %v5743_v19  ;;  %v728_v63 = vor.u32 %v727_v45, %v723_v44  ;;  %v499_v0 = vor.u32 %v497_v52, %v496_v51  ;;  %v379_v1 = vunpack.c.l.b16 %v315_v53  ;;  %v443_v5 = vor.u32 %v441_v59, %v440_v58 }
  0x4c   : > { %v732_v60 = vrot.slane %v730_v41, 1  ;;  %v380_v2 = vunpack.c.l.b16 %v316_v54  ;;  %v333_v41 = vpack.c.bf16 %v301_v22, %v301_v22  ;;  %v287_v22 = vld [vmem:[%s5695_s16 + $0x40] sm:$0xff] }
  0x4d   : > { %1524 = vmatpush.bf16.msra.mxu0 %v5124_v50  ;;  %5274 = vmatpush.bf16.msra.mxu2 %v5124_v50  ;;  %v332_v50 = vpack.c.bf16 %v300_v33, %v300_v33  ;;  %v5783_v8 = vsel %vm5712_vm2, 0, %v499_v0  ;;  %v5792_v11 = vsel %vm5712_vm2, 0, %v443_v5  ;;  %v5142_v5 = vld [vmem:[#allocation5 + $0x98] sm:$0xff] }
  0x4e   : > { %5282 = vmatpush.bf16.msra.mxu3 %v5132_v56  ;;  %1613 = vmatpush.bf16.msra.mxu1 %v5132_v56  ;;  %v631_v56 = vrot.slane %v629_v35, 1  ;;  %v5779_v7 = vsel %vm613_vm3, %v728_v63, %v732_v60  ;;  %v737_v13 = vshll.u32 %v5783_v8, 16  ;;  %v735_v26 = vshrl.u32 %v5783_v8, 16 }
  0x4f   : > { %v396_v62 = vunpack.c.l.b16 %v332_v50  ;;  %7458 = vst [vmem:[#allocation17_spill] sm:$0xff] %v5779_v7  ;;  %v639_v33 = vshrl.u32 %v5792_v11, 16  ;;  %v397_v54 = vunpack.c.l.b16 %v333_v41  ;;  %v319_v41 = vpack.c.bf16 %v287_v22, %v287_v22 }
  0x50   : > { %v632_v3 = vor.u32 %v631_v56, %v627_v55  ;;  %v739_v32 = vrot.slane %v737_v13, 1 }
  0x51   : > { %1525 = vmatpush.bf16.msra.mxu0 %v5123_v4  ;;  %5275 = vmatpush.bf16.msra.mxu2 %v5123_v4  ;;  %v636_v4 = vrot.slane %v634_v57, 1 }
  0x52   : > { %5283 = vmatpush.bf16.msra.mxu3 %v5131_v6  ;;  %1614 = vmatpush.bf16.msra.mxu1 %v5131_v6  ;;  %v417_v6 = vpack.c.b16 %v396_v62, %v395_v61  ;;  %v740_v50 = vor.u32 %v739_v32, %v735_v26 }
  0x53   : > { %v5786_v10 = vsel %vm613_vm3, %v632_v3, %v636_v4 }
  0x54   : > { %1526 = vmatmul.bf16.vlgmr.msra.gmra.mxu0 %v5718_v37  ;;  %1566 = vmatmul.bf16.vlgmr.msra.gmra.mxu2 %v5722_v40  ;;  %v501_v14 = vshrl.u32 %v417_v6, 16 }
  0x55   : > { %1696 = vmatpush.bf16.msrb.mxu2 %v5146_v9  ;;  %1655 = vmatmul.bf16.vlgmr.msra.gmra.mxu3 %v5743_v19  ;;  %v409_v9 = vpack.c.b16 %v380_v2, %v379_v1 }
  0x56   : > { %1785 = vmatpush.bf16.msrb.mxu3 %v5154_v12  ;;  %1874 = vmatpush.bf16.msrb.mxu0 %v5162_v18  ;;  %v5797_v12 = vsel %vm5712_vm2, %v496_v51, 0  ;;  %v5159_v18 = vld [vmem:[#allocation5 + $0x120] sm:$0xff]  ;;  %v503_v35 = vrot.slane %v501_v14, 7  ;;  %v5158_v14 = vld [vmem:[#allocation5 + $0x118] sm:$0xff] }
  0x57   : > { %1615 = vmatmul.bf16.vlgmr.msra.gmra.mxu1 %v5750_v23  ;;  %v445_v17 = vshrl.u32 %v409_v9, 16  ;;  %v742_v28 = vshll.u32 %v5797_v12, 16  ;;  %v448_v39 = vshll.u32 %v409_v9, 16 }
  0x58   : > { %v5833_v2 = vsel %vm5712_vm2, %v503_v35, 0 }
  0x59   : > { %1697 = vmatpush.bf16.msrb.mxu2 %v5145_v21  ;;  %v641_v21 = vshll.u32 %v5792_v11, 16  ;;  %v447_v38 = vrot.slane %v445_v17, 7  ;;  %v744_v51 = vrot.slane %v742_v28, 1  ;;  %v304_v17 = vld [vmem:[%s5695_s16 + $0xc8] sm:$0xff] }
  0x5a   : > { %1786 = vmatpush.bf16.msrb.mxu3 %v5153_v24  ;;  %1875 = vmatpush.bf16.msrb.mxu0 %v5161_v29  ;;  %v302_v24 = vld [vmem:[%s5695_s16 + $0xb8] sm:$0xff]  ;;  %v5808_v29 = vsel %vm5712_vm2, %v440_v58, 0 }
  0x5b   : > { %v334_v43 = vpack.c.bf16 %v302_v24, %v302_v24  ;;  %v643_v44 = vrot.slane %v641_v21, 1  ;;  %v646_v45 = vshll.u32 %v5808_v29, 16  ;;  %v450_v52 = vor.u32 %v448_v39, %v447_v38  ;;  %v288_v24 = vld [vmem:[%s5695_s16 + $0x48] sm:$0xff] }
  0x5c   : > { %v5815_v60 = vsel %vm613_vm3, %v740_v50, %v744_v51  ;;  %v5840_v9 = vsel %vm5712_vm2, %v447_v38, 0  ;;  %v754_v21 = vshll.u32 %v5833_v2, 16 }
  0x5d   : > { %1698 = vmatpush.bf16.msrb.mxu2 %v5144_v31  ;;  %v286_v31 = vld [vmem:[%s5695_s16 + $0x38] sm:$0xff]  ;;  %v398_v55 = vunpack.c.l.b16 %v334_v43  ;;  %v644_v56 = vor.u32 %v643_v44, %v639_v33  ;;  %v648_v57 = vrot.slane %v646_v45, 1  ;;  %v5819_v61 = vsel %vm5712_vm2, 0, %v450_v52 }
  0x5e   : > { %1787 = vmatpush.bf16.msrb.mxu3 %v5152_v36  ;;  %1876 = vmatpush.bf16.msrb.mxu0 %v5160_v47  ;;  %v504_v36 = vshll.u32 %v417_v6, 16  ;;  %v317_v47 = vpack.c.bf16 %v285_v30, %v285_v30  ;;  %v318_v49 = vpack.c.bf16 %v286_v31, %v286_v31  ;;  %v653_v4 = vshll.u32 %v5819_v61, 16  ;;  %v5150_v6 = vld [vmem:[#allocation5 + $0xd8] sm:$0xff] }
  0x5f   : > { %v418_v63 = vpack.c.b16 %v398_v55, %v397_v54  ;;  %v5826_v0 = vsel %vm613_vm3, %v644_v56, %v648_v57  ;;  %v651_v28 = vshrl.u32 %v5819_v61, 16  ;;  %v658_v31 = vshll.u32 %v5840_v9, 16 }
  0x60   : > { %v506_v53 = vor.u32 %v504_v36, %v503_v35  ;;  %v381_v58 = vunpack.c.l.b16 %v317_v47  ;;  %v382_v59 = vunpack.c.l.b16 %v318_v49  ;;  %v655_v30 = vrot.slane %v653_v4, 1  ;;  %v5141_v4 = vld [vmem:[#allocation5 + $0x90] sm:$0xff] }
  0x61   : > { %1699 = vmatpush.bf16.msrb.mxu2 %v5143_v15  ;;  %v508_v13 = vshrl.u32 %v418_v63, 16  ;;  %v511_v33 = vshll.u32 %v418_v63, 16  ;;  %v336_v36 = vpack.c.bf16 %v304_v17, %v304_v17  ;;  %v320_v43 = vpack.c.bf16 %v288_v24, %v288_v24 }
  0x62   : > { %1788 = vmatpush.bf16.msrb.mxu3 %v5151_v16  ;;  %1877 = vmatpush.bf16.msrb.mxu0 %v5159_v18  ;;  %v5823_v62 = vsel %vm5712_vm2, 0, %v506_v53  ;;  %v410_v1 = vpack.c.b16 %v382_v59, %v381_v58  ;;  %v303_v16 = vld [vmem:[%s5695_s16 + $0xc0] sm:$0xff]  ;;  %v756_v45 = vrot.slane %v754_v21, 1  ;;  %v660_v47 = vrot.slane %v658_v31, 1  ;;  %v306_v21 = vld [vmem:[%s5695_s16 + $0xd8] sm:$0xff] }
  0x63   : > { %v749_v3 = vshll.u32 %v5823_v62, 16  ;;  %v747_v18 = vshrl.u32 %v5823_v62, 16  ;;  %v510_v32 = vrot.slane %v508_v13, 7  ;;  %v335_v35 = vpack.c.bf16 %v303_v16, %v303_v16  ;;  %v290_v31 = vld [vmem:[%s5695_s16 + $0x58] sm:$0xff] }
  0x64   : > { %1531 = vmatmul.bf16.gmra.mxu0 %v5756_v25  ;;  %1571 = vmatmul.bf16.gmra.mxu2 %v5747_v20  ;;  %v452_v15 = vshrl.u32 %v410_v1, 16  ;;  %v455_v39 = vshll.u32 %v410_v1, 16  ;;  %v400_v51 = vunpack.c.l.b16 %v336_v36  ;;  %v656_v52 = vor.u32 %v655_v30, %v651_v28  ;;  %v289_v30 = vld [vmem:[%s5695_s16 + $0x50] sm:$0xff] }
  0x65   : > { %1660 = vmatmul.bf16.gmra.mxu3 %v5779_v7  ;;  %1700 = vmatpush.bf16.msrb.mxu2 %v5142_v5  ;;  %v751_v26 = vrot.slane %v749_v3, 1  ;;  %v513_v49 = vor.u32 %v511_v33, %v510_v32  ;;  %v399_v50 = vunpack.c.l.b16 %v335_v35  ;;  %v383_v54 = vunpack.c.l.b16 %v319_v41  ;;  %v5149_v5 = vld [vmem:[#allocation5 + $0xd0] sm:$0xff] }
  0x66   : > { %1789 = vmatpush.bf16.msrb.mxu3 %v5150_v6  ;;  %1878 = vmatpush.bf16.msrb.mxu0 %v5158_v14  ;;  %v454_v38 = vrot.slane %v452_v15, 7  ;;  %v384_v55 = vunpack.c.l.b16 %v320_v43  ;;  %v5858_v59 = vsel %vm613_vm3, %v656_v52, %v660_v47  ;;  %v5871_v6 = vsel %vm5712_vm2, %v510_v32, 0  ;;  %v5157_v15 = vld [vmem:[#allocation5 + $0x110] sm:$0xff] }
  0x67   : > { %1620 = vmatmul.bf16.gmra.mxu1 %v5786_v10  ;;  %v752_v44 = vor.u32 %v751_v26, %v747_v18  ;;  %v5855_v57 = vsel %vm5712_vm2, 0, %v513_v49  ;;  %v419_v58 = vpack.c.b16 %v400_v51, %v399_v50  ;;  %7460 = vst [vmem:[#allocation19_spill] sm:$0xff] %v5871_v6  ;;  %v305_v18 = vld [vmem:[%s5695_s16 + $0xd0] sm:$0xff]  ;;  %v766_v26 = vshll.u32 %v5871_v6, 16 }
  0x68   : > { %v457_v53 = vor.u32 %v455_v39, %v454_v38  ;;  %v411_v1 = vpack.c.b16 %v384_v55, %v383_v54  ;;  %v761_v3 = vshll.u32 %v5855_v57, 16  ;;  %v5876_v16 = vsel %vm5712_vm2, %v454_v38, 0 }
  0x69   : > { %v5851_v56 = vsel %vm613_vm3, %v752_v44, %v756_v45  ;;  %v515_v14 = vshrl.u32 %v419_v58, 16  ;;  %1701 = vmatpush.bf16.msrb.mxu2 %v5141_v4  ;;  %v759_v22 = vshrl.u32 %v5855_v57, 16  ;;  %v670_v33 = vshll.u32 %v5876_v16, 16 }
  0x6a   : > { %v5862_v63 = vsel %vm5712_vm2, 0, %v457_v53  ;;  %v459_v17 = vshrl.u32 %v411_v1, 16  ;;  %1790 = vmatpush.bf16.msrb.mxu3 %v5149_v5  ;;  %1879 = vmatpush.bf16.msrb.mxu0 %v5157_v15  ;;  %v763_v24 = vrot.slane %v761_v3, 1  ;;  %v518_v36 = vshll.u32 %v419_v58, 16 }
  0x6b   : > { %7459 = vst [vmem:[#allocation18_spill] sm:$0xff] %v5862_v63  ;;  %v665_v13 = vshll.u32 %v5862_v63, 16  ;;  %v663_v28 = vshrl.u32 %v5862_v63, 16  ;;  %v517_v35 = vrot.slane %v515_v14, 7  ;;  %v462_v39 = vshll.u32 %v411_v1, 16 }
  0x6c   : > { %v461_v38 = vrot.slane %v459_v17, 7  ;;  %v337_v41 = vpack.c.bf16 %v305_v18, %v305_v18  ;;  %v338_v43 = vpack.c.bf16 %v306_v21, %v306_v21  ;;  %v321_v44 = vpack.c.bf16 %v289_v30, %v289_v30  ;;  %v5140_v18 = vld [vmem:[#allocation5 + $0x88] sm:$0xff] }
  0x6d   : > { %v667_v32 = vrot.slane %v665_v13, 1  ;;  %v322_v45 = vpack.c.bf16 %v290_v31, %v290_v31  ;;  %v764_v47 = vor.u32 %v763_v24, %v759_v22  ;;  %v768_v49 = vrot.slane %v766_v26, 1  ;;  %v5148_v21 = vld [vmem:[#allocation5 + $0xc8] sm:$0xff]  ;;  %v5170_v26 = vld [vmem:[#allocation5 + $0x178] sm:$0xff]  ;;  %1702 = vmatpush.bf16.msrb.mxu2 %v5140_v18 }
  0x6e   : > { %v520_v51 = vor.u32 %v518_v36, %v517_v35  ;;  %v672_v52 = vrot.slane %v670_v33, 1  ;;  %v464_v53 = vor.u32 %v462_v39, %v461_v38  ;;  %v401_v54 = vunpack.c.l.b16 %v337_v41  ;;  %v5156_v24 = vld [vmem:[#allocation5 + $0x108] sm:$0xff]  ;;  %1791 = vmatpush.bf16.msrb.mxu3 %v5148_v21  ;;  %1963 = vmatpush.bf16.msrb.mxu1 %v5170_v26  ;;  %v307_v33 = vld [vmem:[%s5695_s16 + $0xe0] sm:$0xff] }
  0x6f   : > { %v668_v50 = vor.u32 %v667_v32, %v663_v28  ;;  %v402_v55 = vunpack.c.l.b16 %v338_v43  ;;  %v385_v3 = vunpack.c.l.b16 %v321_v44  ;;  %v386_v4 = vunpack.c.l.b16 %v322_v45  ;;  %1880 = vmatpush.bf16.msrb.mxu0 %v5156_v24  ;;  %v308_v36 = vld [vmem:[%s5695_s16 + $0xe8] sm:$0xff]  ;;  %v291_v43 = vld [vmem:[%s5695_s16 + $0x60] sm:$0xff] }
  0x70   : > { %v5887_v5 = vsel %vm613_vm3, %v764_v47, %v768_v49  ;;  %v5891_v58 = vsel %vm5712_vm2, 0, %v520_v51  ;;  %v5898_v13 = vsel %vm5712_vm2, 0, %v464_v53  ;;  %v5908_v28 = vsel %vm5712_vm2, %v517_v35, 0  ;;  %v292_v44 = vld [vmem:[%s5695_s16 + $0x68] sm:$0xff] }
  0x71   : > { %7461 = vst [vmem:[#allocation20_spill] sm:$0xff] %v5887_v5  ;;  %v5894_v1 = vsel %vm613_vm3, %v668_v50, %v672_v52  ;;  %v420_v14 = vpack.c.b16 %v402_v55, %v401_v54  ;;  %v412_v15 = vpack.c.b16 %v386_v4, %v385_v3  ;;  %v773_v17 = vshll.u32 %v5891_v58, 16 }
  0x72   : > { %7462 = vst [vmem:[#allocation21_spill] sm:$0xff] %v5891_v58  ;;  %v677_v22 = vshll.u32 %v5898_v13, 16  ;;  %v5912_v30 = vsel %vm5712_vm2, %v461_v38, 0  ;;  %v771_v39 = vshrl.u32 %v5891_v58, 16  ;;  %v778_v35 = vshll.u32 %v5908_v28, 16 }
  0x73   : > { %7463 = vst [vmem:[#allocation22_spill] sm:$0xff] %v5894_v1  ;;  %v522_v31 = vshrl.u32 %v420_v14, 16  ;;  %v466_v32 = vshrl.u32 %v412_v15, 16  ;;  %v775_v41 = vrot.slane %v773_v17, 1  ;;  %v675_v45 = vshrl.u32 %v5898_v13, 16 }
  0x74   : > { %1536 = vmatmul.bf16.gmra.mxu0 %v5792_v11  ;;  %1576 = vmatmul.bf16.gmra.mxu2 %v5783_v8  ;;  %7464 = vst [vmem:[#allocation23_spill] sm:$0xff] %v5898_v13  ;;  %v679_v47 = vrot.slane %v677_v22, 1  ;;  %v682_v38 = vshll.u32 %v5912_v30, 16  ;;  %v525_v50 = vshll.u32 %v420_v14, 16  ;;  %v339_v51 = vpack.c.bf16 %v307_v33, %v307_v33 }
  0x75   : > { %1665 = vmatmul.bf16.gmra.mxu3 %v5815_v60  ;;  %7465 = vst [vmem:[#allocation24_spill] sm:$0xff] %v5908_v28  ;;  %v524_v49 = vrot.slane %v522_v31, 7  ;;  %v340_v52 = vpack.c.bf16 %v308_v36, %v308_v36  ;;  %v468_v53 = vrot.slane %v466_v32, 7  ;;  %v469_v54 = vshll.u32 %v412_v15, 16  ;;  %v5169_v36 = vld [vmem:[#allocation5 + $0x170] sm:$0xff] }
  0x76   : > { %v323_v55 = vpack.c.bf16 %v291_v43, %v291_v43  ;;  %v324_v3 = vpack.c.bf16 %v292_v44, %v292_v44  ;;  %v776_v4 = vor.u32 %v775_v41, %v771_v39  ;;  %v780_v18 = vrot.slane %v778_v35, 1  ;;  %v5139_v39 = vld [vmem:[#allocation5 + $0x80] sm:$0xff]  ;;  %1964 = vmatpush.bf16.msrb.mxu1 %v5169_v36 }
  0x77   : > { %1625 = vmatmul.bf16.gmra.mxu1 %v5826_v0  ;;  %v680_v17 = vor.u32 %v679_v47, %v675_v45  ;;  %v684_v21 = vrot.slane %v682_v38, 1  ;;  %v527_v24 = vor.u32 %v525_v50, %v524_v49  ;;  %v403_v26 = vunpack.c.l.b16 %v339_v51  ;;  %v5147_v41 = vld [vmem:[#allocation5 + $0xc0] sm:$0xff]  ;;  %1703 = vmatpush.bf16.msrb.mxu2 %v5139_v39  ;;  %v5166_v39 = vld [vmem:[#allocation5 + $0x158] sm:$0xff] }
  0x78   : > { %v404_v23 = vunpack.c.l.b16 %v340_v52  ;;  %v471_v28 = vor.u32 %v469_v54, %v468_v53  ;;  %v388_v22 = vunpack.c.l.b16 %v324_v3  ;;  %v5923_v6 = vsel %vm613_vm3, %v776_v4, %v780_v18  ;;  %v5155_v44 = vld [vmem:[#allocation5 + $0x100] sm:$0xff]  ;;  %1792 = vmatpush.bf16.msrb.mxu3 %v5147_v41 }
  0x79   : > { %7466 = vst [vmem:[#allocation25_spill] sm:$0xff] %v5923_v6  ;;  %v5926_v14 = vsel %vm613_vm3, %v680_v17, %v684_v21  ;;  %v5930_v15 = vsel %vm5712_vm2, 0, %v527_v24  ;;  %1881 = vmatpush.bf16.msrb.mxu0 %v5155_v44  ;;  %v5167_v4 = vld [vmem:[#allocation5 + $0x160] sm:$0xff]  ;;  %v5165_v44 = vld [vmem:[#allocation5 + $0x150] sm:$0xff] }
  0x7a   : > { %7467 = vst [vmem:[#allocation26_spill] sm:$0xff] %v5926_v14  ;;  %v421_v31 = vpack.c.b16 %v404_v23, %v403_v26  ;;  %v5936_v32 = vsel %vm5712_vm2, 0, %v471_v28  ;;  %v785_v43 = vshll.u32 %v5930_v15, 16  ;;  %v5943_v23 = vsel %vm5712_vm2, %v524_v49, 0 }
  0x7b   : > { %7468 = vst [vmem:[#allocation27_spill] sm:$0xff] %v5936_v32  ;;  %v689_v35 = vshll.u32 %v5936_v32, 16  ;;  %v5948_v28 = vsel %vm5712_vm2, %v468_v53, 0  ;;  %v783_v38 = vshrl.u32 %v5930_v15, 16  ;;  %v790_v51 = vshll.u32 %v5943_v23, 16 }
  0x7c   : > { %v529_v45 = vshrl.u32 %v421_v31, 16  ;;  %v787_v50 = vrot.slane %v785_v43, 1  ;;  %v687_v49 = vshrl.u32 %v5936_v32, 16  ;;  %v694_v54 = vshll.u32 %v5948_v28, 16 }
  0x7d   : > { %v691_v52 = vrot.slane %v689_v35, 1  ;;  %v532_v3 = vshll.u32 %v421_v31, 16  ;;  %v792_v21 = vrot.slane %v790_v51, 1  ;;  %v5178_v35 = vld [vmem:[#allocation5 + $0x1b8] sm:$0xff]  ;;  %v5164_v51 = vld [vmem:[#allocation5 + $0x148] sm:$0xff] }
  0x7e   : > { %v788_v17 = vor.u32 %v787_v50, %v783_v38  ;;  %v696_v26 = vrot.slane %v694_v54, 1  ;;  %2052 = vmatpush.bf16.msra.mxu2 %v5178_v35  ;;  %v858_v35 = vrot.slane %v5756_v25, 1 }
  0x7f   : > { %v692_v24 = vor.u32 %v691_v52, %v687_v49 }
  0x80   : > { %v5955_v41 = vsel %vm613_vm3, %v788_v17, %v792_v21  ;;  %v5194_v17 = vld [vmem:[#allocation5 + $0x238] sm:$0xff] }
  0x81   : > { %v5958_v43 = vsel %vm613_vm3, %v692_v24, %v696_v26  ;;  %2230 = vmatpush.bf16.msra.mxu0 %v5194_v17 }
  0x82   : > { %7469 = vst [vmem:[#allocation28_spill] sm:$0xff] %v5958_v43 }
  0x84   : > { %1541 = vmatmul.bf16.gmra.mxu0 %v5819_v61  ;;  %1581 = vmatmul.bf16.gmra.mxu2 %v5823_v62 }
  0x85   : > { %1670 = vmatmul.bf16.gmra.mxu3 %v5851_v56 }
  0x87   : > { %1630 = vmatmul.bf16.gmra.mxu1 %v5858_v59 }
  0x94   : > { %1546 = vmatmul.bf16.gmra.mxu0 %v5862_v63  ;;  %1586 = vmatmul.bf16.gmra.mxu2 %v5855_v57 }
  0x95   : > { %1675 = vmatmul.bf16.gmra.mxu3 %v5887_v5  ;;  %v387_v5 = vunpack.c.l.b16 %v323_v55  ;;  %v531_v55 = vrot.slane %v529_v45, 7  ;;  %v5186_v45 = vld [vmem:[#allocation5 + $0x1f8] sm:$0xff] }
  0x96   : > { %2141 = vmatpush.bf16.msra.mxu3 %v5186_v45  ;;  %v859_v45 = vrot.slane %v5773_v42, 1  ;;  %v5177_v42 = vld [vmem:[#allocation5 + $0x1b0] sm:$0xff] }
  0x97   : > { %1635 = vmatmul.bf16.gmra.mxu1 %v5894_v1  ;;  %v413_v33 = vpack.c.b16 %v388_v22, %v387_v5  ;;  %v5168_v5 = vld [vmem:[#allocation5 + $0x168] sm:$0xff]  ;;  %v534_v22 = vor.u32 %v532_v3, %v531_v55  ;;  %2053 = vmatpush.bf16.msra.mxu2 %v5177_v42 }
  0x98   : > { %1965 = vmatpush.bf16.msrb.mxu1 %v5168_v5 }
  0x99   : > { %v473_v47 = vshrl.u32 %v413_v33, 16  ;;  %v476_v53 = vshll.u32 %v413_v33, 16  ;;  %v5962_v31 = vsel %vm5712_vm2, 0, %v534_v22 }
  0x9a   : > { %v797_v5 = vshll.u32 %v5962_v31, 16  ;;  %v795_v49 = vshrl.u32 %v5962_v31, 16 }
  0x9b   : > { %v475_v18 = vrot.slane %v473_v47, 7  ;;  %v5975_v47 = vsel %vm5712_vm2, %v531_v55, 0 }
  0x9c   : > { %1966 = vmatpush.bf16.msrb.mxu1 %v5167_v4  ;;  %v799_v52 = vrot.slane %v797_v5, 1  ;;  %v802_v54 = vshll.u32 %v5975_v47, 16  ;;  %v6003_v5 = vld [vmem:[%s7375_s2] ss:$0 sm:$0xff] }
  0x9d   : > { %v478_v36 = vor.u32 %v476_v53, %v475_v18  ;;  %v5980_v50 = vsel %vm5712_vm2, %v475_v18, 0  ;;  %v5163_v53 = vld [vmem:[#allocation5 + $0x140] sm:$0xff] }
  0x9e   : > { %v706_v55 = vshll.u32 %v5980_v50, 16  ;;  %v800_v21 = vor.u32 %v799_v52, %v795_v49  ;;  %v804_v24 = vrot.slane %v802_v54, 1  ;;  %v860_v54 = vsel %vm854_vm4, %v858_v35, %v859_v45 }
  0x9f   : > { %v5968_v33 = vsel %vm5712_vm2, 0, %v478_v36 }
  0xa0   : > { %1967 = vmatpush.bf16.msrb.mxu1 %v5166_v39  ;;  %7470 = vst [vmem:[#allocation29_spill] sm:$0xff] %v5968_v33  ;;  %v701_v38 = vshll.u32 %v5968_v33, 16  ;;  %v699_v3 = vshrl.u32 %v5968_v33, 16  ;;  %v708_v26 = vrot.slane %v706_v55, 1  ;;  %v5987_v22 = vsel %vm613_vm3, %v800_v21, %v804_v24 }
  0xa1   : > { %7471 = vst [vmem:[#allocation30_spill] sm:$0xff] %v5987_v22  ;;  %v855_v39 = vrot.slane %v5718_v37, 1  ;;  %v868_v37 = vrot.slane %v5876_v16, 1 }
  0xa2   : > { %v703_v4 = vrot.slane %v701_v38, 1 }
  0xa4   : > { %1551 = vmatmul.bf16.gmra.mxu0 %v5898_v13  ;;  %1591 = vmatmul.bf16.gmra.mxu2 %v5891_v58  ;;  %v704_v18 = vor.u32 %v703_v4, %v699_v3  ;;  %v5185_v3 = vld [vmem:[#allocation5 + $0x1f0] sm:$0xff] }
  0xa5   : > { %1680 = vmatmul.bf16.gmra.mxu3 %v5923_v6  ;;  %1968 = vmatpush.bf16.msrb.mxu1 %v5165_v44  ;;  %v856_v44 = vrot.slane %v5734_v48, 1 }
  0xa6   : > { %v5990_v36 = vsel %vm613_vm3, %v704_v18, %v708_v26  ;;  %2142 = vmatpush.bf16.msra.mxu3 %v5185_v3  ;;  %v5193_v26 = vld [vmem:[#allocation5 + $0x230] sm:$0xff] }
  0xa7   : > { %1640 = vmatmul.bf16.gmra.mxu1 %v5926_v14  ;;  %7472 = vst [vmem:[#allocation31_spill] sm:$0xff] %v5990_v36  ;;  %2231 = vmatpush.bf16.msra.mxu0 %v5193_v26 }
  0xa9   : > { %1969 = vmatpush.bf16.msrb.mxu1 %v5164_v51  ;;  %v6006_v51 = vsel %vm854_vm4, %v855_v39, %v856_v44  ;;  %v861_v39 = vrot.slane %v5792_v11, 1  ;;  %v862_v44 = vrot.slane %v5808_v29, 1 }
  0xaa   : > { %7473 = vst [vmem:[#allocation32_spill] sm:$0xff] %v6006_v51 }
  0xab   : > { %v6028_v3 = vsel %vm854_vm4, %v861_v39, %v862_v44  ;;  %v864_v39 = vrot.slane %v5819_v61, 1  ;;  %v865_v44 = vrot.slane %v5840_v9, 1  ;;  %v5176_v9 = vld [vmem:[#allocation5 + $0x1a8] sm:$0xff] }
  0xac   : > { %2054 = vmatpush.bf16.msra.mxu2 %v5176_v9 }
  0xad   : > { %1970 = vmatpush.bf16.msrb.mxu1 %v5163_v53 }
  0xb4   : > { %1556 = vmatmul.bf16.gmra.mxu0 %v5936_v32  ;;  %1596 = vmatmul.bf16.gmra.mxu2 %v5930_v15 }
  0xb5   : > { %1685 = vmatmul.bf16.gmra.mxu3 %v5955_v41 }
  0xb7   : > { %1645 = vmatmul.bf16.gmra.mxu1 %v5958_v43 }
  0xc4   : > { %1561 = vmatmul.bf16.gmra.mxu0 %v5968_v33  ;;  %1601 = vmatmul.bf16.gmra.mxu2 %v5962_v31 }
  0xc5   : > { %1690 = vmatmul.bf16.gmra.mxu3 %v5987_v22 }
  0xc7   : > { %1650 = vmatmul.bf16.gmra.mxu1 %v5990_v36 }
  0xd1   : > { %v1527_v38 = vpop.f32.mrf.mxu0 }
  0xd2   : > { %v1528_v49 = vadd.f32 %v6003_v5, %v1527_v38 }
  0xd4   : > { %v1616_v52 = vpop.f32.mrf.mxu1  ;;  %1704 = vmatmul.bf16.vlgmr.msrb.gmra.mxu2 %v6006_v51  ;;  %1882 = vmatmul.bf16.vlgmr.msrb.gmra.mxu0 %v5786_v10  ;;  %v867_v51 = vrot.slane %v5862_v63, 1 }
  0xd5   : > { %v6012_v48 = vadd.f32 %v1616_v52, %v1528_v49  ;;  %1793 = vmatmul.bf16.vlgmr.msrb.gmra.mxu3 %v5756_v25 }
  0xd7   : > { %1971 = vmatmul.bf16.vlgmr.msrb.gmra.mxu1 %v860_v54  ;;  %v1567_v4 = vpop.f32.mrf.mxu2 }
  0xd8   : > { %v1568_v55 = vadd.f32 %v6003_v5, %v1567_v4  ;;  %v1656_v53 = vpop.f32.mrf.mxu3 }
  0xd9   : > { %v1529_v17 = vpop.f32.mrf.mxu0 }
  0xda   : > { %v6016_v21 = vadd.f32 %v1656_v53, %v1568_v55  ;;  %v1530_v24 = vadd.f32 %v6003_v5, %v1529_v17 }
  0xdc   : > { %v1618_v18 = vpop.f32.mrf.mxu1 }
  0xdd   : > { %v6019_v10 = vadd.f32 %v1618_v18, %v1530_v24 }
  0xdf   : > { %v1569_v25 = vpop.f32.mrf.mxu2 }
  0xe0   : > { %v1570_v35 = vadd.f32 %v6003_v5, %v1569_v25  ;;  %v1658_v45 = vpop.f32.mrf.mxu3 }
  0xe1   : > { %v1532_v38 = vpop.f32.mrf.mxu0 }
  0xe2   : > { %v6024_v49 = vadd.f32 %v1658_v45, %v1570_v35  ;;  %v1533_v52 = vadd.f32 %v6003_v5, %v1532_v38 }
  0xe4   : > { %v1621_v42 = vpop.f32.mrf.mxu1  ;;  %1709 = vmatmul.bf16.gmra.mxu2 %v860_v54  ;;  %1887 = vmatmul.bf16.gmra.mxu0 %v5826_v0 }
  0xe5   : > { %v6031_v4 = vadd.f32 %v1621_v42, %v1533_v52  ;;  %1798 = vmatmul.bf16.gmra.mxu3 %v5792_v11 }
  0xe7   : > { %1976 = vmatmul.bf16.gmra.mxu1 %v6028_v3  ;;  %v1572_v29 = vpop.f32.mrf.mxu2 }
  0xe8   : > { %v1573_v55 = vadd.f32 %v6003_v5, %v1572_v29  ;;  %v1661_v53 = vpop.f32.mrf.mxu3 }
  0xe9   : > { %v1534_v17 = vpop.f32.mrf.mxu0 }
  0xea   : > { %v6036_v24 = vadd.f32 %v1661_v53, %v1573_v55  ;;  %v1535_v18 = vadd.f32 %v6003_v5, %v1534_v17  ;;  %v6048_v55 = vsel %vm854_vm4, %v864_v39, %v865_v44  ;;  %v5184_v17 = vld [vmem:[#allocation5 + $0x1e8] sm:$0xff] }
  0xeb   : > { %2143 = vmatpush.bf16.msra.mxu3 %v5184_v17 }
  0xec   : > { %v1623_v26 = vpop.f32.mrf.mxu1 }
  0xed   : > { %v6039_v25 = vadd.f32 %v1623_v26, %v1535_v18 }
  0xef   : > { %v1574_v54 = vpop.f32.mrf.mxu2 }
  0xf0   : > { %v1575_v35 = vadd.f32 %v6003_v5, %v1574_v54  ;;  %v1663_v45 = vpop.f32.mrf.mxu3 }
  0xf1   : > { %v1537_v38 = vpop.f32.mrf.mxu0 }
  0xf2   : > { %v6044_v52 = vadd.f32 %v1663_v45, %v1575_v35  ;;  %v1538_v42 = vadd.f32 %v6003_v5, %v1537_v38 }
  0xf4   : > { %7474 = vst [vmem:[#allocation33_spill] sm:$0xff] %v6044_v52  ;;  %v1626_v29 = vpop.f32.mrf.mxu1  ;;  %1714 = vmatmul.bf16.gmra.mxu2 %v6028_v3  ;;  %1892 = vmatmul.bf16.gmra.mxu0 %v5858_v59 }
  0xf5   : > { %v6052_v53 = vadd.f32 %v1626_v29, %v1538_v42  ;;  %1803 = vmatmul.bf16.gmra.mxu3 %v5819_v61  ;;  %v5192_v42 = vld [vmem:[#allocation5 + $0x228] sm:$0xff] }
  0xf6   : > { %2232 = vmatpush.bf16.msra.mxu0 %v5192_v42 }
  0xf7   : > { %1981 = vmatmul.bf16.gmra.mxu1 %v6048_v55  ;;  %v1577_v18 = vpop.f32.mrf.mxu2 }
  0xf8   : > { %v1578_v26 = vadd.f32 %v6003_v5, %v1577_v18  ;;  %v1666_v54 = vpop.f32.mrf.mxu3 }
  0xf9   : > { %v1539_v39 = vpop.f32.mrf.mxu0 }
  0xfa   : > { %v6057_v44 = vadd.f32 %v1666_v54, %v1578_v26  ;;  %v1540_v35 = vadd.f32 %v6003_v5, %v1539_v39  ;;  %v6069_v39 = vsel %vm854_vm4, %v867_v51, %v868_v37 }
  0xfc   : > { %7475 = vst [vmem:[#allocation34_spill] sm:$0xff] %v6057_v44  ;;  %v1628_v45 = vpop.f32.mrf.mxu1 }
  0xfd   : > { %v6060_v38 = vadd.f32 %v1628_v45, %v1540_v35 }
  0xff   : > { %v1579_v29 = vpop.f32.mrf.mxu2 }
 0x100   : > { %v1580_v9 = vadd.f32 %v6003_v5, %v1579_v29  ;;  %v1668_v17 = vpop.f32.mrf.mxu3 }
 0x101   : > { %v1542_v18 = vpop.f32.mrf.mxu0 }
 0x102   : > { %v6065_v52 = vadd.f32 %v1668_v17, %v1580_v9  ;;  %v1543_v26 = vadd.f32 %v6003_v5, %v1542_v18 }
 0x104   : > { %7476 = vst [vmem:[#allocation35_spill] sm:$0xff] %v6065_v52  ;;  %v1631_v54 = vpop.f32.mrf.mxu1  ;;  %1719 = vmatmul.bf16.gmra.mxu2 %v6048_v55  ;;  %1897 = vmatmul.bf16.gmra.mxu0 %v5894_v1 }
 0x105   : > { %v6073_v35 = vadd.f32 %v1631_v54, %v1543_v26  ;;  %1808 = vmatmul.bf16.gmra.mxu3 %v5862_v63  ;;  %v870_v26 = vrot.slane %v5898_v13, 1  ;;  %v871_v54 = vrot.slane %v5912_v30, 1  ;;  %v5175_v30 = vld [vmem:[#allocation5 + $0x1a0] sm:$0xff] }
 0x106   : > { %2055 = vmatpush.bf16.msra.mxu2 %v5175_v30 }
 0x107   : > { %1986 = vmatmul.bf16.gmra.mxu1 %v6069_v39  ;;  %v1582_v16 = vpop.f32.mrf.mxu2 }
 0x108   : > { %v1583_v45 = vadd.f32 %v6003_v5, %v1582_v16  ;;  %v1671_v42 = vpop.f32.mrf.mxu3 }
 0x109   : > { %v1544_v29 = vpop.f32.mrf.mxu0 }
 0x10a   : > { %v6078_v9 = vadd.f32 %v1671_v42, %v1583_v45  ;;  %v1545_v37 = vadd.f32 %v6003_v5, %v1544_v29  ;;  %v6090_v42 = vsel %vm854_vm4, %v870_v26, %v871_v54 }
 0x10c   : > { %7477 = vst [vmem:[#allocation36_spill] sm:$0xff] %v6078_v9  ;;  %v1633_v51 = vpop.f32.mrf.mxu1  ;;  %v873_v9 = vrot.slane %v5936_v32, 1 }
 0x10d   : > { %v6081_v17 = vadd.f32 %v1633_v51, %v1545_v37  ;;  %v5183_v37 = vld [vmem:[#allocation5 + $0x1e0] sm:$0xff] }
 0x10e   : > { %2144 = vmatpush.bf16.msra.mxu3 %v5183_v37 }
 0x10f   : > { %v1584_v18 = vpop.f32.mrf.mxu2 }
 0x110   : > { %v1585_v52 = vadd.f32 %v6003_v5, %v1584_v18  ;;  %v1673_v44 = vpop.f32.mrf.mxu3 }
 0x111   : > { %v1547_v1 = vpop.f32.mrf.mxu0 }
 0x112   : > { %v6086_v63 = vadd.f32 %v1673_v44, %v1585_v52  ;;  %v1548_v16 = vadd.f32 %v6003_v5, %v1547_v1 }
 0x114   : > { %7478 = vst [vmem:[#allocation37_spill] sm:$0xff] %v6086_v63  ;;  %v1636_v45 = vpop.f32.mrf.mxu1  ;;  %1724 = vmatmul.bf16.gmra.mxu2 %v6069_v39  ;;  %1902 = vmatmul.bf16.gmra.mxu0 %v5926_v14  ;;  %v874_v14 = vrot.slane %v5948_v28, 1 }
 0x115   : > { %v6094_v29 = vadd.f32 %v1636_v45, %v1548_v16  ;;  %1813 = vmatmul.bf16.gmra.mxu3 %v5898_v13  ;;  %v5191_v45 = vld [vmem:[#allocation5 + $0x220] sm:$0xff] }
 0x116   : > { %2233 = vmatpush.bf16.msra.mxu0 %v5191_v45 }
 0x117   : > { %1991 = vmatmul.bf16.gmra.mxu1 %v6090_v42  ;;  %v1587_v52 = vpop.f32.mrf.mxu2 }
 0x118   : > { %v1588_v1 = vadd.f32 %v6003_v5, %v1587_v52  ;;  %v1676_v44 = vpop.f32.mrf.mxu3 }
 0x119   : > { %v1549_v51 = vpop.f32.mrf.mxu0 }
 0x11a   : > { %v6099_v18 = vadd.f32 %v1676_v44, %v1588_v1  ;;  %v1550_v26 = vadd.f32 %v6003_v5, %v1549_v51  ;;  %v6111_v51 = vsel %vm854_vm4, %v873_v9, %v874_v14 }
 0x11c   : > { %7479 = vst [vmem:[#allocation38_spill] sm:$0xff] %v6099_v18  ;;  %v1638_v54 = vpop.f32.mrf.mxu1 }
 0x11d   : > { %v6102_v16 = vadd.f32 %v1638_v54, %v1550_v26 }
 0x11f   : > { %v1589_v63 = vpop.f32.mrf.mxu2 }
 0x120   : > { %v1590_v30 = vadd.f32 %v6003_v5, %v1589_v63  ;;  %v1678_v37 = vpop.f32.mrf.mxu3 }
 0x121   : > { %v1552_v52 = vpop.f32.mrf.mxu0 }
 0x122   : > { %v6107_v13 = vadd.f32 %v1678_v37, %v1590_v30  ;;  %v1553_v1 = vadd.f32 %v6003_v5, %v1552_v52 }
 0x124   : > { %7480 = vst [vmem:[#allocation39_spill] sm:$0xff] %v6107_v13  ;;  %v1641_v44 = vpop.f32.mrf.mxu1  ;;  %1729 = vmatmul.bf16.gmra.mxu2 %v6090_v42  ;;  %1907 = vmatmul.bf16.gmra.mxu0 %v5958_v43 }
 0x125   : > { %v6115_v26 = vadd.f32 %v1641_v44, %v1553_v1  ;;  %1818 = vmatmul.bf16.gmra.mxu3 %v5936_v32  ;;  %v876_v1 = vrot.slane %v5968_v33, 1  ;;  %v877_v44 = vrot.slane %v5980_v50, 1  ;;  %v5174_v50 = vld [vmem:[#allocation5 + $0x198] sm:$0xff] }
 0x126   : > { %2056 = vmatpush.bf16.msra.mxu2 %v5174_v50 }
 0x127   : > { %1996 = vmatmul.bf16.gmra.mxu1 %v6111_v51  ;;  %v1592_v63 = vpop.f32.mrf.mxu2 }
 0x128   : > { %v1593_v28 = vadd.f32 %v6003_v5, %v1592_v63  ;;  %v1681_v54 = vpop.f32.mrf.mxu3 }
 0x129   : > { %v1554_v45 = vpop.f32.mrf.mxu0 }
 0x12a   : > { %v6120_v30 = vadd.f32 %v1681_v54, %v1593_v28  ;;  %v1555_v14 = vadd.f32 %v6003_v5, %v1554_v45  ;;  %v6132_v54 = vsel %vm854_vm4, %v876_v1, %v877_v44 }
 0x12c   : > { %7481 = vst [vmem:[#allocation40_spill] sm:$0xff] %v6120_v30  ;;  %v1643_v9 = vpop.f32.mrf.mxu1  ;;  %v879_v30 = vrot.slane %v5722_v40, 1 }
 0x12d   : > { %v6123_v37 = vadd.f32 %v1643_v9, %v1555_v14  ;;  %v5182_v14 = vld [vmem:[#allocation5 + $0x1d8] sm:$0xff] }
 0x12e   : > { %2145 = vmatpush.bf16.msra.mxu3 %v5182_v14 }
 0x12f   : > { %v1594_v52 = vpop.f32.mrf.mxu2 }
 0x130   : > { %v1595_v13 = vadd.f32 %v6003_v5, %v1594_v52  ;;  %v1683_v18 = vpop.f32.mrf.mxu3 }
 0x131   : > { %v1557_v43 = vpop.f32.mrf.mxu0 }
 0x132   : > { %v6128_v32 = vadd.f32 %v1683_v18, %v1595_v13  ;;  %v1558_v63 = vadd.f32 %v6003_v5, %v1557_v43 }
 0x134   : > { %7482 = vst [vmem:[#allocation41_spill] sm:$0xff] %v6128_v32  ;;  %v1646_v28 = vpop.f32.mrf.mxu1  ;;  %1734 = vmatmul.bf16.gmra.mxu2 %v6111_v51  ;;  %1912 = vmatmul.bf16.gmra.mxu0 %v5990_v36  ;;  %v880_v36 = vrot.slane %v5729_v46, 1  ;;  %v5202_v46 = vld [vmem:[#allocation7 + $0x38] sm:$0xff] }
 0x135   : > { %v6136_v45 = vadd.f32 %v1646_v28, %v1558_v63  ;;  %1823 = vmatmul.bf16.gmra.mxu3 %v5968_v33  ;;  %v5190_v28 = vld [vmem:[#allocation5 + $0x218] sm:$0xff]  ;;  %3523 = vmatpush.bf16.msra.mxu1 %v5202_v46 }
 0x136   : > { %2234 = vmatpush.bf16.msra.mxu0 %v5190_v28 }
 0x137   : > { %2001 = vmatmul.bf16.gmra.mxu1 %v6132_v54  ;;  %v1597_v13 = vpop.f32.mrf.mxu2 }
 0x138   : > { %v1598_v43 = vadd.f32 %v6003_v5, %v1597_v13  ;;  %v1686_v18 = vpop.f32.mrf.mxu3 }
 0x139   : > { %v1559_v9 = vpop.f32.mrf.mxu0 }
 0x13a   : > { %v6141_v52 = vadd.f32 %v1686_v18, %v1598_v43  ;;  %v1560_v1 = vadd.f32 %v6003_v5, %v1559_v9  ;;  %v6153_v9 = vsel %vm854_vm4, %v879_v30, %v880_v36 }
 0x13b   : > { %7485 = vst [vmem:[#allocation44_spill] sm:$0xff] %v6153_v9 }
 0x13c   : > { %7483 = vst [vmem:[#allocation42_spill] sm:$0xff] %v6141_v52  ;;  %v1648_v44 = vpop.f32.mrf.mxu1 }
 0x13d   : > { %v6144_v63 = vadd.f32 %v1648_v44, %v1560_v1 }
 0x13f   : > { %v1599_v32 = vpop.f32.mrf.mxu2 }
 0x140   : > { %v1600_v50 = vadd.f32 %v6003_v5, %v1599_v32  ;;  %v1688_v14 = vpop.f32.mrf.mxu3 }
 0x141   : > { %v1562_v13 = vpop.f32.mrf.mxu0 }
 0x142   : > { %v6149_v33 = vadd.f32 %v1688_v14, %v1600_v50  ;;  %v1563_v43 = vadd.f32 %v6003_v5, %v1562_v13 }
 0x144   : > { %7484 = vst [vmem:[#allocation43_spill] sm:$0xff] %v6149_v33  ;;  %v1651_v18 = vpop.f32.mrf.mxu1  ;;  %1739 = vmatmul.bf16.gmra.mxu2 %v6132_v54  ;;  %1917 = vmatmul.bf16.gmra.mxu0 %v5743_v19  ;;  %v883_v33 = vrot.slane %v5761_v27, 1  ;;  %v5181_v27 = vld [vmem:[#allocation5 + $0x1d0] sm:$0xff] }
 0x145   : > { %v6157_v1 = vadd.f32 %v1651_v18, %v1563_v43  ;;  %1828 = vmatmul.bf16.gmra.mxu3 %v5722_v40  ;;  %v882_v18 = vrot.slane %v5747_v20, 1 }
 0x146   : > { %2146 = vmatpush.bf16.msra.mxu3 %v5181_v27 }
 0x147   : > { %2006 = vmatmul.bf16.gmra.mxu1 %v6153_v9  ;;  %v1602_v32 = vpop.f32.mrf.mxu2 }
 0x148   : > { %v1603_v44 = vadd.f32 %v6003_v5, %v1602_v32  ;;  %v1691_v28 = vpop.f32.mrf.mxu3 }
 0x149   : > { %v1564_v50 = vpop.f32.mrf.mxu0 }
 0x14a   : > { %v6162_v14 = vadd.f32 %v1691_v28, %v1603_v44  ;;  %v1565_v36 = vadd.f32 %v6003_v5, %v1564_v50  ;;  %v6173_v44 = vsel %vm854_vm4, %v882_v18, %v883_v33  ;;  %v5173_v28 = vld [vmem:[#allocation5 + $0x190] sm:$0xff] }
 0x14b   : > { %2057 = vmatpush.bf16.msra.mxu2 %v5173_v28  ;;  %v5189_v18 = vld [vmem:[#allocation5 + $0x210] sm:$0xff] }
 0x14c   : > { %7486 = vst [vmem:[#allocation45_spill] sm:$0xff] %v6162_v14  ;;  %v1653_v30 = vpop.f32.mrf.mxu1  ;;  %v885_v14 = vrot.slane %v5783_v8, 1  ;;  %2235 = vmatpush.bf16.msra.mxu0 %v5189_v18 }
 0x14d   : > { %v6165_v13 = vadd.f32 %v1653_v30, %v1565_v36 }
 0x14f   : > { %v1604_v43 = vpop.f32.mrf.mxu2 }
 0x150   : > { %v1605_v52 = vadd.f32 %v6003_v5, %v1604_v43  ;;  %v1693_v19 = vpop.f32.mrf.mxu3 }
 0x151   : > { %v1883_v40 = vpop.f32.mrf.mxu0 }
 0x152   : > { %v6170_v32 = vadd.f32 %v1693_v19, %v1605_v52 }
 0x154   : > { %7487 = vst [vmem:[#allocation46_spill] sm:$0xff] %v6170_v32  ;;  %v1972_v46 = vpop.f32.mrf.mxu1  ;;  %1744 = vmatmul.bf16.gmra.mxu2 %v6153_v9  ;;  %1922 = vmatmul.bf16.gmra.mxu0 %v5779_v7  ;;  %v886_v7 = vrot.slane %v5797_v12, 1  ;;  %v5201_v12 = vld [vmem:[#allocation7 + $0x30] sm:$0xff] }
 0x155   : > { %1833 = vmatmul.bf16.gmra.mxu3 %v5747_v20  ;;  %3524 = vmatpush.bf16.msra.mxu1 %v5201_v12 }
 0x156   : > { %v6186_v27 = vsel %vm854_vm4, %v885_v14, %v886_v7 }
 0x157   : > { %2011 = vmatmul.bf16.gmra.mxu1 %v6173_v44  ;;  %v1705_v50 = vpop.f32.mrf.mxu2 }
 0x158   : > { %v1706_v5 = vadd.f32 %v1705_v50, %v6012_v48  ;;  %v1794_v19 = vpop.f32.mrf.mxu3 }
 0x159   : > { %v1885_v52 = vpop.f32.mrf.mxu0 }
 0x15a   : > { %v1795_v36 = vadd.f32 %v1794_v19, %v1706_v5 }
 0x15c   : > { %v1974_v33 = vpop.f32.mrf.mxu1  ;;  %v1884_v30 = vadd.f32 %v1883_v40, %v1795_v36 }
 0x15e   : > { %v6180_v43 = vadd.f32 %v1972_v46, %v1884_v30 }
 0x15f   : > { %v1707_v32 = vpop.f32.mrf.mxu2 }
 0x160   : > { %v1708_v20 = vadd.f32 %v1707_v32, %v6019_v10  ;;  %v1796_v9 = vpop.f32.mrf.mxu3 }
 0x161   : > { %v1888_v28 = vpop.f32.mrf.mxu0 }
 0x162   : > { %v1797_v48 = vadd.f32 %v1796_v9, %v1708_v20 }
 0x164   : > { %v1977_v50 = vpop.f32.mrf.mxu1  ;;  %1749 = vmatmul.bf16.gmra.mxu2 %v6173_v44  ;;  %1927 = vmatmul.bf16.gmra.mxu0 %v5815_v60  ;;  %v1886_v40 = vadd.f32 %v1885_v52, %v1797_v48  ;;  %v888_v52 = vrot.slane %v5823_v62, 1 }
 0x165   : > { %1838 = vmatmul.bf16.gmra.mxu3 %v5783_v8 }
 0x166   : > { %v6191_v46 = vadd.f32 %v1974_v33, %v1886_v40  ;;  %v889_v33 = vrot.slane %v5833_v2, 1  ;;  %v5180_v2 = vld [vmem:[#allocation5 + $0x1c8] sm:$0xff] }
 0x167   : > { %2016 = vmatmul.bf16.gmra.mxu1 %v6186_v27  ;;  %v1710_v10 = vpop.f32.mrf.mxu2  ;;  %2147 = vmatpush.bf16.msra.mxu3 %v5180_v2 }
 0x168   : > { %7488 = vst [vmem:[#allocation47_spill] sm:$0xff] %v6191_v46  ;;  %v1711_v32 = vadd.f32 %v1710_v10, %v6031_v4  ;;  %v1799_v20 = vpop.f32.mrf.mxu3  ;;  %v6201_v4 = vsel %vm854_vm4, %v888_v52, %v889_v33 }
 0x169   : > { %v1890_v9 = vpop.f32.mrf.mxu0 }
 0x16a   : > { %v1800_v7 = vadd.f32 %v1799_v20, %v1711_v32 }
 0x16c   : > { %v1979_v14 = vpop.f32.mrf.mxu1  ;;  %v1889_v5 = vadd.f32 %v1888_v28, %v1800_v7 }
 0x16e   : > { %v6195_v19 = vadd.f32 %v1977_v50, %v1889_v5  ;;  %v5172_v50 = vld [vmem:[#allocation5 + $0x188] sm:$0xff] }
 0x16f   : > { %v1712_v36 = vpop.f32.mrf.mxu2  ;;  %2058 = vmatpush.bf16.msra.mxu2 %v5172_v50 }
 0x170   : > { %v1713_v30 = vadd.f32 %v1712_v36, %v6039_v25  ;;  %v1801_v18 = vpop.f32.mrf.mxu3 }
 0x171   : > { %v1893_v48 = vpop.f32.mrf.mxu0 }
 0x172   : > { %v1802_v40 = vadd.f32 %v1801_v18, %v1713_v30  ;;  %v7489_v30 = vld [vmem:[#allocation19_spill] sm:$0xff] }
 0x173   : > { %v892_v18 = vrot.slane %v7489_v30, 1 }
 0x174   : > { %v1982_v46 = vpop.f32.mrf.mxu1  ;;  %1754 = vmatmul.bf16.gmra.mxu2 %v6186_v27  ;;  %1932 = vmatmul.bf16.gmra.mxu0 %v5851_v56  ;;  %v1891_v28 = vadd.f32 %v1890_v9, %v1802_v40  ;;  %v5188_v9 = vld [vmem:[#allocation5 + $0x208] sm:$0xff] }
 0x175   : > { %1843 = vmatmul.bf16.gmra.mxu3 %v5823_v62  ;;  %2236 = vmatpush.bf16.msra.mxu0 %v5188_v9 }
 0x176   : > { %v6206_v12 = vadd.f32 %v1979_v14, %v1891_v28  ;;  %v891_v14 = vrot.slane %v5855_v57, 1 }
 0x177   : > { %2021 = vmatmul.bf16.gmra.mxu1 %v6201_v4  ;;  %v1715_v25 = vpop.f32.mrf.mxu2 }
 0x178   : > { %v1716_v10 = vadd.f32 %v1715_v25, %v6052_v53  ;;  %v1804_v32 = vpop.f32.mrf.mxu3  ;;  %v6216_v2 = vsel %vm854_vm4, %v891_v14, %v892_v18 }
 0x179   : > { %v1895_v20 = vpop.f32.mrf.mxu0 }
 0x17a   : > { %v1805_v7 = vadd.f32 %v1804_v32, %v1716_v10 }
 0x17c   : > { %v1984_v5 = vpop.f32.mrf.mxu1  ;;  %v1894_v36 = vadd.f32 %v1893_v48, %v1805_v7 }
 0x17e   : > { %v6210_v52 = vadd.f32 %v1982_v46, %v1894_v36  ;;  %v7490_v46 = vld [vmem:[#allocation20_spill] sm:$0xff] }
 0x17f   : > { %v1717_v33 = vpop.f32.mrf.mxu2 }
 0x180   : > { %v1718_v40 = vadd.f32 %v1717_v33, %v6060_v38  ;;  %v1806_v28 = vpop.f32.mrf.mxu3  ;;  %v5200_v38 = vld [vmem:[#allocation7 + $0x28] sm:$0xff] }
 0x181   : > { %v1898_v50 = vpop.f32.mrf.mxu0  ;;  %3525 = vmatpush.bf16.msra.mxu1 %v5200_v38 }
 0x182   : > { %v1807_v53 = vadd.f32 %v1806_v28, %v1718_v40  ;;  %v7493_v28 = vld [vmem:[#allocation24_spill] sm:$0xff] }
 0x184   : > { %v1987_v25 = vpop.f32.mrf.mxu1  ;;  %1759 = vmatmul.bf16.gmra.mxu2 %v6201_v4  ;;  %1937 = vmatmul.bf16.gmra.mxu0 %v7490_v46  ;;  %v1896_v48 = vadd.f32 %v1895_v20, %v1807_v53  ;;  %v894_v20 = vrot.slane %v5891_v58, 1 }
 0x185   : > { %1848 = vmatmul.bf16.gmra.mxu3 %v5855_v57 }
 0x186   : > { %v6221_v10 = vadd.f32 %v1984_v5, %v1896_v48  ;;  %v895_v5 = vrot.slane %v7493_v28, 1 }
 0x187   : > { %2026 = vmatmul.bf16.gmra.mxu1 %v6216_v2  ;;  %v1720_v32 = vpop.f32.mrf.mxu2 }
 0x188   : > { %7491 = vst [vmem:[#allocation19_spill] sm:$0xff] %v6221_v10  ;;  %v1721_v7 = vadd.f32 %v1720_v32, %v6073_v35  ;;  %v1809_v36 = vpop.f32.mrf.mxu3  ;;  %v6231_v38 = vsel %vm854_vm4, %v894_v20, %v895_v5 }
 0x189   : > { %v1900_v9 = vpop.f32.mrf.mxu0 }
 0x18a   : > { %v1810_v33 = vadd.f32 %v1809_v36, %v1721_v7 }
 0x18c   : > { %v1989_v14 = vpop.f32.mrf.mxu1  ;;  %v1899_v30 = vadd.f32 %v1898_v50, %v1810_v33  ;;  %v309_v33 = vld [vmem:[%s5695_s16 + $0xf0] sm:$0xff] }
 0x18e   : > { %v6225_v18 = vadd.f32 %v1987_v25, %v1899_v30  ;;  %v5171_v25 = vld [vmem:[#allocation5 + $0x180] sm:$0xff]  ;;  %v310_v30 = vld [vmem:[%s5695_s16 + $0xf8] sm:$0xff] }
 0x18f   : > { %v1722_v40 = vpop.f32.mrf.mxu2  ;;  %2059 = vmatpush.bf16.msra.mxu2 %v5171_v25  ;;  %v897_v25 = vrot.slane %v5930_v15, 1 }
 0x190   : > { %7492 = vst [vmem:[#allocation20_spill] sm:$0xff] %v6225_v18  ;;  %v1723_v53 = vadd.f32 %v1722_v40, %v6081_v17  ;;  %v1811_v48 = vpop.f32.mrf.mxu3  ;;  %v5179_v17 = vld [vmem:[#allocation5 + $0x1c0] sm:$0xff] }
 0x191   : > { %v1903_v10 = vpop.f32.mrf.mxu0  ;;  %2148 = vmatpush.bf16.msra.mxu3 %v5179_v17 }
 0x192   : > { %v1812_v35 = vadd.f32 %v1811_v48, %v1723_v53  ;;  %v341_v53 = vpack.c.bf16 %v309_v33, %v309_v33 }
 0x194   : > { %v1992_v32 = vpop.f32.mrf.mxu1  ;;  %1764 = vmatmul.bf16.gmra.mxu2 %v6216_v2  ;;  %1942 = vmatmul.bf16.gmra.mxu0 %v5923_v6  ;;  %v1901_v50 = vadd.f32 %v1900_v9, %v1812_v35  ;;  %v342_v9 = vpack.c.bf16 %v310_v30, %v310_v30 }
 0x195   : > { %1853 = vmatmul.bf16.gmra.mxu3 %v5891_v58  ;;  %v898_v58 = vrot.slane %v5943_v23, 1  ;;  %v5199_v23 = vld [vmem:[#allocation7 + $0x20] sm:$0xff] }
 0x196   : > { %v6236_v7 = vadd.f32 %v1989_v14, %v1901_v50  ;;  %v5187_v50 = vld [vmem:[#allocation5 + $0x200] sm:$0xff]  ;;  %v406_v18 = vunpack.c.l.b16 %v342_v9  ;;  %3526 = vmatpush.bf16.msra.mxu1 %v5199_v23 }
 0x197   : > { %2031 = vmatmul.bf16.gmra.mxu1 %v6231_v38  ;;  %v1725_v36 = vpop.f32.mrf.mxu2  ;;  %2237 = vmatpush.bf16.msra.mxu0 %v5187_v50 }
 0x198   : > { %7494 = vst [vmem:[#allocation24_spill] sm:$0xff] %v6236_v7  ;;  %v1726_v40 = vadd.f32 %v1725_v36, %v6094_v29  ;;  %v1814_v20 = vpop.f32.mrf.mxu3  ;;  %v405_v7 = vunpack.c.l.b16 %v341_v53 }
 0x199   : > { %v1905_v28 = vpop.f32.mrf.mxu0 }
 0x19a   : > { %v1815_v5 = vadd.f32 %v1814_v20, %v1726_v40  ;;  %v422_v30 = vpack.c.b16 %v406_v18, %v405_v7 }
 0x19c   : > { %v6242_v48 = vpop.f32.mrf.mxu1  ;;  %v1904_v35 = vadd.f32 %v1903_v10, %v1815_v5  ;;  %v6250_v10 = vsel %vm854_vm4, %v897_v25, %v898_v58  ;;  %v539_v53 = vshll.u32 %v422_v30, 16 }
 0x19e   : > { %v6244_v14 = vadd.f32 %v1992_v32, %v1904_v35 }
 0x19f   : > { %v1727_v6 = vpop.f32.mrf.mxu2 }
 0x1a0   : > { %v1728_v29 = vadd.f32 %v1727_v6, %v6102_v16  ;;  %v1816_v17 = vpop.f32.mrf.mxu3  ;;  %v536_v6 = vshrl.u32 %v422_v30, 16 }
 0x1a1   : > { %v1908_v36 = vpop.f32.mrf.mxu0 }
 0x1a2   : > { %v1817_v33 = vadd.f32 %v1816_v17, %v1728_v29  ;;  %v538_v5 = vrot.slane %v536_v6, 7  ;;  %v900_v29 = vrot.slane %v5962_v31, 1  ;;  %v901_v17 = vrot.slane %v5975_v47, 1 }
 0x1a4   : > { %v1997_v40 = vpop.f32.mrf.mxu1  ;;  %1769 = vmatmul.bf16.gmra.mxu2 %v6231_v38  ;;  %1947 = vmatmul.bf16.gmra.mxu0 %v5955_v41  ;;  %v6254_v32 = vadd.f32 %v1905_v28, %v1817_v33  ;;  %v541_v50 = vor.u32 %v539_v53, %v538_v5 }
 0x1a5   : > { %1858 = vmatmul.bf16.gmra.mxu3 %v5930_v15 }
 0x1a6   : > { %v6268_v6 = vsel %vm5712_vm2, 0, %v541_v50 }
 0x1a7   : > { %2036 = vmatmul.bf16.gmra.mxu1 %v6250_v10  ;;  %v1730_v16 = vpop.f32.mrf.mxu2  ;;  %v922_v47 = vshll.u32 %v6268_v6, 16 }
 0x1a8   : > { %v1731_v20 = vadd.f32 %v1730_v16, %v6115_v26  ;;  %v1819_v18 = vpop.f32.mrf.mxu3 }
 0x1a9   : > { %v1910_v7 = vpop.f32.mrf.mxu0  ;;  %v924_v50 = vrot.slane %v922_v47, 1 }
 0x1aa   : > { %v1820_v58 = vadd.f32 %v1819_v18, %v1731_v20 }
 0x1ac   : > { %v6259_v9 = vpop.f32.mrf.mxu1  ;;  %v1909_v35 = vadd.f32 %v1908_v36, %v1820_v58  ;;  %v6271_v36 = vsel %vm854_vm4, %v900_v29, %v901_v17 }
 0x1ad   : > { %7495 = vst [vmem:[#allocation48_spill] sm:$0xff] %v6259_v9 }
 0x1ae   : > { %v6261_v28 = vadd.f32 %v1997_v40, %v1909_v35  ;;  %v920_v35 = vshrl.u32 %v6268_v6, 16 }
 0x1af   : > { %v1732_v25 = vpop.f32.mrf.mxu2 }
 0x1b0   : > { %7496 = vst [vmem:[#allocation49_spill] sm:$0xff] %v6261_v28  ;;  %v1733_v33 = vadd.f32 %v1732_v25, %v6123_v37  ;;  %v1821_v26 = vpop.f32.mrf.mxu3  ;;  %v612_v37 = vsel %vm5712_vm2, %v538_v5, 0  ;;  %v934_v5 = vrot.slane %v6268_v6, 1 }
 0x1b1   : > { %v1913_v16 = vpop.f32.mrf.mxu0  ;;  %v927_v25 = vshll.u32 %v612_v37, 16 }
 0x1b2   : > { %v1822_v23 = vadd.f32 %v1821_v26, %v1733_v33  ;;  %v925_v33 = vor.u32 %v924_v50, %v920_v35 }
 0x1b3   : > { %v929_v26 = vrot.slane %v927_v25, 1 }
 0x1b4   : > { %v2002_v30 = vpop.f32.mrf.mxu1  ;;  %1774 = vmatmul.bf16.gmra.mxu2 %v6250_v10  ;;  %1952 = vmatmul.bf16.gmra.mxu0 %v5987_v22  ;;  %v6275_v40 = vadd.f32 %v1910_v7, %v1822_v23 }
 0x1b5   : > { %1863 = vmatmul.bf16.gmra.mxu3 %v5962_v31  ;;  %v6291_v22 = vsel %vm613_vm3, %v925_v33, %v929_v26 }
 0x1b6   : > { %7497 = vst [vmem:[#allocation50_spill] sm:$0xff] %v6275_v40  ;;  %v935_v40 = vrot.slane %v612_v37, 1 }
 0x1b7   : > { %2041 = vmatmul.bf16.gmra.mxu1 %v6271_v36  ;;  %v1735_v20 = vpop.f32.mrf.mxu2 }
 0x1b8   : > { %v1736_v18 = vadd.f32 %v1735_v20, %v6136_v45  ;;  %v1824_v58 = vpop.f32.mrf.mxu3 }
 0x1b9   : > { %v1915_v53 = vpop.f32.mrf.mxu0 }
 0x1ba   : > { %v1825_v7 = vadd.f32 %v1824_v58, %v1736_v18  ;;  %v6294_v58 = vsel %vm854_vm4, %v934_v5, %v935_v40 }
 0x1bc   : > { %v6284_v29 = vpop.f32.mrf.mxu1  ;;  %v1914_v17 = vadd.f32 %v1913_v16, %v1825_v7 }
 0x1be   : > { %v6286_v23 = vadd.f32 %v2002_v30, %v1914_v17 }
 0x1bf   : > { %v1737_v9 = vpop.f32.mrf.mxu2 }
 0x1c0   : > { %v1738_v45 = vadd.f32 %v1737_v9, %v6144_v63  ;;  %v1826_v20 = vpop.f32.mrf.mxu3  ;;  %v5198_v63 = vld [vmem:[#allocation7 + $0x18] sm:$0xff] }
 0x1c1   : > { %v1918_v28 = vpop.f32.mrf.mxu0  ;;  %3527 = vmatpush.bf16.msra.mxu1 %v5198_v63 }
 0x1c2   : > { %v1827_v47 = vadd.f32 %v1826_v20, %v1738_v45 }
 0x1c4   : > { %v2007_v18 = vpop.f32.mrf.mxu1  ;;  %1779 = vmatmul.bf16.gmra.mxu2 %v6271_v36  ;;  %1957 = vmatmul.bf16.gmra.mxu0 %v6291_v22  ;;  %v6298_v16 = vadd.f32 %v1915_v53, %v1827_v47 }
 0x1c5   : > { %1868 = vmatmul.bf16.gmra.mxu3 %v6268_v6 }
 0x1c7   : > { %2046 = vmatmul.bf16.gmra.mxu1 %v6294_v58  ;;  %v1740_v9 = vpop.f32.mrf.mxu2 }
 0x1c8   : > { %v1741_v30 = vadd.f32 %v1740_v9, %v6157_v1  ;;  %v1829_v37 = vpop.f32.mrf.mxu3 }
 0x1c9   : > { %v1920_v35 = vpop.f32.mrf.mxu0 }
 0x1ca   : > { %v1830_v50 = vadd.f32 %v1829_v37, %v1741_v30 }
 0x1cc   : > { %v6303_v40 = vpop.f32.mrf.mxu1  ;;  %v1919_v25 = vadd.f32 %v1918_v28, %v1830_v50 }
 0x1ce   : > { %v6305_v7 = vadd.f32 %v2007_v18, %v1919_v25 }
 0x1cf   : > { %v1742_v17 = vpop.f32.mrf.mxu2 }
 0x1d0   : > { %v1743_v53 = vadd.f32 %v1742_v17, %v6165_v13  ;;  %v1831_v33 = vpop.f32.mrf.mxu3 }
 0x1d1   : > { %v1923_v26 = vpop.f32.mrf.mxu0 }
 0x1d2   : > { %v1832_v5 = vadd.f32 %v1831_v33, %v1743_v53 }
 0x1d4   : > { %v2012_v45 = vpop.f32.mrf.mxu1  ;;  %2060 = vmatmul.bf16.vlgmr.msra.gmra.mxu2 %v5792_v11  ;;  %2238 = vmatmul.bf16.vlgmr.msra.gmra.mxu0 %v6028_v3  ;;  %v6310_v1 = vadd.f32 %v1920_v35, %v1832_v5 }
 0x1d5   : > { %2149 = vmatmul.bf16.vlgmr.msra.gmra.mxu3 %v5826_v0 }
 0x1d7   : > { %v1745_v20 = vpop.f32.mrf.mxu2 }
 0x1d8   : > { %v1746_v28 = vadd.f32 %v1745_v20, %v6016_v21  ;;  %v1834_v47 = vpop.f32.mrf.mxu3  ;;  %v5197_v21 = vld [vmem:[#allocation7 + $0x10] sm:$0xff] }
 0x1d9   : > { %v1925_v18 = vpop.f32.mrf.mxu0  ;;  %3528 = vmatpush.bf16.msra.mxu1 %v5197_v21 }
 0x1da   : > { %v1835_v63 = vadd.f32 %v1834_v47, %v1746_v28  ;;  %v7498_v28 = vld [vmem:[#allocation33_spill] sm:$0xff] }
 0x1dc   : > { %v6314_v9 = vpop.f32.mrf.mxu1  ;;  %v1924_v13 = vadd.f32 %v1923_v26, %v1835_v63 }
 0x1de   : > { %v6316_v30 = vadd.f32 %v2012_v45, %v1924_v13  ;;  %v7499_v13 = vld [vmem:[#allocation18_spill] sm:$0xff] }
 0x1df   : > { %v1747_v37 = vpop.f32.mrf.mxu2 }
 0x1e0   : > { %v1748_v11 = vadd.f32 %v1747_v37, %v6024_v49  ;;  %v1836_v50 = vpop.f32.mrf.mxu3  ;;  %v7500_v37 = vld [vmem:[#allocation22_spill] sm:$0xff] }
 0x1e1   : > { %v1928_v3 = vpop.f32.mrf.mxu0 }
 0x1e2   : > { %v1837_v35 = vadd.f32 %v1836_v50, %v1748_v11  ;;  %v7501_v50 = vld [vmem:[#allocation34_spill] sm:$0xff] }
 0x1e4   : > { %v2017_v25 = vpop.f32.mrf.mxu1  ;;  %2065 = vmatmul.bf16.gmra.mxu2 %v5819_v61  ;;  %2243 = vmatmul.bf16.gmra.mxu0 %v6048_v55  ;;  %v6321_v0 = vadd.f32 %v1925_v18, %v1837_v35 }
 0x1e5   : > { %2154 = vmatmul.bf16.gmra.mxu3 %v5858_v59 }
 0x1e7   : > { %v1750_v17 = vpop.f32.mrf.mxu2 }
 0x1e8   : > { %v1751_v53 = vadd.f32 %v1750_v17, %v6036_v24  ;;  %v1839_v33 = vpop.f32.mrf.mxu3 }
 0x1e9   : > { %v1930_v26 = vpop.f32.mrf.mxu0 }
 0x1ea   : > { %v1840_v49 = vadd.f32 %v1839_v33, %v1751_v53 }
 0x1ec   : > { %v6325_v5 = vpop.f32.mrf.mxu1  ;;  %v1929_v45 = vadd.f32 %v1928_v3, %v1840_v49 }
 0x1ee   : > { %v6327_v20 = vadd.f32 %v2017_v25, %v1929_v45  ;;  %v7502_v45 = vld [vmem:[#allocation35_spill] sm:$0xff] }
 0x1ef   : > { %v1752_v61 = vpop.f32.mrf.mxu2 }
 0x1f0   : > { %v1753_v55 = vadd.f32 %v1752_v61, %v7498_v28  ;;  %v1841_v47 = vpop.f32.mrf.mxu3 }
 0x1f1   : > { %v1933_v18 = vpop.f32.mrf.mxu0 }
 0x1f2   : > { %v1842_v63 = vadd.f32 %v1841_v47, %v1753_v55  ;;  %v7503_v47 = vld [vmem:[#allocation23_spill] sm:$0xff] }
 0x1f4   : > { %v2022_v59 = vpop.f32.mrf.mxu1  ;;  %2070 = vmatmul.bf16.gmra.mxu2 %v7499_v13  ;;  %2248 = vmatmul.bf16.gmra.mxu0 %v6069_v39  ;;  %v6332_v24 = vadd.f32 %v1930_v26, %v1842_v63  ;;  %v7504_v13 = vld [vmem:[#allocation26_spill] sm:$0xff] }
 0x1f5   : > { %2159 = vmatmul.bf16.gmra.mxu3 %v7500_v37  ;;  %v5196_v37 = vld [vmem:[#allocation7 + $0x8] sm:$0xff] }
 0x1f6   : > { %3529 = vmatpush.bf16.msra.mxu1 %v5196_v37  ;;  %v7510_v37 = vld [vmem:[#allocation28_spill] sm:$0xff] }
 0x1f7   : > { %v1755_v11 = vpop.f32.mrf.mxu2 }
 0x1f8   : > { %v1756_v3 = vadd.f32 %v1755_v11, %v7501_v50  ;;  %v1844_v35 = vpop.f32.mrf.mxu3 }
 0x1f9   : > { %v1935_v25 = vpop.f32.mrf.mxu0 }
 0x1fa   : > { %v1845_v21 = vadd.f32 %v1844_v35, %v1756_v3 }
 0x1fc   : > { %v6336_v17 = vpop.f32.mrf.mxu1  ;;  %v1934_v53 = vadd.f32 %v1933_v18, %v1845_v21  ;;  %v7505_v18 = vld [vmem:[#allocation36_spill] sm:$0xff] }
 0x1fe   : > { %v6338_v33 = vadd.f32 %v2022_v59, %v1934_v53 }
 0x1ff   : > { %v1757_v49 = vpop.f32.mrf.mxu2 }
 0x200   : > { %v1758_v61 = vadd.f32 %v1757_v49, %v7502_v45  ;;  %v1846_v28 = vpop.f32.mrf.mxu3 }
 0x201   : > { %v1938_v39 = vpop.f32.mrf.mxu0 }
 0x202   : > { %v1847_v26 = vadd.f32 %v1846_v28, %v1758_v61  ;;  %v7507_v61 = vld [vmem:[#allocation37_spill] sm:$0xff] }
 0x204   : > { %v2027_v55 = vpop.f32.mrf.mxu1  ;;  %2075 = vmatmul.bf16.gmra.mxu2 %v7503_v47  ;;  %2253 = vmatmul.bf16.gmra.mxu0 %v6090_v42  ;;  %v6343_v63 = vadd.f32 %v1935_v25, %v1847_v26 }
 0x205   : > { %2164 = vmatmul.bf16.gmra.mxu3 %v7504_v13  ;;  %v7508_v13 = vld [vmem:[#allocation27_spill] sm:$0xff] }
 0x207   : > { %v1760_v11 = vpop.f32.mrf.mxu2 }
 0x208   : > { %v1761_v59 = vadd.f32 %v1760_v11, %v7505_v18  ;;  %v1849_v50 = vpop.f32.mrf.mxu3 }
 0x209   : > { %v1940_v3 = vpop.f32.mrf.mxu0 }
 0x20a   : > { %v1850_v35 = vadd.f32 %v1849_v50, %v1761_v59  ;;  %v7511_v59 = vld [vmem:[#allocation38_spill] sm:$0xff] }
 0x20c   : > { %v6347_v21 = vpop.f32.mrf.mxu1  ;;  %v1939_v53 = vadd.f32 %v1938_v39, %v1850_v35 }
 0x20d   : > { %7506 = vst [vmem:[#allocation33_spill] sm:$0xff] %v6347_v21 }
 0x20e   : > { %v6349_v49 = vadd.f32 %v2027_v55, %v1939_v53 }
 0x20f   : > { %v1762_v45 = vpop.f32.mrf.mxu2 }
 0x210   : > { %v1763_v42 = vadd.f32 %v1762_v45, %v7507_v61  ;;  %v1851_v25 = vpop.f32.mrf.mxu3 }
 0x211   : > { %v1943_v28 = vpop.f32.mrf.mxu0 }
 0x212   : > { %v1852_v26 = vadd.f32 %v1851_v25, %v1763_v42  ;;  %v7514_v25 = vld [vmem:[#allocation39_spill] sm:$0xff] }
 0x214   : > { %v2032_v47 = vpop.f32.mrf.mxu1  ;;  %2080 = vmatmul.bf16.gmra.mxu2 %v7508_v13  ;;  %2258 = vmatmul.bf16.gmra.mxu0 %v6111_v51  ;;  %v6354_v11 = vadd.f32 %v1940_v3, %v1852_v26 }
 0x215   : > { %2169 = vmatmul.bf16.gmra.mxu3 %v7510_v37 }
 0x216   : > { %7509 = vst [vmem:[#allocation18_spill] sm:$0xff] %v6354_v11  ;;  %v7515_v11 = vld [vmem:[#allocation29_spill] sm:$0xff] }
 0x217   : > { %v1765_v18 = vpop.f32.mrf.mxu2 }
 0x218   : > { %v1766_v39 = vadd.f32 %v1765_v18, %v7511_v59  ;;  %v1854_v55 = vpop.f32.mrf.mxu3  ;;  %v7517_v18 = vld [vmem:[#allocation31_spill] sm:$0xff]  ;;  %v5195_v59 = vld [vmem:[#allocation7] sm:$0xff] }
 0x219   : > { %v1945_v50 = vpop.f32.mrf.mxu0  ;;  %3530 = vmatpush.bf16.msra.mxu1 %v5195_v59 }
 0x21a   : > { %v1855_v35 = vadd.f32 %v1854_v55, %v1766_v39 }
 0x21c   : > { %v6358_v53 = vpop.f32.mrf.mxu1  ;;  %v1944_v45 = vadd.f32 %v1943_v28, %v1855_v35  ;;  %v7518_v28 = vld [vmem:[#allocation40_spill] sm:$0xff] }
 0x21d   : > { %7512 = vst [vmem:[#allocation22_spill] sm:$0xff] %v6358_v53 }
 0x21e   : > { %v6360_v61 = vadd.f32 %v2032_v47, %v1944_v45 }
 0x21f   : > { %v1767_v42 = vpop.f32.mrf.mxu2 }
 0x220   : > { %7513 = vst [vmem:[#allocation34_spill] sm:$0xff] %v6360_v61  ;;  %v1768_v13 = vadd.f32 %v1767_v42, %v7514_v25  ;;  %v1856_v21 = vpop.f32.mrf.mxu3  ;;  %v7519_v42 = vld [vmem:[#allocation12_spill] sm:$0xff] }
 0x221   : > { %v1948_v51 = vpop.f32.mrf.mxu0  ;;  %3531 = vmatmul.bf16.vlgmr.msra.gmra.mxu1 %v7519_v42 }
 0x222   : > { %v1857_v3 = vadd.f32 %v1856_v21, %v1768_v13 }
 0x224   : > { %v2037_v26 = vpop.f32.mrf.mxu1  ;;  %2085 = vmatmul.bf16.gmra.mxu2 %v7515_v11  ;;  %2263 = vmatmul.bf16.gmra.mxu0 %v6132_v54  ;;  %v6365_v37 = vadd.f32 %v1945_v50, %v1857_v3  ;;  %v7522_v50 = vld [vmem:[#allocation41_spill] sm:$0xff] }
 0x225   : > { %2174 = vmatmul.bf16.gmra.mxu3 %v7517_v18 }
 0x226   : > { %7516 = vst [vmem:[#allocation35_spill] sm:$0xff] %v6365_v37  ;;  %v7523_v37 = vld [vmem:[#allocation13_spill] sm:$0xff] }
 0x227   : > { %v1770_v39 = vpop.f32.mrf.mxu2 }
 0x228   : > { %v1771_v47 = vadd.f32 %v1770_v39, %v7518_v28  ;;  %v1859_v55 = vpop.f32.mrf.mxu3  ;;  %v7524_v39 = vld [vmem:[#allocation44_spill] sm:$0xff]  ;;  %v7526_v28 = vld [vmem:[#allocation14_spill] sm:$0xff] }
 0x229   : > { %v1950_v35 = vpop.f32.mrf.mxu0 }
 0x22a   : > { %v1860_v45 = vadd.f32 %v1859_v55, %v1771_v47  ;;  %v7527_v55 = vld [vmem:[#allocation42_spill] sm:$0xff] }
 0x22c   : > { %v1949_v21 = vadd.f32 %v1948_v51, %v1860_v45  ;;  %v6370_v25 = vpop.f32.mrf.mxu1 }
 0x22d   : > { %7520 = vst [vmem:[#allocation23_spill] sm:$0xff] %v6370_v25 }
 0x22e   : > { %v6372_v11 = vadd.f32 %v2037_v26, %v1949_v21 }
 0x22f   : > { %v1772_v54 = vpop.f32.mrf.mxu2 }
 0x230   : > { %7521 = vst [vmem:[#allocation26_spill] sm:$0xff] %v6372_v11  ;;  %v1773_v13 = vadd.f32 %v1772_v54, %v7522_v50  ;;  %v1861_v3 = vpop.f32.mrf.mxu3 }
 0x231   : > { %v1953_v18 = vpop.f32.mrf.mxu0 }
 0x232   : > { %v1862_v53 = vadd.f32 %v1861_v3, %v1773_v13  ;;  %v7528_v13 = vld [vmem:[#allocation43_spill] sm:$0xff] }
 0x234   : > { %2090 = vmatmul.bf16.gmra.mxu2 %v7523_v37  ;;  %2268 = vmatmul.bf16.gmra.mxu0 %v7524_v39  ;;  %v6377_v59 = vadd.f32 %v1950_v35, %v1862_v53  ;;  %v2042_v51 = vpop.f32.mrf.mxu1  ;;  %v5210_v35 = vld [vmem:[#allocation7 + $0x78] sm:$0xff] }
 0x235   : > { %2179 = vmatmul.bf16.gmra.mxu3 %v7526_v28  ;;  %v5218_v28 = vld [vmem:[#allocation7 + $0xb8] sm:$0xff]  ;;  %3612 = vmatpush.bf16.msrb.mxu2 %v5210_v35 }
 0x236   : > { %7525 = vst [vmem:[#allocation36_spill] sm:$0xff] %v6377_v59  ;;  %v7530_v59 = vld [vmem:[#allocation15_spill] sm:$0xff]  ;;  %3701 = vmatpush.bf16.msrb.mxu3 %v5218_v28 }
 0x237   : > { %v1775_v47 = vpop.f32.mrf.mxu2 }
 0x238   : > { %v1776_v45 = vadd.f32 %v1775_v47, %v7527_v55  ;;  %v1864_v26 = vpop.f32.mrf.mxu3  ;;  %v7531_v55 = vld [vmem:[#allocation17_spill] sm:$0xff] }
 0x239   : > { %v1955_v21 = vpop.f32.mrf.mxu0 }
 0x23a   : > { %v1865_v25 = vadd.f32 %v1864_v26, %v1776_v45 }
 0x23c   : > { %v1954_v11 = vadd.f32 %v1953_v18, %v1865_v25  ;;  %v6384_v39 = vpop.f32.mrf.mxu1 }
 0x23d   : > { %7529 = vst [vmem:[#allocation37_spill] sm:$0xff] %v6384_v39 }
 0x23e   : > { %v6381_v54 = vadd.f32 %v2042_v51, %v1954_v11  ;;  %v7532_v11 = vld [vmem:[#allocation45_spill] sm:$0xff] }
 0x23f   : > { %v1777_v50 = vpop.f32.mrf.mxu2 }
 0x240   : > { %v1778_v3 = vadd.f32 %v1777_v50, %v7528_v13  ;;  %v1866_v37 = vpop.f32.mrf.mxu3 }
 0x241   : > { %v1958_v61 = vpop.f32.mrf.mxu0 }
 0x242   : > { %v1867_v53 = vadd.f32 %v1866_v37, %v1778_v3  ;;  %v5226_v37 = vld [vmem:[#allocation7 + $0xf8] sm:$0xff] }
 0x243   : > { %3790 = vmatpush.bf16.msrb.mxu0 %v5226_v37 }
 0x244   : > { %2095 = vmatmul.bf16.gmra.mxu2 %v7530_v59  ;;  %2273 = vmatmul.bf16.gmra.mxu0 %v6173_v44  ;;  %v6388_v47 = vadd.f32 %v1955_v21, %v1867_v53  ;;  %v2047_v50 = vpop.f32.mrf.mxu1  ;;  %v5234_v59 = vld [vmem:[#allocation7 + $0x138] sm:$0xff]  ;;  %v7533_v44 = vld [vmem:[#allocation46_spill] sm:$0xff] }
 0x245   : > { %2184 = vmatmul.bf16.gmra.mxu3 %v7531_v55  ;;  %3879 = vmatpush.bf16.msrb.mxu1 %v5234_v59 }
 0x247   : > { %v1780_v25 = vpop.f32.mrf.mxu2 }
 0x248   : > { %v1781_v18 = vadd.f32 %v1780_v25, %v7532_v11  ;;  %v1869_v51 = vpop.f32.mrf.mxu3 }
 0x249   : > { %v1960_v45 = vpop.f32.mrf.mxu0 }
 0x24a   : > { %v1870_v26 = vadd.f32 %v1869_v51, %v1781_v18 }
 0x24c   : > { %v1959_v13 = vadd.f32 %v1958_v61, %v1870_v26 }
 0x24e   : > { %v6392_v3 = vadd.f32 %v2047_v50, %v1959_v13  ;;  %v7534_v50 = vld [vmem:[#allocation47_spill] sm:$0xff] }
 0x24f   : > { %v1782_v39 = vpop.f32.mrf.mxu2 }
 0x250   : > { %v1783_v21 = vadd.f32 %v1782_v39, %v7533_v44  ;;  %v1871_v53 = vpop.f32.mrf.mxu3 }
 0x251   : > { %v2239_v35 = vpop.f32.mrf.mxu0 }
 0x252   : > { %v1872_v28 = vadd.f32 %v1871_v53, %v1783_v21  ;;  %v5209_v21 = vld [vmem:[#allocation7 + $0x70] sm:$0xff] }
 0x253   : > { %3613 = vmatpush.bf16.msrb.mxu2 %v5209_v21 }
 0x254   : > { %2100 = vmatmul.bf16.gmra.mxu2 %v5783_v8  ;;  %2278 = vmatmul.bf16.gmra.mxu0 %v6186_v27  ;;  %v6397_v55 = vadd.f32 %v1960_v45, %v1872_v28  ;;  %v5217_v27 = vld [vmem:[#allocation7 + $0xb0] sm:$0xff] }
 0x255   : > { %2189 = vmatmul.bf16.gmra.mxu3 %v5815_v60 }
 0x256   : > { %3702 = vmatpush.bf16.msrb.mxu3 %v5217_v27 }
 0x257   : > { %v2061_v61 = vpop.f32.mrf.mxu2 }
 0x258   : > { %v2062_v25 = vadd.f32 %v2061_v61, %v6180_v43  ;;  %v2150_v11 = vpop.f32.mrf.mxu3 }
 0x259   : > { %v2241_v18 = vpop.f32.mrf.mxu0 }
 0x25a   : > { %v2151_v51 = vadd.f32 %v2150_v11, %v2062_v25 }
 0x25c   : > { %v2240_v39 = vadd.f32 %v2239_v35, %v2151_v51 }
 0x25e   : > { %v2319_v44 = vmax.f32 %v2240_v39, 0.0 }
 0x25f   : > { %v2063_v26 = vpop.f32.mrf.mxu2 }
 0x260   : > { %v2064_v13 = vadd.f32 %v2063_v26, %v7534_v50  ;;  %v2152_v37 = vpop.f32.mrf.mxu3  ;;  %v2351_v60 = vpack.c.bf16 %v2319_v44, %v2319_v44  ;;  %v5225_v44 = vld [vmem:[#allocation7 + $0xf0] sm:$0xff] }
 0x261   : > { %v2244_v59 = vpop.f32.mrf.mxu0  ;;  %3791 = vmatpush.bf16.msrb.mxu0 %v5225_v44 }
 0x262   : > { %v2153_v8 = vadd.f32 %v2152_v37, %v2064_v13  ;;  %v2415_v11 = vunpack.c.l.b16 %v2351_v60 }
 0x264   : > { %v2242_v45 = vadd.f32 %v2241_v18, %v2153_v8  ;;  %2105 = vmatmul.bf16.gmra.mxu2 %v5823_v62  ;;  %2283 = vmatmul.bf16.gmra.mxu0 %v6201_v4  ;;  %v5233_v8 = vld [vmem:[#allocation7 + $0x130] sm:$0xff] }
 0x265   : > { %2194 = vmatmul.bf16.gmra.mxu3 %v5851_v56  ;;  %3880 = vmatpush.bf16.msrb.mxu1 %v5233_v8 }
 0x266   : > { %v2320_v43 = vmax.f32 %v2242_v45, 0.0 }
 0x267   : > { %v2066_v53 = vpop.f32.mrf.mxu2 }
 0x268   : > { %v2352_v35 = vpack.c.bf16 %v2320_v43, %v2320_v43  ;;  %v2067_v28 = vadd.f32 %v2066_v53, %v6195_v19  ;;  %v2155_v61 = vpop.f32.mrf.mxu3 }
 0x269   : > { %v2246_v25 = vpop.f32.mrf.mxu0 }
 0x26a   : > { %v2416_v51 = vunpack.c.l.b16 %v2352_v35  ;;  %v2156_v39 = vadd.f32 %v2155_v61, %v2067_v28 }
 0x26c   : > { %v2447_v18 = vpack.c.b16 %v2416_v51, %v2415_v11  ;;  %v2245_v62 = vadd.f32 %v2244_v59, %v2156_v39 }
 0x26e   : > { %v2464_v26 = vshrl.u32 %v2447_v18, 16  ;;  %v2467_v4 = vshll.u32 %v2447_v18, 16  ;;  %v2321_v27 = vmax.f32 %v2245_v62, 0.0 }
 0x26f   : > { %v2068_v50 = vpop.f32.mrf.mxu2 }
 0x270   : > { %v2069_v56 = vadd.f32 %v2068_v50, %v6206_v12  ;;  %v2157_v13 = vpop.f32.mrf.mxu3  ;;  %v6407_v37 = vrot.slane %v2464_v26, 7  ;;  %v2353_v59 = vpack.c.bf16 %v2321_v27, %v2321_v27  ;;  %v7535_v50 = vld [vmem:[#allocation19_spill] sm:$0xff]  ;;  %v5208_v27 = vld [vmem:[#allocation7 + $0x68] sm:$0xff] }
 0x271   : > { %v2249_v21 = vpop.f32.mrf.mxu0  ;;  %3614 = vmatpush.bf16.msrb.mxu2 %v5208_v27  ;;  %v5232_v27 = vld [vmem:[#allocation7 + $0x128] sm:$0xff] }
 0x272   : > { %v2158_v19 = vadd.f32 %v2157_v13, %v2069_v56  ;;  %v2469_v45 = vor.u32 %v2467_v4, %v6407_v37  ;;  %v2417_v11 = vunpack.c.l.b16 %v2353_v59  ;;  %v7537_v59 = vld [vmem:[#allocation25_spill] sm:$0xff]  ;;  %3881 = vmatpush.bf16.msrb.mxu1 %v5232_v27 }
 0x274   : > { %v2247_v60 = vadd.f32 %v2246_v25, %v2158_v19  ;;  %2110 = vmatmul.bf16.gmra.mxu2 %v5855_v57  ;;  %2288 = vmatmul.bf16.gmra.mxu0 %v6216_v2  ;;  %v6414_v12 = vsel %vm5712_vm2, 0, %v2469_v45  ;;  %v5216_v19 = vld [vmem:[#allocation7 + $0xa8] sm:$0xff] }
 0x275   : > { %2199 = vmatmul.bf16.gmra.mxu3 %v7490_v46  ;;  %3536 = vmatmul.bf16.gmra.mxu1 %v6414_v12 }
 0x276   : > { %v2322_v43 = vmax.f32 %v2247_v60, 0.0  ;;  %v7536_v60 = vld [vmem:[#allocation21_spill] sm:$0xff]  ;;  %3703 = vmatpush.bf16.msrb.mxu3 %v5216_v19 }
 0x277   : > { %v2071_v53 = vpop.f32.mrf.mxu2 }
 0x278   : > { %v2354_v35 = vpack.c.bf16 %v2322_v43, %v2322_v43  ;;  %v2072_v28 = vadd.f32 %v2071_v53, %v6210_v52  ;;  %v2160_v61 = vpop.f32.mrf.mxu3 }
 0x279   : > { %v2251_v25 = vpop.f32.mrf.mxu0 }
 0x27a   : > { %v2418_v57 = vunpack.c.l.b16 %v2354_v35  ;;  %v2161_v51 = vadd.f32 %v2160_v61, %v2072_v28  ;;  %v7538_v61 = vld [vmem:[#allocation20_spill] sm:$0xff] }
 0x27c   : > { %v2448_v2 = vpack.c.b16 %v2418_v57, %v2417_v11  ;;  %v2250_v18 = vadd.f32 %v2249_v21, %v2161_v51 }
 0x27e   : > { %v2471_v39 = vshrl.u32 %v2448_v2, 16  ;;  %v2474_v46 = vshll.u32 %v2448_v2, 16  ;;  %v2323_v44 = vmax.f32 %v2250_v18, 0.0 }
 0x27f   : > { %v2073_v26 = vpop.f32.mrf.mxu2 }
 0x280   : > { %v6419_v62 = vrot.slane %v2471_v39, 7  ;;  %v2074_v4 = vadd.f32 %v2073_v26, %v7535_v50  ;;  %v2162_v56 = vpop.f32.mrf.mxu3  ;;  %v2355_v43 = vpack.c.bf16 %v2323_v44, %v2323_v44 }
 0x281   : > { %v2254_v13 = vpop.f32.mrf.mxu0 }
 0x282   : > { %v2163_v8 = vadd.f32 %v2162_v56, %v2074_v4  ;;  %v2476_v52 = vor.u32 %v2474_v46, %v6419_v62  ;;  %v2419_v51 = vunpack.c.l.b16 %v2355_v43  ;;  %v7539_v56 = vld [vmem:[#allocation24_spill] sm:$0xff] }
 0x284   : > { %v2252_v45 = vadd.f32 %v2251_v25, %v2163_v8  ;;  %2115 = vmatmul.bf16.gmra.mxu2 %v7536_v60  ;;  %2293 = vmatmul.bf16.gmra.mxu0 %v6231_v38  ;;  %v6427_v21 = vsel %vm5712_vm2, 0, %v2476_v52  ;;  %v5224_v52 = vld [vmem:[#allocation7 + $0xe8] sm:$0xff] }
 0x285   : > { %2204 = vmatmul.bf16.gmra.mxu3 %v7537_v59  ;;  %3541 = vmatmul.bf16.gmra.mxu1 %v6427_v21 }
 0x286   : > { %v2324_v53 = vmax.f32 %v2252_v45, 0.0  ;;  %3792 = vmatpush.bf16.msrb.mxu0 %v5224_v52 }
 0x287   : > { %v2076_v35 = vpop.f32.mrf.mxu2 }
 0x288   : > { %v2356_v28 = vpack.c.bf16 %v2324_v53, %v2324_v53  ;;  %v2077_v25 = vadd.f32 %v2076_v35, %v7538_v61  ;;  %v2165_v11 = vpop.f32.mrf.mxu3 }
 0x289   : > { %v2256_v57 = vpop.f32.mrf.mxu0 }
 0x28a   : > { %v2420_v38 = vunpack.c.l.b16 %v2356_v28  ;;  %v2166_v2 = vadd.f32 %v2165_v11, %v2077_v25 }
 0x28c   : > { %v2449_v39 = vpack.c.b16 %v2420_v38, %v2419_v51  ;;  %v2255_v26 = vadd.f32 %v2254_v13, %v2166_v2  ;;  %v1995_v2 = vadd.f32 %v6242_v48, %v6254_v32 }
 0x28e   : > { %v2478_v18 = vshrl.u32 %v2449_v39, 16  ;;  %v2481_v4 = vshll.u32 %v2449_v39, 16  ;;  %v2325_v45 = vmax.f32 %v2255_v26, 0.0 }
 0x28f   : > { %v2078_v46 = vpop.f32.mrf.mxu2 }
 0x290   : > { %v6432_v50 = vrot.slane %v2478_v18, 7  ;;  %v2079_v44 = vadd.f32 %v2078_v46, %v7539_v56  ;;  %v2167_v8 = vpop.f32.mrf.mxu3  ;;  %v2357_v53 = vpack.c.bf16 %v2325_v45, %v2325_v45 }
 0x291   : > { %v2259_v19 = vpop.f32.mrf.mxu0 }
 0x292   : > { %v2168_v60 = vadd.f32 %v2167_v8, %v2079_v44  ;;  %v2483_v59 = vor.u32 %v2481_v4, %v6432_v50  ;;  %v2421_v51 = vunpack.c.l.b16 %v2357_v53  ;;  %v5207_v44 = vld [vmem:[#allocation7 + $0x60] sm:$0xff]  ;;  %v7542_v53 = vld [vmem:[#allocation30_spill] sm:$0xff] }
 0x293   : > { %v5215_v8 = vld [vmem:[#allocation7 + $0xa0] sm:$0xff]  ;;  %3615 = vmatpush.bf16.msrb.mxu2 %v5207_v44 }
 0x294   : > { %v2257_v43 = vadd.f32 %v2256_v57, %v2168_v60  ;;  %2120 = vmatmul.bf16.gmra.mxu2 %v5930_v15  ;;  %2298 = vmatmul.bf16.gmra.mxu0 %v6250_v10  ;;  %v6440_v13 = vsel %vm5712_vm2, 0, %v2483_v59  ;;  %v5214_v59 = vld [vmem:[#allocation7 + $0x98] sm:$0xff]  ;;  %v7545_v44 = vld [vmem:[#allocation48_spill] sm:$0xff] }
 0x295   : > { %7540 = vst [vmem:[#allocation27_spill] sm:$0xff] %v6440_v13  ;;  %2209 = vmatmul.bf16.gmra.mxu3 %v5955_v41  ;;  %3546 = vmatmul.bf16.gmra.mxu1 %v6440_v13 }
 0x296   : > { %v2326_v35 = vmax.f32 %v2257_v43, 0.0  ;;  %3704 = vmatpush.bf16.msrb.mxu3 %v5215_v8  ;;  %v5222_v43 = vld [vmem:[#allocation7 + $0xd8] sm:$0xff] }
 0x297   : > { %v2081_v28 = vpop.f32.mrf.mxu2 }
 0x298   : > { %v2358_v61 = vpack.c.bf16 %v2326_v35, %v2326_v35  ;;  %v2082_v25 = vadd.f32 %v2081_v28, %v6244_v14  ;;  %v2170_v11 = vpop.f32.mrf.mxu3  ;;  %v5223_v14 = vld [vmem:[#allocation7 + $0xe0] sm:$0xff] }
 0x299   : > { %v2261_v57 = vpop.f32.mrf.mxu0  ;;  %3793 = vmatpush.bf16.msrb.mxu0 %v5223_v14 }
 0x29a   : > { %v2422_v15 = vunpack.c.l.b16 %v2358_v61  ;;  %v2171_v38 = vadd.f32 %v2170_v11, %v2082_v25  ;;  %3705 = vmatpush.bf16.msrb.mxu3 %v5214_v59  ;;  %v7543_v25 = vld [vmem:[#allocation49_spill] sm:$0xff] }
 0x29c   : > { %v2450_v10 = vpack.c.b16 %v2422_v15, %v2421_v51  ;;  %v2260_v18 = vadd.f32 %v2259_v19, %v2171_v38  ;;  %v5206_v19 = vld [vmem:[#allocation7 + $0x58] sm:$0xff]  ;;  %v5213_v51 = vld [vmem:[#allocation7 + $0x90] sm:$0xff] }
 0x29d   : > { %3616 = vmatpush.bf16.msrb.mxu2 %v5206_v19  ;;  %3794 = vmatpush.bf16.msrb.mxu0 %v5222_v43  ;;  %v5221_v15 = vld [vmem:[#allocation7 + $0xd0] sm:$0xff]  ;;  %v5231_v43 = vld [vmem:[#allocation7 + $0x120] sm:$0xff] }
 0x29e   : > { %v2485_v39 = vshrl.u32 %v2450_v10, 16  ;;  %v2488_v46 = vshll.u32 %v2450_v10, 16  ;;  %v2327_v27 = vmax.f32 %v2260_v18, 0.0  ;;  %3706 = vmatpush.bf16.msrb.mxu3 %v5213_v51  ;;  %3882 = vmatpush.bf16.msrb.mxu1 %v5231_v43  ;;  %v7547_v43 = vld [vmem:[#allocation32_spill] sm:$0xff] }
 0x29f   : > { %v2083_v41 = vpop.f32.mrf.mxu2 }
 0x2a0   : > { %v6447_v26 = vrot.slane %v2485_v39, 7  ;;  %v2084_v4 = vadd.f32 %v2083_v41, %v1995_v2  ;;  %v2172_v56 = vpop.f32.mrf.mxu3  ;;  %v2359_v35 = vpack.c.bf16 %v2327_v27, %v2327_v27  ;;  %v5204_v41 = vld [vmem:[#allocation7 + $0x48] sm:$0xff] }
 0x2a1   : > { %v2264_v52 = vpop.f32.mrf.mxu0  ;;  %3795 = vmatpush.bf16.msrb.mxu0 %v5221_v15 }
 0x2a2   : > { %v2173_v45 = vadd.f32 %v2172_v56, %v2084_v4  ;;  %v2490_v60 = vor.u32 %v2488_v46, %v6447_v26  ;;  %v2423_v10 = vunpack.c.l.b16 %v2359_v35  ;;  %v5212_v46 = vld [vmem:[#allocation7 + $0x88] sm:$0xff]  ;;  %v7544_v56 = vld [vmem:[#allocation50_spill] sm:$0xff]  ;;  %v5211_v35 = vld [vmem:[#allocation7 + $0x80] sm:$0xff] }
 0x2a3   : > { %v5220_v4 = vld [vmem:[#allocation7 + $0xc8] sm:$0xff]  ;;  %v2000_v8 = vadd.f32 %v7545_v44, %v7544_v56  ;;  %3707 = vmatpush.bf16.msrb.mxu3 %v5212_v46  ;;  %v2005_v46 = vadd.f32 %v6284_v29, %v6298_v16  ;;  %v7549_v16 = vld [vmem:[#allocation16_spill] sm:$0xff] }
 0x2a4   : > { %v2262_v48 = vadd.f32 %v2261_v57, %v2173_v45  ;;  %2125 = vmatmul.bf16.gmra.mxu2 %v5962_v31  ;;  %2303 = vmatmul.bf16.gmra.mxu0 %v6271_v36  ;;  %v6454_v32 = vsel %vm5712_vm2, 0, %v2490_v60  ;;  %v5205_v57 = vld [vmem:[#allocation7 + $0x50] sm:$0xff] }
 0x2a5   : > { %7541 = vst [vmem:[#allocation28_spill] sm:$0xff] %v6454_v32  ;;  %2214 = vmatmul.bf16.gmra.mxu3 %v7542_v53  ;;  %3551 = vmatmul.bf16.gmra.mxu1 %v6454_v32  ;;  %v5203_v53 = vld [vmem:[#allocation7 + $0x40] sm:$0xff] }
 0x2a6   : > { %v2328_v28 = vmax.f32 %v2262_v48, 0.0  ;;  %3617 = vmatpush.bf16.msrb.mxu2 %v5205_v57  ;;  %3796 = vmatpush.bf16.msrb.mxu0 %v5220_v4 }
 0x2a7   : > { %v2086_v61 = vpop.f32.mrf.mxu2  ;;  %3708 = vmatpush.bf16.msrb.mxu3 %v5211_v35 }
 0x2a8   : > { %v2360_v31 = vpack.c.bf16 %v2328_v28, %v2328_v28  ;;  %v2087_v36 = vadd.f32 %v2086_v61, %v7543_v25  ;;  %v2175_v11 = vpop.f32.mrf.mxu3  ;;  %v5219_v61 = vld [vmem:[#allocation7 + $0xc0] sm:$0xff] }
 0x2a9   : > { %v2266_v38 = vpop.f32.mrf.mxu0 }
 0x2aa   : > { %v2424_v2 = vunpack.c.l.b16 %v2360_v31  ;;  %v2176_v39 = vadd.f32 %v2175_v11, %v2087_v36  ;;  %3618 = vmatpush.bf16.msrb.mxu2 %v5204_v41  ;;  %3797 = vmatpush.bf16.msrb.mxu0 %v5219_v61 }
 0x2ac   : > { %v2451_v18 = vpack.c.b16 %v2424_v2, %v2423_v10  ;;  %v2265_v27 = vadd.f32 %v2264_v52, %v2176_v39 }
 0x2ae   : > { %v2492_v14 = vshrl.u32 %v2451_v18, 16  ;;  %v2495_v48 = vshll.u32 %v2451_v18, 16  ;;  %v2329_v31 = vmax.f32 %v2265_v27, 0.0  ;;  %3619 = vmatpush.bf16.msrb.mxu2 %v5203_v53 }
 0x2af   : > { %v2088_v45 = vpop.f32.mrf.mxu2 }
 0x2b0   : > { %v6461_v60 = vrot.slane %v2492_v14, 7  ;;  %v2089_v19 = vadd.f32 %v2088_v45, %v2000_v8  ;;  %v2177_v59 = vpop.f32.mrf.mxu3  ;;  %v2361_v57 = vpack.c.bf16 %v2329_v31, %v2329_v31 }
 0x2b1   : > { %v2269_v28 = vpop.f32.mrf.mxu0 }
 0x2b2   : > { %v2178_v25 = vadd.f32 %v2177_v59, %v2089_v19  ;;  %v2497_v36 = vor.u32 %v2495_v48, %v6461_v60  ;;  %v2425_v18 = vunpack.c.l.b16 %v2361_v57 }
 0x2b4   : > { %v2267_v52 = vadd.f32 %v2266_v38, %v2178_v25  ;;  %2130 = vmatmul.bf16.gmra.mxu2 %v6268_v6  ;;  %2308 = vmatmul.bf16.gmra.mxu0 %v6294_v58  ;;  %v6468_v11 = vsel %vm5712_vm2, 0, %v2497_v36 }
 0x2b5   : > { %7546 = vst [vmem:[#allocation38_spill] sm:$0xff] %v6468_v11  ;;  %2219 = vmatmul.bf16.gmra.mxu3 %v6291_v22  ;;  %3556 = vmatmul.bf16.gmra.mxu1 %v6468_v11 }
 0x2b6   : > { %v2330_v51 = vmax.f32 %v2267_v52, 0.0 }
 0x2b7   : > { %v2091_v15 = vpop.f32.mrf.mxu2 }
 0x2b8   : > { %v2362_v10 = vpack.c.bf16 %v2330_v51, %v2330_v51  ;;  %v2092_v2 = vadd.f32 %v2091_v15, %v6286_v23  ;;  %v2180_v39 = vpop.f32.mrf.mxu3 }
 0x2b9   : > { %v2271_v38 = vpop.f32.mrf.mxu0 }
 0x2ba   : > { %v2426_v6 = vunpack.c.l.b16 %v2362_v10  ;;  %v2181_v41 = vadd.f32 %v2180_v39, %v2092_v2  ;;  %v2010_v10 = vadd.f32 %v6303_v40, %v6310_v1 }
 0x2bc   : > { %v2452_v58 = vpack.c.b16 %v2426_v6, %v2425_v18  ;;  %v2270_v56 = vadd.f32 %v2269_v28, %v2181_v41 }
 0x2be   : > { %v2499_v4 = vshrl.u32 %v2452_v58, 16  ;;  %v2502_v8 = vshll.u32 %v2452_v58, 16  ;;  %v2331_v48 = vmax.f32 %v2270_v56, 0.0 }
 0x2bf   : > { %v2093_v22 = vpop.f32.mrf.mxu2 }
 0x2c0   : > { %v6475_v44 = vrot.slane %v2499_v4, 7  ;;  %v2094_v14 = vadd.f32 %v2093_v22, %v2005_v46  ;;  %v2182_v27 = vpop.f32.mrf.mxu3  ;;  %v2363_v53 = vpack.c.bf16 %v2331_v48, %v2331_v48  ;;  %v5230_v46 = vld [vmem:[#allocation7 + $0x118] sm:$0xff]  ;;  %v6501_v48 = vpop.f32.mrf.mxu1 }
 0x2c1   : > { %v2274_v45 = vpop.f32.mrf.mxu0  ;;  %3883 = vmatpush.bf16.msrb.mxu1 %v5230_v46 }
 0x2c2   : > { %v2183_v23 = vadd.f32 %v2182_v27, %v2094_v14  ;;  %v2504_v19 = vor.u32 %v2502_v8, %v6475_v44  ;;  %v2427_v52 = vunpack.c.l.b16 %v2363_v53 }
 0x2c4   : > { %v2272_v59 = vadd.f32 %v2271_v38, %v2183_v23  ;;  %2135 = vmatmul.bf16.gmra.mxu2 %v7519_v42  ;;  %2313 = vmatmul.bf16.gmra.mxu0 %v7547_v43  ;;  %v6482_v29 = vsel %vm5712_vm2, 0, %v2504_v19 }
 0x2c5   : > { %7548 = vst [vmem:[#allocation39_spill] sm:$0xff] %v6482_v29  ;;  %2224 = vmatmul.bf16.gmra.mxu3 %v7549_v16  ;;  %3561 = vmatmul.bf16.gmra.mxu1 %v6482_v29 }
 0x2c6   : > { %v2332_v35 = vmax.f32 %v2272_v59, 0.0 }
 0x2c7   : > { %v2096_v28 = vpop.f32.mrf.mxu2 }
 0x2c8   : > { %v2364_v61 = vpack.c.bf16 %v2332_v35, %v2332_v35  ;;  %v2097_v31 = vadd.f32 %v2096_v28, %v6305_v7  ;;  %v2185_v25 = vpop.f32.mrf.mxu3 }
 0x2c9   : > { %v2276_v36 = vpop.f32.mrf.mxu0 }
 0x2ca   : > { %v2428_v57 = vunpack.c.l.b16 %v2364_v61  ;;  %v2186_v51 = vadd.f32 %v2185_v25, %v2097_v31  ;;  %v2623_v31 = vsel %vm5712_vm2, %v6407_v37, 0  ;;  %v2864_v37 = vrot.slane %v6414_v12, 1 }
 0x2cc   : > { %v2453_v15 = vpack.c.b16 %v2428_v57, %v2427_v52  ;;  %v2275_v39 = vadd.f32 %v2274_v45, %v2186_v51  ;;  %v2642_v45 = vshll.u32 %v6414_v12, 16  ;;  %v2640_v52 = vshrl.u32 %v6414_v12, 16 }
 0x2cd   : > { %v2647_v57 = vshll.u32 %v2623_v31, 16  ;;  %v2015_v51 = vadd.f32 %v6314_v9, %v6321_v0 }
 0x2ce   : > { %v2506_v2 = vshrl.u32 %v2453_v15, 16  ;;  %v2509_v6 = vshll.u32 %v2453_v15, 16  ;;  %v2333_v7 = vmax.f32 %v2275_v39, 0.0  ;;  %v2644_v25 = vrot.slane %v2642_v45, 1 }
 0x2cf   : > { %v2098_v38 = vpop.f32.mrf.mxu2 }
 0x2d0   : > { %v6489_v18 = vrot.slane %v2506_v2, 7  ;;  %v2099_v41 = vadd.f32 %v2098_v38, %v2010_v10  ;;  %v2187_v58 = vpop.f32.mrf.mxu3  ;;  %v2365_v1 = vpack.c.bf16 %v2333_v7, %v2333_v7  ;;  %v2645_v2 = vor.u32 %v2644_v25, %v2640_v52 }
 0x2d1   : > { %v2279_v4 = vpop.f32.mrf.mxu0  ;;  %v2649_v7 = vrot.slane %v2647_v57, 1 }
 0x2d2   : > { %v2188_v56 = vadd.f32 %v2187_v58, %v2099_v41  ;;  %v2511_v22 = vor.u32 %v2509_v6, %v6489_v18  ;;  %v2429_v35 = vunpack.c.l.b16 %v2365_v1  ;;  %v6512_v6 = vpop.f32.mrf.mxu1 }
 0x2d3   : > { %v6517_v0 = vsel %vm613_vm3, %v2645_v2, %v2649_v7 }
 0x2d4   : > { %v2277_v8 = vadd.f32 %v2276_v36, %v2188_v56  ;;  %3620 = vmatmul.bf16.vlgmr.msrb.gmra.mxu2 %v7549_v16  ;;  %3798 = vmatmul.bf16.vlgmr.msrb.gmra.mxu0 %v6414_v12  ;;  %v6496_v40 = vsel %vm5712_vm2, 0, %v2511_v22 }
 0x2d5   : > { %7550 = vst [vmem:[#allocation29_spill] sm:$0xff] %v6496_v40  ;;  %3709 = vmatmul.bf16.vlgmr.msrb.gmra.mxu3 %v7547_v43  ;;  %3566 = vmatmul.bf16.gmra.mxu1 %v6496_v40  ;;  %v2876_v43 = vrot.slane %v6468_v11, 1 }
 0x2d6   : > { %v2334_v14 = vmax.f32 %v2277_v8, 0.0  ;;  %v2865_v8 = vrot.slane %v2623_v31, 1 }
 0x2d7   : > { %v2101_v27 = vpop.f32.mrf.mxu2 }
 0x2d8   : > { %v2366_v23 = vpack.c.bf16 %v2334_v14, %v2334_v14  ;;  %v2102_v19 = vadd.f32 %v2101_v27, %v6316_v30  ;;  %v2190_v59 = vpop.f32.mrf.mxu3  ;;  %v6521_v1 = vsel %vm854_vm4, %v2864_v37, %v2865_v8 }
 0x2d9   : > { %v2281_v53 = vpop.f32.mrf.mxu0 }
 0x2da   : > { %v2430_v28 = vunpack.c.l.b16 %v2366_v23  ;;  %v2191_v61 = vadd.f32 %v2190_v59, %v2102_v19  ;;  %v2654_v23 = vshll.u32 %v6427_v21, 16  ;;  %v6532_v31 = vpop.f32.mrf.mxu1 }
 0x2dc   : > { %v2454_v36 = vpack.c.b16 %v2430_v28, %v2429_v35  ;;  %v2280_v10 = vadd.f32 %v2279_v4, %v2191_v61  ;;  %v2656_v52 = vrot.slane %v2654_v23, 1 }
 0x2de   : > { %v2513_v15 = vshrl.u32 %v2454_v36, 16  ;;  %v2516_v38 = vshll.u32 %v2454_v36, 16  ;;  %v2335_v56 = vmax.f32 %v2280_v10, 0.0  ;;  %v2624_v36 = vsel %vm5712_vm2, %v6419_v62, 0  ;;  %v5229_v62 = vld [vmem:[#allocation7 + $0x110] sm:$0xff] }
 0x2df   : > { %v2103_v30 = vpop.f32.mrf.mxu2  ;;  %v2020_v10 = vadd.f32 %v6325_v5, %v6332_v24  ;;  %3884 = vmatpush.bf16.msrb.mxu1 %v5229_v62 }
 0x2e0   : > { %v6510_v39 = vrot.slane %v2513_v15, 7  ;;  %v2104_v41 = vadd.f32 %v2103_v30, %v2015_v51  ;;  %v2192_v58 = vpop.f32.mrf.mxu3  ;;  %v2367_v14 = vpack.c.bf16 %v2335_v56, %v2335_v56  ;;  %v2652_v51 = vshrl.u32 %v6427_v21, 16 }
 0x2e1   : > { %v2284_v46 = vpop.f32.mrf.mxu0  ;;  %v2659_v15 = vshll.u32 %v2624_v36, 16  ;;  %v2867_v56 = vrot.slane %v6427_v21, 1 }
 0x2e2   : > { %v2193_v22 = vadd.f32 %v2192_v58, %v2104_v41  ;;  %v2518_v9 = vor.u32 %v2516_v38, %v6510_v39  ;;  %v2431_v28 = vunpack.c.l.b16 %v2367_v14  ;;  %v2657_v38 = vor.u32 %v2656_v52, %v2652_v51 }
 0x2e3   : > { %v2661_v8 = vrot.slane %v2659_v15, 1 }
 0x2e4   : > { %v2282_v4 = vadd.f32 %v2281_v53, %v2193_v22  ;;  %3625 = vmatmul.bf16.gmra.mxu2 %v6517_v0  ;;  %3803 = vmatmul.bf16.gmra.mxu0 %v6427_v21  ;;  %v6526_v12 = vsel %vm5712_vm2, 0, %v2518_v9 }
 0x2e5   : > { %7551 = vst [vmem:[#allocation31_spill] sm:$0xff] %v6526_v12  ;;  %3714 = vmatmul.bf16.gmra.mxu3 %v6521_v1  ;;  %3571 = vmatmul.bf16.gmra.mxu1 %v6526_v12  ;;  %v6547_v24 = vsel %vm613_vm3, %v2657_v38, %v2661_v8 }
 0x2e6   : > { %v2336_v27 = vmax.f32 %v2282_v4, 0.0 }
 0x2e7   : > { %v2106_v45 = vpop.f32.mrf.mxu2 }
 0x2e8   : > { %v2368_v19 = vpack.c.bf16 %v2336_v27, %v2336_v27  ;;  %v2107_v59 = vadd.f32 %v2106_v45, %v6327_v20  ;;  %v2195_v53 = vpop.f32.mrf.mxu3  ;;  %v2868_v27 = vrot.slane %v2624_v36, 1 }
 0x2e9   : > { %v2286_v35 = vpop.f32.mrf.mxu0 }
 0x2ea   : > { %v2432_v61 = vunpack.c.l.b16 %v2368_v19  ;;  %v2196_v25 = vadd.f32 %v2195_v53, %v2107_v59  ;;  %v6551_v45 = vsel %vm854_vm4, %v2867_v56, %v2868_v27  ;;  %v2870_v27 = vrot.slane %v6440_v13, 1 }
 0x2ec   : > { %v2455_v57 = vpack.c.b16 %v2432_v61, %v2431_v28  ;;  %v2285_v30 = vadd.f32 %v2284_v46, %v2196_v25 }
 0x2ee   : > { %v2520_v20 = vshrl.u32 %v2455_v57, 16  ;;  %v2523_v58 = vshll.u32 %v2455_v57, 16  ;;  %v2337_v9 = vmax.f32 %v2285_v30, 0.0 }
 0x2ef   : > { %v2108_v2 = vpop.f32.mrf.mxu2 }
 0x2f0   : > { %v6540_v41 = vrot.slane %v2520_v20, 7  ;;  %v2109_v37 = vadd.f32 %v2108_v2, %v2020_v10  ;;  %v2197_v7 = vpop.f32.mrf.mxu3  ;;  %v2369_v19 = vpack.c.bf16 %v2337_v9, %v2337_v9  ;;  %v2625_v10 = vsel %vm5712_vm2, %v6432_v50, 0 }
 0x2f1   : > { %v2289_v22 = vpop.f32.mrf.mxu0  ;;  %v2664_v2 = vshrl.u32 %v6440_v13, 16  ;;  %v2671_v38 = vshll.u32 %v2625_v10, 16 }
 0x2f2   : > { %v2198_v4 = vadd.f32 %v2197_v7, %v2109_v37  ;;  %v6543_v14 = vpop.f32.mrf.mxu1  ;;  %v2525_v5 = vor.u32 %v2523_v58, %v6540_v41  ;;  %v2433_v52 = vunpack.c.l.b16 %v2369_v19  ;;  %v2025_v58 = vadd.f32 %v6336_v17, %v6343_v63 }
 0x2f4   : > { %v2287_v46 = vadd.f32 %v2286_v35, %v2198_v4  ;;  %3630 = vmatmul.bf16.gmra.mxu2 %v6547_v24  ;;  %3808 = vmatmul.bf16.gmra.mxu0 %v6440_v13  ;;  %v6556_v23 = vsel %vm5712_vm2, 0, %v2525_v5  ;;  %v2666_v35 = vshll.u32 %v6440_v13, 16  ;;  %v2673_v5 = vrot.slane %v2671_v38, 1 }
 0x2f5   : > { %7552 = vst [vmem:[#allocation40_spill] sm:$0xff] %v6556_v23  ;;  %3719 = vmatmul.bf16.gmra.mxu3 %v6551_v45  ;;  %3576 = vmatmul.bf16.gmra.mxu1 %v6556_v23 }
 0x2f6   : > { %v2338_v59 = vmax.f32 %v2287_v46, 0.0  ;;  %v2668_v20 = vrot.slane %v2666_v35, 1 }
 0x2f7   : > { %v2111_v53 = vpop.f32.mrf.mxu2 }
 0x2f8   : > { %v2370_v28 = vpack.c.bf16 %v2338_v59, %v2338_v59  ;;  %v2112_v61 = vadd.f32 %v2111_v53, %v6338_v33  ;;  %v2200_v25 = vpop.f32.mrf.mxu3  ;;  %v2669_v56 = vor.u32 %v2668_v20, %v2664_v2  ;;  %v2871_v53 = vrot.slane %v2625_v10, 1 }
 0x2f9   : > { %v2291_v36 = vpop.f32.mrf.mxu0 }
 0x2fa   : > { %v2434_v57 = vunpack.c.l.b16 %v2370_v28  ;;  %v2201_v51 = vadd.f32 %v2200_v25, %v2112_v61  ;;  %v6562_v15 = vpop.f32.mrf.mxu1  ;;  %v6577_v63 = vsel %vm613_vm3, %v2669_v56, %v2673_v5  ;;  %v6581_v35 = vsel %vm854_vm4, %v2870_v27, %v2871_v53 }
 0x2fb   : > { %7553 = vst [vmem:[#allocation41_spill] sm:$0xff] %v6581_v35  ;;  %v2676_v56 = vshrl.u32 %v6454_v32, 16 }
 0x2fc   : > { %v2456_v30 = vpack.c.b16 %v2434_v57, %v2433_v52  ;;  %v2290_v37 = vadd.f32 %v2289_v22, %v2201_v51 }
 0x2fe   : > { %v2527_v33 = vshrl.u32 %v2456_v30, 16  ;;  %v2530_v8 = vshll.u32 %v2456_v30, 16  ;;  %v2339_v46 = vmax.f32 %v2290_v37, 0.0 }
 0x2ff   : > { %v2113_v7 = vpop.f32.mrf.mxu2 }
 0x300   : > { %v6570_v62 = vrot.slane %v2527_v33, 7  ;;  %v2114_v9 = vadd.f32 %v2113_v7, %v2025_v58  ;;  %v2202_v4 = vpop.f32.mrf.mxu3  ;;  %v2371_v61 = vpack.c.bf16 %v2339_v46, %v2339_v46  ;;  %v2626_v33 = vsel %vm5712_vm2, %v6447_v26, 0  ;;  %v5228_v26 = vld [vmem:[#allocation7 + $0x108] sm:$0xff] }
 0x301   : > { %v2294_v50 = vpop.f32.mrf.mxu0  ;;  %3885 = vmatpush.bf16.msrb.mxu1 %v5228_v26 }
 0x302   : > { %v2203_v19 = vadd.f32 %v2202_v4, %v2114_v9  ;;  %v6573_v59 = vpop.f32.mrf.mxu1  ;;  %v2532_v17 = vor.u32 %v2530_v8, %v6570_v62  ;;  %v2435_v30 = vunpack.c.l.b16 %v2371_v61  ;;  %v2683_v8 = vshll.u32 %v2626_v33, 16  ;;  %v7555_v9 = vld [vmem:[#allocation18_spill] sm:$0xff]  ;;  %v7556_v4 = vld [vmem:[#allocation33_spill] sm:$0xff] }
 0x303   : > { %v2030_v27 = vadd.f32 %v7556_v4, %v7555_v9  ;;  %v7559_v4 = vld [vmem:[#allocation34_spill] sm:$0xff] }
 0x304   : > { %v2292_v22 = vadd.f32 %v2291_v36, %v2203_v19  ;;  %3635 = vmatmul.bf16.gmra.mxu2 %v6577_v63  ;;  %3813 = vmatmul.bf16.gmra.mxu0 %v6454_v32  ;;  %v6586_v28 = vsel %vm5712_vm2, 0, %v2532_v17  ;;  %v2678_v36 = vshll.u32 %v6454_v32, 16 }
 0x305   : > { %7554 = vst [vmem:[#allocation13_spill] sm:$0xff] %v6586_v28  ;;  %3724 = vmatmul.bf16.gmra.mxu3 %v6581_v35  ;;  %3581 = vmatmul.bf16.gmra.mxu1 %v6586_v28 }
 0x306   : > { %v2340_v25 = vmax.f32 %v2292_v22, 0.0  ;;  %v2680_v37 = vrot.slane %v2678_v36, 1  ;;  %v2685_v36 = vrot.slane %v2683_v8, 1 }
 0x307   : > { %v2116_v52 = vpop.f32.mrf.mxu2 }
 0x308   : > { %v2372_v57 = vpack.c.bf16 %v2340_v25, %v2340_v25  ;;  %v2117_v51 = vadd.f32 %v2116_v52, %v6349_v49  ;;  %v2205_v10 = vpop.f32.mrf.mxu3  ;;  %v2681_v19 = vor.u32 %v2680_v37, %v2676_v56  ;;  %v2873_v25 = vrot.slane %v6454_v32, 1 }
 0x309   : > { %v2296_v20 = vpop.f32.mrf.mxu0 }
 0x30a   : > { %v2436_v2 = vunpack.c.l.b16 %v2372_v57  ;;  %v2206_v38 = vadd.f32 %v2205_v10, %v2117_v51  ;;  %v6592_v58 = vpop.f32.mrf.mxu1 }
 0x30c   : > { %v2457_v7 = vpack.c.b16 %v2436_v2, %v2435_v30  ;;  %v2295_v5 = vadd.f32 %v2294_v50, %v2206_v38  ;;  %v2874_v30 = vrot.slane %v2626_v33, 1  ;;  %v6607_v50 = vsel %vm613_vm3, %v2681_v19, %v2685_v36 }
 0x30d   : > { %v2688_v36 = vshrl.u32 %v6468_v11, 16 }
 0x30e   : > { %v2534_v49 = vshrl.u32 %v2457_v7, 16  ;;  %v2537_v17 = vshll.u32 %v2457_v7, 16  ;;  %v2341_v57 = vmax.f32 %v2295_v5, 0.0  ;;  %v6611_v37 = vsel %vm854_vm4, %v2873_v25, %v2874_v30  ;;  %v7561_v30 = vld [vmem:[#allocation22_spill] sm:$0xff] }
 0x30f   : > { %v2118_v46 = vpop.f32.mrf.mxu2  ;;  %7557 = vst [vmem:[#allocation44_spill] sm:$0xff] %v6611_v37 }
 0x310   : > { %v6600_v53 = vrot.slane %v2534_v49, 7  ;;  %v2119_v22 = vadd.f32 %v2118_v46, %v2030_v27  ;;  %v2207_v61 = vpop.f32.mrf.mxu3  ;;  %v2373_v33 = vpack.c.bf16 %v2341_v57, %v2341_v57 }
 0x311   : > { %v2299_v52 = vpop.f32.mrf.mxu0 }
 0x312   : > { %v2208_v51 = vadd.f32 %v2207_v61, %v2119_v22  ;;  %v6603_v10 = vpop.f32.mrf.mxu1  ;;  %v2539_v2 = vor.u32 %v2537_v17, %v6600_v53  ;;  %v2437_v46 = vunpack.c.l.b16 %v2373_v33  ;;  %v2627_v61 = vsel %vm5712_vm2, %v6461_v60, 0 }
 0x313   : > { %v2695_v57 = vshll.u32 %v2627_v61, 16  ;;  %v2877_v16 = vrot.slane %v2627_v61, 1 }
 0x314   : > { %v2297_v38 = vadd.f32 %v2296_v20, %v2208_v51  ;;  %3640 = vmatmul.bf16.gmra.mxu2 %v6607_v50  ;;  %3818 = vmatmul.bf16.gmra.mxu0 %v6468_v11  ;;  %v6616_v7 = vsel %vm5712_vm2, 0, %v2539_v2  ;;  %v2690_v20 = vshll.u32 %v6468_v11, 16  ;;  %v7560_v51 = vld [vmem:[#allocation35_spill] sm:$0xff] }
 0x315   : > { %7558 = vst [vmem:[#allocation14_spill] sm:$0xff] %v6616_v7  ;;  %3729 = vmatmul.bf16.gmra.mxu3 %v6611_v37  ;;  %3586 = vmatmul.bf16.gmra.mxu1 %v6616_v7  ;;  %v2035_v2 = vadd.f32 %v7561_v30, %v7560_v51  ;;  %v2879_v37 = vrot.slane %v6482_v29, 1 }
 0x316   : > { %v2342_v56 = vmax.f32 %v2297_v38, 0.0  ;;  %v2692_v25 = vrot.slane %v2690_v20, 1  ;;  %v2697_v20 = vrot.slane %v2695_v57, 1 }
 0x317   : > { %v2121_v8 = vpop.f32.mrf.mxu2 }
 0x318   : > { %v2374_v9 = vpack.c.bf16 %v2342_v56, %v2342_v56  ;;  %v2122_v27 = vadd.f32 %v2121_v8, %v7559_v4  ;;  %v2210_v49 = vpop.f32.mrf.mxu3  ;;  %v2693_v33 = vor.u32 %v2692_v25, %v2688_v36  ;;  %v6641_v25 = vsel %vm854_vm4, %v2876_v43, %v2877_v16 }
 0x319   : > { %v2301_v5 = vpop.f32.mrf.mxu0  ;;  %7562 = vst [vmem:[#allocation42_spill] sm:$0xff] %v6641_v25 }
 0x31a   : > { %v2438_v19 = vunpack.c.l.b16 %v2374_v9  ;;  %v2211_v17 = vadd.f32 %v2210_v49, %v2122_v27  ;;  %v6622_v22 = vpop.f32.mrf.mxu1 }
 0x31c   : > { %v2458_v26 = vpack.c.b16 %v2438_v19, %v2437_v46  ;;  %v2300_v56 = vadd.f32 %v2299_v52, %v2211_v17  ;;  %v6637_v52 = vsel %vm613_vm3, %v2693_v33, %v2697_v20 }
 0x31e   : > { %v2541_v38 = vshrl.u32 %v2458_v26, 16  ;;  %v2544_v4 = vshll.u32 %v2458_v26, 16  ;;  %v2343_v46 = vmax.f32 %v2300_v56, 0.0 }
 0x31f   : > { %v2123_v8 = vpop.f32.mrf.mxu2 }
 0x320   : > { %v6630_v9 = vrot.slane %v2541_v38, 7  ;;  %v2124_v27 = vadd.f32 %v2123_v8, %v2035_v2  ;;  %v2212_v49 = vpop.f32.mrf.mxu3  ;;  %v2375_v61 = vpack.c.bf16 %v2343_v46, %v2343_v46  ;;  %v7564_v2 = vld [vmem:[#allocation26_spill] sm:$0xff]  ;;  %v2700_v46 = vshrl.u32 %v6482_v29, 16 }
 0x321   : > { %v2304_v60 = vpop.f32.mrf.mxu0 }
 0x322   : > { %v2213_v19 = vadd.f32 %v2212_v49, %v2124_v27  ;;  %v6633_v42 = vpop.f32.mrf.mxu1  ;;  %v2546_v51 = vor.u32 %v2544_v4, %v6630_v9  ;;  %v2439_v56 = vunpack.c.l.b16 %v2375_v61  ;;  %v2628_v27 = vsel %vm5712_vm2, %v6475_v44, 0  ;;  %v5227_v44 = vld [vmem:[#allocation7 + $0x100] sm:$0xff] }
 0x323   : > { %v2880_v13 = vrot.slane %v2628_v27, 1  ;;  %3886 = vmatpush.bf16.msrb.mxu1 %v5227_v44 }
 0x324   : > { %v2302_v17 = vadd.f32 %v2301_v5, %v2213_v19  ;;  %3645 = vmatmul.bf16.gmra.mxu2 %v6637_v52  ;;  %3823 = vmatmul.bf16.gmra.mxu0 %v6482_v29  ;;  %v6646_v26 = vsel %vm5712_vm2, 0, %v2546_v51  ;;  %v2702_v5 = vshll.u32 %v6482_v29, 16  ;;  %v2707_v19 = vshll.u32 %v2628_v27, 16  ;;  %v7565_v51 = vld [vmem:[#allocation36_spill] sm:$0xff] }
 0x325   : > { %7563 = vst [vmem:[#allocation43_spill] sm:$0xff] %v6646_v26  ;;  %3734 = vmatmul.bf16.gmra.mxu3 %v6641_v25  ;;  %3591 = vmatmul.bf16.gmra.mxu1 %v6646_v26 }
 0x326   : > { %v2344_v36 = vmax.f32 %v2302_v17, 0.0  ;;  %v2704_v49 = vrot.slane %v2702_v5, 1  ;;  %v7566_v17 = vld [vmem:[#allocation23_spill] sm:$0xff] }
 0x327   : > { %v2126_v57 = vpop.f32.mrf.mxu2 }
 0x328   : > { %v2376_v30 = vpack.c.bf16 %v2344_v36, %v2344_v36  ;;  %v2127_v38 = vadd.f32 %v2126_v57, %v7564_v2  ;;  %v2215_v43 = vpop.f32.mrf.mxu3  ;;  %v2040_v36 = vadd.f32 %v7566_v17, %v7565_v51  ;;  %v2705_v61 = vor.u32 %v2704_v49, %v2700_v46 }
 0x329   : > { %v2306_v16 = vpop.f32.mrf.mxu0 }
 0x32a   : > { %v2440_v8 = vunpack.c.l.b16 %v2376_v30  ;;  %v2216_v33 = vadd.f32 %v2215_v43, %v2127_v38  ;;  %v6652_v4 = vpop.f32.mrf.mxu1 }
 0x32c   : > { %v2459_v20 = vpack.c.b16 %v2440_v8, %v2439_v56  ;;  %v2305_v2 = vadd.f32 %v2304_v60, %v2216_v33  ;;  %v2709_v56 = vrot.slane %v2707_v19, 1 }
 0x32e   : > { %v2548_v57 = vshrl.u32 %v2459_v20, 16  ;;  %v2551_v38 = vshll.u32 %v2459_v20, 16  ;;  %v2345_v8 = vmax.f32 %v2305_v2, 0.0  ;;  %v6667_v60 = vsel %vm613_vm3, %v2705_v61, %v2709_v56  ;;  %v7569_v56 = vld [vmem:[#allocation37_spill] sm:$0xff] }
 0x32f   : > { %v2128_v25 = vpop.f32.mrf.mxu2  ;;  %v2629_v2 = vsel %vm5712_vm2, %v6489_v18, 0  ;;  %v2882_v18 = vrot.slane %v6496_v40, 1 }
 0x330   : > { %v6660_v30 = vrot.slane %v2548_v57, 7  ;;  %v2129_v43 = vadd.f32 %v2128_v25, %v2040_v36  ;;  %v2217_v11 = vpop.f32.mrf.mxu3  ;;  %v6671_v25 = vsel %vm854_vm4, %v2879_v37, %v2880_v13  ;;  %v2377_v27 = vpack.c.bf16 %v2345_v8, %v2345_v8 }
 0x331   : > { %v2309_v5 = vpop.f32.mrf.mxu0  ;;  %7567 = vst [vmem:[#allocation15_spill] sm:$0xff] %v6671_v25  ;;  %v2719_v44 = vshll.u32 %v2629_v2, 16  ;;  %v2045_v8 = vadd.f32 %v7569_v56, %v6388_v47 }
 0x332   : > { %v2218_v32 = vadd.f32 %v2217_v11, %v2129_v43  ;;  %v6663_v35 = vpop.f32.mrf.mxu1  ;;  %v2553_v51 = vor.u32 %v2551_v38, %v6660_v30  ;;  %v2441_v19 = vunpack.c.l.b16 %v2377_v27  ;;  %v2712_v43 = vshrl.u32 %v6496_v40, 16  ;;  %v5250_v27 = vld [vmem:[#allocation7 + $0x1b8] sm:$0xff] }
 0x333   : > { %4057 = vmatpush.bf16.msra.mxu3 %v5250_v27 }
 0x334   : > { %v2307_v33 = vadd.f32 %v2306_v16, %v2218_v32  ;;  %3650 = vmatmul.bf16.gmra.mxu2 %v6667_v60  ;;  %3828 = vmatmul.bf16.gmra.mxu0 %v6496_v40  ;;  %v6676_v11 = vsel %vm5712_vm2, 0, %v2553_v51  ;;  %v2714_v32 = vshll.u32 %v6496_v40, 16 }
 0x335   : > { %7568 = vst [vmem:[#allocation17_spill] sm:$0xff] %v6676_v11  ;;  %3739 = vmatmul.bf16.gmra.mxu3 %v6671_v25  ;;  %3596 = vmatmul.bf16.gmra.mxu1 %v6676_v11 }
 0x336   : > { %v2346_v49 = vmax.f32 %v2307_v33, 0.0  ;;  %v2716_v61 = vrot.slane %v2714_v32, 1  ;;  %v5242_v33 = vld [vmem:[#allocation7 + $0x178] sm:$0xff] }
 0x337   : > { %v2131_v20 = vpop.f32.mrf.mxu2  ;;  %3968 = vmatpush.bf16.msra.mxu2 %v5242_v33 }
 0x338   : > { %v2378_v16 = vpack.c.bf16 %v2346_v49, %v2346_v49  ;;  %v2132_v46 = vadd.f32 %v2131_v20, %v6381_v54  ;;  %v2220_v13 = vpop.f32.mrf.mxu3  ;;  %v2717_v20 = vor.u32 %v2716_v61, %v2712_v43  ;;  %v5258_v43 = vld [vmem:[#allocation7 + $0x1f8] sm:$0xff] }
 0x339   : > { %v2311_v37 = vpop.f32.mrf.mxu0  ;;  %4146 = vmatpush.bf16.msra.mxu0 %v5258_v43  ;;  %v2050_v43 = vadd.f32 %v6501_v48, %v6397_v55 }
 0x33a   : > { %v2442_v17 = vunpack.c.l.b16 %v2378_v16  ;;  %v2221_v36 = vadd.f32 %v2220_v13, %v2132_v46  ;;  %v6682_v57 = vpop.f32.mrf.mxu1 }
 0x33c   : > { %v2460_v38 = vpack.c.b16 %v2442_v17, %v2441_v19  ;;  %v2310_v51 = vadd.f32 %v2309_v5, %v2221_v36  ;;  %v2721_v19 = vrot.slane %v2719_v44, 1  ;;  %v2883_v5 = vrot.slane %v2629_v2, 1  ;;  %v5266_v2 = vld [vmem:[#allocation7 + $0x238] sm:$0xff] }
 0x33d   : > { %4235 = vmatpush.bf16.msra.mxu1 %v5266_v2 }
 0x33e   : > { %v2555_v54 = vshrl.u32 %v2460_v38, 16  ;;  %v2558_v46 = vshll.u32 %v2460_v38, 16  ;;  %v2347_v17 = vmax.f32 %v2310_v51, 0.0  ;;  %v6697_v61 = vsel %vm613_vm3, %v2717_v20, %v2721_v19 }
 0x33f   : > { %v2133_v49 = vpop.f32.mrf.mxu2  ;;  %v6701_v56 = vsel %vm854_vm4, %v2882_v18, %v2883_v5  ;;  %v2630_v18 = vsel %vm5712_vm2, %v6510_v39, 0  ;;  %v2724_v5 = vshrl.u32 %v6526_v12, 16 }
 0x340   : > { %v6690_v16 = vrot.slane %v2555_v54, 7  ;;  %v2134_v13 = vadd.f32 %v2133_v49, %v2045_v8  ;;  %v2222_v25 = vpop.f32.mrf.mxu3  ;;  %7570 = vst [vmem:[#allocation45_spill] sm:$0xff] %v6701_v56  ;;  %v2379_v44 = vpack.c.bf16 %v2347_v17, %v2347_v17 }
 0x341   : > { %v2314_v32 = vpop.f32.mrf.mxu0 }
 0x342   : > { %v2223_v29 = vadd.f32 %v2222_v25, %v2134_v13  ;;  %v6693_v47 = vpop.f32.mrf.mxu1  ;;  %v2560_v36 = vor.u32 %v2558_v46, %v6690_v16  ;;  %v2443_v49 = vunpack.c.l.b16 %v2379_v44 }
 0x344   : > { %v2312_v38 = vadd.f32 %v2311_v37, %v2223_v29  ;;  %3655 = vmatmul.bf16.gmra.mxu2 %v6697_v61  ;;  %3833 = vmatmul.bf16.gmra.mxu0 %v6526_v12  ;;  %v6706_v25 = vsel %vm5712_vm2, 0, %v2560_v36  ;;  %v2726_v37 = vshll.u32 %v6526_v12, 16  ;;  %v2731_v36 = vshll.u32 %v2630_v18, 16 }
 0x345   : > { %3744 = vmatmul.bf16.gmra.mxu3 %v6701_v56  ;;  %3601 = vmatmul.bf16.gmra.mxu1 %v6706_v25 }
 0x346   : > { %v2348_v8 = vmax.f32 %v2312_v38, 0.0  ;;  %v2728_v19 = vrot.slane %v2726_v37, 1  ;;  %v2733_v37 = vrot.slane %v2731_v36, 1 }
 0x347   : > { %v2136_v29 = vpop.f32.mrf.mxu2 }
 0x348   : > { %v2380_v54 = vpack.c.bf16 %v2348_v8, %v2348_v8  ;;  %v2137_v51 = vadd.f32 %v2136_v29, %v6392_v3  ;;  %v2225_v33 = vpop.f32.mrf.mxu3  ;;  %v2729_v44 = vor.u32 %v2728_v19, %v2724_v5 }
 0x349   : > { %v2316_v27 = vpop.f32.mrf.mxu0 }
 0x34a   : > { %v2444_v20 = vunpack.c.l.b16 %v2380_v54  ;;  %v2226_v46 = vadd.f32 %v2225_v33, %v2137_v51  ;;  %v6712_v13 = vpop.f32.mrf.mxu1  ;;  %v2885_v33 = vrot.slane %v6526_v12, 1  ;;  %v6732_v19 = vsel %vm613_vm3, %v2729_v44, %v2733_v37 }
 0x34c   : > { %v2461_v17 = vpack.c.b16 %v2444_v20, %v2443_v49  ;;  %v2315_v38 = vadd.f32 %v2314_v32, %v2226_v46  ;;  %v6726_v49 = vld [vmem:[%s7377_s4] ss:$0 sm:$0xff]  ;;  %v2886_v32 = vrot.slane %v2630_v18, 1 }
 0x34d   : > { %v3533_v18 = vadd.f32 %v6726_v49, %v6512_v6 }
 0x34e   : > { %v2562_v3 = vshrl.u32 %v2461_v17, 16  ;;  %v2565_v29 = vshll.u32 %v2461_v17, 16  ;;  %v2349_v20 = vmax.f32 %v2315_v38, 0.0  ;;  %v6736_v5 = vsel %vm854_vm4, %v2885_v33, %v2886_v32 }
 0x34f   : > { %v2138_v2 = vpop.f32.mrf.mxu2  ;;  %7571 = vst [vmem:[#allocation46_spill] sm:$0xff] %v6736_v5  ;;  %v2738_v38 = vshll.u32 %v6556_v23, 16  ;;  %v2631_v32 = vsel %vm5712_vm2, %v6540_v41, 0  ;;  %v2888_v41 = vrot.slane %v6556_v23, 1 }
 0x350   : > { %v6720_v8 = vrot.slane %v2562_v3, 7  ;;  %v2139_v54 = vadd.f32 %v2138_v2, %v2050_v43  ;;  %v2227_v51 = vpop.f32.mrf.mxu3  ;;  %v2381_v43 = vpack.c.bf16 %v2349_v20, %v2349_v20  ;;  %v5249_v20 = vld [vmem:[#allocation7 + $0x1b0] sm:$0xff] }
 0x351   : > { %v3799_v39 = vpop.f32.mrf.mxu0  ;;  %v2740_v6 = vrot.slane %v2738_v38, 1  ;;  %4058 = vmatpush.bf16.msra.mxu3 %v5249_v20  ;;  %v5265_v20 = vld [vmem:[#allocation7 + $0x230] sm:$0xff] }
 0x352   : > { %v2228_v55 = vadd.f32 %v2227_v51, %v2139_v54  ;;  %v6728_v48 = vpop.f32.mrf.mxu1  ;;  %v2567_v46 = vor.u32 %v2565_v29, %v6720_v8  ;;  %v2445_v51 = vunpack.c.l.b16 %v2381_v43  ;;  %v3535_v43 = vadd.f32 %v6726_v49, %v6532_v31  ;;  %4236 = vmatpush.bf16.msra.mxu1 %v5265_v20 }
 0x354   : > { %v2317_v17 = vadd.f32 %v2316_v27, %v2228_v55  ;;  %3660 = vmatmul.bf16.gmra.mxu2 %v6732_v19  ;;  %3838 = vmatmul.bf16.gmra.mxu0 %v6556_v23  ;;  %v6741_v36 = vsel %vm5712_vm2, 0, %v2567_v46  ;;  %v5241_v46 = vld [vmem:[#allocation7 + $0x170] sm:$0xff] }
 0x355   : > { %7572 = vst [vmem:[#allocation47_spill] sm:$0xff] %v6741_v36  ;;  %3749 = vmatmul.bf16.gmra.mxu3 %v6736_v5  ;;  %3606 = vmatmul.bf16.gmra.mxu1 %v6741_v36 }
 0x356   : > { %v2350_v27 = vmax.f32 %v2317_v17, 0.0  ;;  %3969 = vmatpush.bf16.msra.mxu2 %v5241_v46  ;;  %v5257_v46 = vld [vmem:[#allocation7 + $0x1f0] sm:$0xff] }
 0x357   : > { %v3621_v3 = vpop.f32.mrf.mxu2  ;;  %4147 = vmatpush.bf16.msra.mxu0 %v5257_v46 }
 0x358   : > { %v2382_v2 = vpack.c.bf16 %v2350_v27, %v2350_v27  ;;  %v3622_v44 = vadd.f32 %v3621_v3, %v3533_v18  ;;  %v3710_v29 = vpop.f32.mrf.mxu3  ;;  %v2736_v18 = vshrl.u32 %v6556_v23, 16  ;;  %v2743_v27 = vshll.u32 %v2631_v32, 16 }
 0x359   : > { %v3801_v54 = vpop.f32.mrf.mxu0 }
 0x35a   : > { %v2446_v33 = vunpack.c.l.b16 %v2382_v2  ;;  %v3711_v37 = vadd.f32 %v3710_v29, %v3622_v44  ;;  %v6748_v55 = vpop.f32.mrf.mxu1  ;;  %v2741_v2 = vor.u32 %v2740_v6, %v2736_v18  ;;  %v2745_v12 = vrot.slane %v2743_v27, 1 }
 0x35b   : > { %v2750_v18 = vshll.u32 %v6586_v28, 16 }
 0x35c   : > { %v6753_v17 = vpack.c.b16 %v2446_v33, %v2445_v51  ;;  %v6755_v5 = vadd.f32 %v3799_v39, %v3711_v37  ;;  %v2889_v39 = vrot.slane %v2631_v32, 1  ;;  %v6764_v37 = vsel %vm613_vm3, %v2741_v2, %v2745_v12 }
 0x35d   : > { %v3538_v32 = vadd.f32 %v6726_v49, %v6543_v14  ;;  %v2748_v14 = vshrl.u32 %v6586_v28, 16 }
 0x35e   : > { %v6768_v31 = vsel %vm854_vm4, %v2888_v41, %v2889_v39 }
 0x35f   : > { %v3623_v3 = vpop.f32.mrf.mxu2  ;;  %7573 = vst [vmem:[#allocation19_spill] sm:$0xff] %v6768_v31 }
 0x360   : > { %v3624_v44 = vadd.f32 %v3623_v3, %v3535_v43  ;;  %v3712_v29 = vpop.f32.mrf.mxu3 }
 0x361   : > { %v3804_v38 = vpop.f32.mrf.mxu0 }
 0x362   : > { %v3713_v51 = vadd.f32 %v3712_v29, %v3624_v44  ;;  %v6761_v33 = vpop.f32.mrf.mxu1 }
 0x364   : > { %3665 = vmatmul.bf16.gmra.mxu2 %v6764_v37  ;;  %3843 = vmatmul.bf16.gmra.mxu0 %v6586_v28  ;;  %v6771_v6 = vadd.f32 %v3801_v54, %v3713_v51  ;;  %v2632_v54 = vsel %vm5712_vm2, %v6570_v62, 0  ;;  %v3540_v51 = vadd.f32 %v6726_v49, %v6562_v15 }
 0x365   : > { %3754 = vmatmul.bf16.gmra.mxu3 %v6768_v31  ;;  %3887 = vmatmul.bf16.vlgmr.msrb.gmra.mxu1 %v6517_v0  ;;  %v2752_v0 = vrot.slane %v2750_v18, 1  ;;  %v2755_v41 = vshll.u32 %v2632_v54, 16  ;;  %v2892_v62 = vrot.slane %v2632_v54, 1 }
 0x367   : > { %v3626_v12 = vpop.f32.mrf.mxu2  ;;  %v2753_v46 = vor.u32 %v2752_v0, %v2748_v14  ;;  %v2762_v0 = vshll.u32 %v6616_v7, 16 }
 0x368   : > { %v3627_v27 = vadd.f32 %v3626_v12, %v3538_v32  ;;  %v3715_v43 = vpop.f32.mrf.mxu3  ;;  %v2891_v12 = vrot.slane %v6586_v28, 1 }
 0x369   : > { %v3806_v3 = vpop.f32.mrf.mxu0 }
 0x36a   : > { %v3716_v2 = vadd.f32 %v3715_v43, %v3627_v27  ;;  %v6778_v44 = vpop.f32.mrf.mxu1  ;;  %v2757_v43 = vrot.slane %v2755_v41, 1  ;;  %v6796_v18 = vsel %vm854_vm4, %v2891_v12, %v2892_v62  ;;  %v3545_v62 = vadd.f32 %v6726_v49, %v6592_v58 }
 0x36b   : > { %7574 = vst [vmem:[#allocation21_spill] sm:$0xff] %v6796_v18 }
 0x36c   : > { %v6783_v29 = vadd.f32 %v3804_v38, %v3716_v2  ;;  %v6792_v38 = vsel %vm613_vm3, %v2753_v46, %v2757_v43  ;;  %v3543_v2 = vadd.f32 %v6726_v49, %v6573_v59  ;;  %v2760_v59 = vshrl.u32 %v6616_v7, 16 }
 0x36f   : > { %v3628_v39 = vpop.f32.mrf.mxu2 }
 0x370   : > { %v3629_v20 = vadd.f32 %v3628_v39, %v3540_v51  ;;  %v3717_v32 = vpop.f32.mrf.mxu3 }
 0x371   : > { %v3809_v27 = vpop.f32.mrf.mxu0 }
 0x372   : > { %v3718_v31 = vadd.f32 %v3717_v32, %v3629_v20  ;;  %v6789_v23 = vpop.f32.mrf.mxu1  ;;  %v2764_v20 = vrot.slane %v2762_v0, 1  ;;  %v5248_v32 = vld [vmem:[#allocation7 + $0x1a8] sm:$0xff] }
 0x373   : > { %4059 = vmatpush.bf16.msra.mxu3 %v5248_v32  ;;  %v5264_v32 = vld [vmem:[#allocation7 + $0x228] sm:$0xff] }
 0x374   : > { %3670 = vmatmul.bf16.gmra.mxu2 %v6792_v38  ;;  %3848 = vmatmul.bf16.gmra.mxu0 %v6616_v7  ;;  %v6799_v15 = vadd.f32 %v3806_v3, %v3718_v31  ;;  %v2633_v31 = vsel %vm5712_vm2, %v6600_v53, 0  ;;  %v5240_v3 = vld [vmem:[#allocation7 + $0x168] sm:$0xff] }
 0x375   : > { %3759 = vmatmul.bf16.gmra.mxu3 %v6796_v18  ;;  %3892 = vmatmul.bf16.gmra.mxu1 %v6547_v24  ;;  %v2767_v43 = vshll.u32 %v2633_v31, 16  ;;  %v2894_v18 = vrot.slane %v6616_v7, 1 }
 0x376   : > { %3970 = vmatpush.bf16.msra.mxu2 %v5240_v3  ;;  %v5256_v3 = vld [vmem:[#allocation7 + $0x1e8] sm:$0xff]  ;;  %4237 = vmatpush.bf16.msra.mxu1 %v5264_v32 }
 0x377   : > { %v3631_v54 = vpop.f32.mrf.mxu2  ;;  %v2769_v28 = vrot.slane %v2767_v43, 1  ;;  %4148 = vmatpush.bf16.msra.mxu0 %v5256_v3 }
 0x378   : > { %v3632_v14 = vadd.f32 %v3631_v54, %v3543_v2  ;;  %v3720_v41 = vpop.f32.mrf.mxu3  ;;  %v2765_v54 = vor.u32 %v2764_v20, %v2760_v59  ;;  %v2774_v59 = vshll.u32 %v6646_v26, 16 }
 0x379   : > { %v3811_v51 = vpop.f32.mrf.mxu0 }
 0x37a   : > { %v3721_v39 = vadd.f32 %v3720_v41, %v3632_v14  ;;  %v6806_v46 = vpop.f32.mrf.mxu1 }
 0x37c   : > { %v6811_v12 = vadd.f32 %v3809_v27, %v3721_v39  ;;  %v2895_v27 = vrot.slane %v2633_v31, 1  ;;  %v6820_v39 = vsel %vm613_vm3, %v2765_v54, %v2769_v28  ;;  %v3548_v31 = vadd.f32 %v6726_v49, %v6603_v10 }
 0x37d   : > { %v2772_v10 = vshrl.u32 %v6646_v26, 16 }
 0x37e   : > { %v6824_v58 = vsel %vm854_vm4, %v2894_v18, %v2895_v27  ;;  %v3550_v27 = vadd.f32 %v6726_v49, %v6622_v22 }
 0x37f   : > { %v3633_v2 = vpop.f32.mrf.mxu2  ;;  %7575 = vst [vmem:[#allocation25_spill] sm:$0xff] %v6824_v58 }
 0x380   : > { %v3634_v14 = vadd.f32 %v3633_v2, %v3545_v62  ;;  %v3722_v41 = vpop.f32.mrf.mxu3 }
 0x381   : > { %v3814_v53 = vpop.f32.mrf.mxu0 }
 0x382   : > { %v3723_v0 = vadd.f32 %v3722_v41, %v3634_v14  ;;  %v6817_v56 = vpop.f32.mrf.mxu1  ;;  %v2776_v14 = vrot.slane %v2774_v59, 1 }
 0x384   : > { %3675 = vmatmul.bf16.gmra.mxu2 %v6820_v39  ;;  %3853 = vmatmul.bf16.gmra.mxu0 %v6646_v26  ;;  %v6827_v20 = vadd.f32 %v3811_v51, %v3723_v0  ;;  %v2634_v51 = vsel %vm5712_vm2, %v6630_v9, 0  ;;  %v2777_v32 = vor.u32 %v2776_v14, %v2772_v10 }
 0x385   : > { %3764 = vmatmul.bf16.gmra.mxu3 %v6824_v58  ;;  %3897 = vmatmul.bf16.gmra.mxu1 %v6577_v63  ;;  %v2779_v0 = vshll.u32 %v2634_v51, 16  ;;  %v2898_v9 = vrot.slane %v2634_v51, 1 }
 0x387   : > { %v3636_v28 = vpop.f32.mrf.mxu2  ;;  %v2781_v58 = vrot.slane %v2779_v0, 1 }
 0x388   : > { %v3637_v43 = vadd.f32 %v3636_v28, %v3548_v31  ;;  %v3725_v18 = vpop.f32.mrf.mxu3 }
 0x389   : > { %v3816_v62 = vpop.f32.mrf.mxu0 }
 0x38a   : > { %v3726_v2 = vadd.f32 %v3725_v18, %v3637_v43  ;;  %v6834_v54 = vpop.f32.mrf.mxu1  ;;  %v2897_v43 = vrot.slane %v6646_v26, 1 }
 0x38c   : > { %v6839_v41 = vadd.f32 %v3814_v53, %v3726_v2  ;;  %v6848_v53 = vsel %vm613_vm3, %v2777_v32, %v2781_v58  ;;  %v6852_v59 = vsel %vm854_vm4, %v2897_v43, %v2898_v9  ;;  %v3553_v2 = vadd.f32 %v6726_v49, %v6633_v42 }
 0x38d   : > { %7576 = vst [vmem:[#allocation20_spill] sm:$0xff] %v6852_v59  ;;  %v2786_v58 = vshll.u32 %v6676_v11, 16  ;;  %v2784_v42 = vshrl.u32 %v6676_v11, 16  ;;  %v3555_v9 = vadd.f32 %v6726_v49, %v6652_v4 }
 0x38f   : > { %v3638_v3 = vpop.f32.mrf.mxu2  ;;  %v2788_v32 = vrot.slane %v2786_v58, 1 }
 0x390   : > { %v3639_v31 = vadd.f32 %v3638_v3, %v3550_v27  ;;  %v3727_v28 = vpop.f32.mrf.mxu3 }
 0x391   : > { %v3819_v18 = vpop.f32.mrf.mxu0 }
 0x392   : > { %v3728_v7 = vadd.f32 %v3727_v28, %v3639_v31  ;;  %v6845_v40 = vpop.f32.mrf.mxu1  ;;  %v5247_v31 = vld [vmem:[#allocation7 + $0x1a0] sm:$0xff] }
 0x393   : > { %4060 = vmatpush.bf16.msra.mxu3 %v5247_v31  ;;  %v5246_v31 = vld [vmem:[#allocation7 + $0x198] sm:$0xff] }
 0x394   : > { %3680 = vmatmul.bf16.gmra.mxu2 %v6848_v53  ;;  %3858 = vmatmul.bf16.gmra.mxu0 %v6676_v11  ;;  %v6855_v22 = vadd.f32 %v3816_v62, %v3728_v7  ;;  %v2635_v7 = vsel %vm5712_vm2, %v6660_v30, 0  ;;  %v5239_v62 = vld [vmem:[#allocation7 + $0x160] sm:$0xff] }
 0x395   : > { %3769 = vmatmul.bf16.gmra.mxu3 %v6852_v59  ;;  %3902 = vmatmul.bf16.gmra.mxu1 %v6607_v50  ;;  %v2791_v43 = vshll.u32 %v2635_v7, 16  ;;  %v2900_v59 = vrot.slane %v6676_v11, 1  ;;  %v5255_v30 = vld [vmem:[#allocation7 + $0x1e0] sm:$0xff] }
 0x396   : > { %7577 = vst [vmem:[#allocation24_spill] sm:$0xff] %v6855_v22  ;;  %3971 = vmatpush.bf16.msra.mxu2 %v5239_v62  ;;  %4149 = vmatpush.bf16.msra.mxu0 %v5255_v30 }
 0x397   : > { %v3641_v51 = vpop.f32.mrf.mxu2  ;;  %v2793_v58 = vrot.slane %v2791_v43, 1  ;;  %v3558_v43 = vadd.f32 %v6726_v49, %v6663_v35  ;;  %4061 = vmatpush.bf16.msra.mxu3 %v5246_v31  ;;  %v2636_v35 = vsel %vm5712_vm2, %v6690_v16, 0  ;;  %v5236_v31 = vld [vmem:[#allocation7 + $0x148] sm:$0xff] }
 0x398   : > { %v3642_v14 = vadd.f32 %v3641_v51, %v3553_v2  ;;  %v3730_v10 = vpop.f32.mrf.mxu3  ;;  %v2789_v51 = vor.u32 %v2788_v32, %v2784_v42  ;;  %v5238_v32 = vld [vmem:[#allocation7 + $0x158] sm:$0xff] }
 0x399   : > { %v3821_v0 = vpop.f32.mrf.mxu0  ;;  %v5254_v42 = vld [vmem:[#allocation7 + $0x1d8] sm:$0xff] }
 0x39a   : > { %v3731_v27 = vadd.f32 %v3730_v10, %v3642_v14  ;;  %v6862_v3 = vpop.f32.mrf.mxu1  ;;  %3972 = vmatpush.bf16.msra.mxu2 %v5238_v32  ;;  %4150 = vmatpush.bf16.msra.mxu0 %v5254_v42  ;;  %v5244_v42 = vld [vmem:[#allocation7 + $0x188] sm:$0xff] }
 0x39c   : > { %v6867_v28 = vadd.f32 %v3819_v18, %v3731_v27  ;;  %v2901_v18 = vrot.slane %v2635_v7, 1  ;;  %v6876_v27 = vsel %vm613_vm3, %v2789_v51, %v2793_v58  ;;  %v5263_v7 = vld [vmem:[#allocation7 + $0x220] sm:$0xff] }
 0x39d   : > { %7579 = vst [vmem:[#allocation49_spill] sm:$0xff] %v6876_v27  ;;  %4238 = vmatpush.bf16.msra.mxu1 %v5263_v7  ;;  %v5252_v7 = vld [vmem:[#allocation7 + $0x1c8] sm:$0xff] }
 0x39e   : > { %7578 = vst [vmem:[#allocation30_spill] sm:$0xff] %v6867_v28  ;;  %v6880_v4 = vsel %vm854_vm4, %v2900_v59, %v2901_v18  ;;  %v2798_v59 = vshll.u32 %v6706_v25, 16  ;;  %v2904_v28 = vrot.slane %v2636_v35, 1 }
 0x39f   : > { %v3643_v2 = vpop.f32.mrf.mxu2  ;;  %7580 = vst [vmem:[#allocation50_spill] sm:$0xff] %v6880_v4 }
 0x3a0   : > { %v3644_v14 = vadd.f32 %v3643_v2, %v3555_v9  ;;  %v3732_v10 = vpop.f32.mrf.mxu3  ;;  %v2800_v32 = vrot.slane %v2798_v59, 1  ;;  %v2903_v59 = vrot.slane %v6706_v25, 1 }
 0x3a1   : > { %v3824_v26 = vpop.f32.mrf.mxu0 }
 0x3a2   : > { %v3733_v22 = vadd.f32 %v3732_v10, %v3644_v14  ;;  %v6873_v62 = vpop.f32.mrf.mxu1  ;;  %v5237_v10 = vld [vmem:[#allocation7 + $0x150] sm:$0xff] }
 0x3a3   : > { %3973 = vmatpush.bf16.msra.mxu2 %v5237_v10 }
 0x3a4   : > { %3685 = vmatmul.bf16.gmra.mxu2 %v6876_v27  ;;  %3863 = vmatmul.bf16.gmra.mxu0 %v6706_v25  ;;  %v6883_v9 = vadd.f32 %v3821_v0, %v3733_v22  ;;  %v5245_v22 = vld [vmem:[#allocation7 + $0x190] sm:$0xff] }
 0x3a5   : > { %3774 = vmatmul.bf16.gmra.mxu3 %v6880_v4  ;;  %3907 = vmatmul.bf16.gmra.mxu1 %v6637_v52  ;;  %v5253_v0 = vld [vmem:[#allocation7 + $0x1d0] sm:$0xff]  ;;  %v2803_v4 = vshll.u32 %v2636_v35, 16 }
 0x3a6   : > { %7581 = vst [vmem:[#allocation48_spill] sm:$0xff] %v6883_v9  ;;  %4062 = vmatpush.bf16.msra.mxu3 %v5245_v22  ;;  %4151 = vmatpush.bf16.msra.mxu0 %v5253_v0  ;;  %v5235_v22 = vld [vmem:[#allocation7 + $0x140] sm:$0xff] }
 0x3a7   : > { %v3646_v2 = vpop.f32.mrf.mxu2  ;;  %3974 = vmatpush.bf16.msra.mxu2 %v5236_v31  ;;  %v5243_v0 = vld [vmem:[#allocation7 + $0x180] sm:$0xff] }
 0x3a8   : > { %v3647_v51 = vadd.f32 %v3646_v2, %v3558_v43  ;;  %v3735_v14 = vpop.f32.mrf.mxu3  ;;  %v2796_v2 = vshrl.u32 %v6706_v25, 16  ;;  %v5251_v9 = vld [vmem:[#allocation7 + $0x1c0] sm:$0xff] }
 0x3a9   : > { %v3826_v30 = vpop.f32.mrf.mxu0 }
 0x3aa   : > { %v3736_v58 = vadd.f32 %v3735_v14, %v3647_v51  ;;  %v6890_v18 = vpop.f32.mrf.mxu1  ;;  %v3560_v51 = vadd.f32 %v6726_v49, %v6682_v57  ;;  %4063 = vmatpush.bf16.msra.mxu3 %v5244_v42  ;;  %v2801_v11 = vor.u32 %v2800_v32, %v2796_v2  ;;  %4152 = vmatpush.bf16.msra.mxu0 %v5252_v7 }
 0x3ab   : > { %3975 = vmatpush.bf16.msra.mxu2 %v5235_v22  ;;  %v6908_v32 = vsel %vm854_vm4, %v2903_v59, %v2904_v28  ;;  %v3565_v22 = vadd.f32 %v6726_v49, %v6712_v13 }
 0x3ac   : > { %v6895_v43 = vadd.f32 %v3824_v26, %v3736_v58  ;;  %v2805_v58 = vrot.slane %v2803_v4, 1  ;;  %v3563_v4 = vadd.f32 %v6726_v49, %v6693_v47  ;;  %v2572_v47 = vshll.u32 %v6753_v17, 16 }
 0x3ae   : > { %7582 = vst [vmem:[#allocation18_spill] sm:$0xff] %v6895_v43  ;;  %4064 = vmatpush.bf16.msra.mxu3 %v5243_v0  ;;  %v6904_v57 = vsel %vm613_vm3, %v2801_v11, %v2805_v58  ;;  %4153 = vmatpush.bf16.msra.mxu0 %v5251_v9  ;;  %v2569_v11 = vshrl.u32 %v6753_v17, 16  ;;  %v2810_v9 = vshll.u32 %v6741_v36, 16 }
 0x3af   : > { %v3648_v14 = vpop.f32.mrf.mxu2 }
 0x3b0   : > { %v3649_v16 = vadd.f32 %v3648_v14, %v3560_v51  ;;  %v3737_v10 = vpop.f32.mrf.mxu3  ;;  %v6924_v14 = vrot.slane %v2569_v11, 7 }
 0x3b1   : > { %v3829_v26 = vpop.f32.mrf.mxu0 }
 0x3b2   : > { %v3738_v43 = vadd.f32 %v3737_v10, %v3649_v16  ;;  %v6901_v27 = vpop.f32.mrf.mxu1  ;;  %v2808_v10 = vshrl.u32 %v6741_v36, 16 }
 0x3b4   : > { %3690 = vmatmul.bf16.gmra.mxu2 %v6904_v57  ;;  %3868 = vmatmul.bf16.gmra.mxu0 %v6741_v36  ;;  %v6911_v31 = vadd.f32 %v3826_v30, %v3738_v43  ;;  %v2637_v30 = vsel %vm5712_vm2, %v6720_v8, 0  ;;  %v2812_v43 = vrot.slane %v2810_v9, 1  ;;  %v2906_v8 = vrot.slane %v6741_v36, 1 }
 0x3b5   : > { %3779 = vmatmul.bf16.gmra.mxu3 %v6908_v32  ;;  %3912 = vmatmul.bf16.gmra.mxu1 %v6667_v60  ;;  %v2815_v59 = vshll.u32 %v2637_v30, 16  ;;  %v2907_v17 = vrot.slane %v2637_v30, 1  ;;  %v5262_v30 = vld [vmem:[#allocation7 + $0x218] sm:$0xff] }
 0x3b6   : > { %v2813_v58 = vor.u32 %v2812_v43, %v2808_v10  ;;  %v3568_v10 = vadd.f32 %v6726_v49, %v6728_v48  ;;  %4239 = vmatpush.bf16.msra.mxu1 %v5262_v30 }
 0x3b7   : > { %v3651_v35 = vpop.f32.mrf.mxu2  ;;  %v2817_v9 = vrot.slane %v2815_v59, 1  ;;  %v6945_v43 = vsel %vm854_vm4, %v2906_v8, %v2907_v17 }
 0x3b8   : > { %v3652_v42 = vadd.f32 %v3651_v35, %v3563_v4  ;;  %v3740_v7 = vpop.f32.mrf.mxu3  ;;  %v2574_v4 = vor.u32 %v2572_v47, %v6924_v14  ;;  %7583 = vst [vmem:[#allocation33_spill] sm:$0xff] %v6945_v43 }
 0x3b9   : > { %v3831_v28 = vpop.f32.mrf.mxu0 }
 0x3ba   : > { %v3741_v2 = vadd.f32 %v3740_v7, %v3652_v42  ;;  %v6919_v51 = vpop.f32.mrf.mxu1  ;;  %v6941_v13 = vsel %vm5712_vm2, 0, %v2574_v4 }
 0x3bc   : > { %v6926_v16 = vadd.f32 %v3829_v26, %v3741_v2  ;;  %v6937_v2 = vsel %vm613_vm3, %v2813_v58, %v2817_v9 }
 0x3bf   : > { %v3653_v0 = vpop.f32.mrf.mxu2 }
 0x3c0   : > { %v3654_v35 = vadd.f32 %v3653_v0, %v3565_v22  ;;  %v3742_v42 = vpop.f32.mrf.mxu3 }
 0x3c1   : > { %v3834_v11 = vpop.f32.mrf.mxu0 }
 0x3c2   : > { %v3743_v26 = vadd.f32 %v3742_v42, %v3654_v35  ;;  %v6934_v7 = vpop.f32.mrf.mxu1 }
 0x3c4   : > { %3695 = vmatmul.bf16.gmra.mxu2 %v6937_v2  ;;  %3873 = vmatmul.bf16.gmra.mxu0 %v6941_v13  ;;  %v6948_v47 = vadd.f32 %v3831_v28, %v3743_v26  ;;  %v3570_v28 = vadd.f32 %v6726_v49, %v6748_v55  ;;  %v3573_v55 = vadd.f32 %v6726_v49, %v6761_v33 }
 0x3c5   : > { %3784 = vmatmul.bf16.gmra.mxu3 %v6945_v43  ;;  %3917 = vmatmul.bf16.gmra.mxu1 %v6697_v61 }
 0x3c7   : > { %v3656_v59 = vpop.f32.mrf.mxu2 }
 0x3c8   : > { %v3657_v22 = vadd.f32 %v3656_v59, %v3568_v10  ;;  %v3745_v0 = vpop.f32.mrf.mxu3 }
 0x3c9   : > { %v3836_v58 = vpop.f32.mrf.mxu0 }
 0x3ca   : > { %v3746_v4 = vadd.f32 %v3745_v0, %v3657_v22  ;;  %v6954_v35 = vpop.f32.mrf.mxu1 }
 0x3cc   : > { %v6956_v42 = vadd.f32 %v3834_v11, %v3746_v4 }
 0x3cf   : > { %v3658_v8 = vpop.f32.mrf.mxu2 }
 0x3d0   : > { %v3659_v9 = vadd.f32 %v3658_v8, %v3570_v28  ;;  %v3747_v26 = vpop.f32.mrf.mxu3 }
 0x3d1   : > { %v3839_v17 = vpop.f32.mrf.mxu0 }
 0x3d2   : > { %v3748_v43 = vadd.f32 %v3747_v26, %v3659_v9  ;;  %v6960_v36 = vpop.f32.mrf.mxu1  ;;  %v7584_v26 = vld [vmem:[#allocation27_spill] sm:$0xff] }
 0x3d4   : > { %3976 = vmatmul.bf16.vlgmr.msra.gmra.mxu2 %v6521_v1  ;;  %4154 = vmatmul.bf16.vlgmr.msra.gmra.mxu0 %v6547_v24  ;;  %v6964_v48 = vadd.f32 %v3836_v58, %v3748_v43  ;;  %v3575_v1 = vadd.f32 %v6726_v49, %v6778_v44  ;;  %v5261_v44 = vld [vmem:[#allocation7 + $0x210] sm:$0xff] }
 0x3d5   : > { %4065 = vmatmul.bf16.vlgmr.msra.gmra.mxu3 %v6427_v21  ;;  %3922 = vmatmul.bf16.gmra.mxu1 %v6732_v19 }
 0x3d6   : > { %4240 = vmatpush.bf16.msra.mxu1 %v5261_v44  ;;  %v7585_v44 = vld [vmem:[#allocation41_spill] sm:$0xff] }
 0x3d7   : > { %v3661_v11 = vpop.f32.mrf.mxu2 }
 0x3d8   : > { %v3662_v30 = vadd.f32 %v3661_v11, %v3573_v55  ;;  %v3750_v10 = vpop.f32.mrf.mxu3 }
 0x3d9   : > { %v3841_v59 = vpop.f32.mrf.mxu0 }
 0x3da   : > { %v3751_v22 = vadd.f32 %v3750_v10, %v3662_v30  ;;  %v6970_v0 = vpop.f32.mrf.mxu1 }
 0x3dc   : > { %v6972_v4 = vadd.f32 %v3839_v17, %v3751_v22  ;;  %v3578_v17 = vadd.f32 %v6726_v49, %v6789_v23 }
 0x3df   : > { %v3663_v24 = vpop.f32.mrf.mxu2 }
 0x3e0   : > { %v3664_v43 = vadd.f32 %v3663_v24, %v3575_v1  ;;  %v3752_v21 = vpop.f32.mrf.mxu3 }
 0x3e1   : > { %v3844_v58 = vpop.f32.mrf.mxu0 }
 0x3e2   : > { %v3753_v28 = vadd.f32 %v3752_v21, %v3664_v43  ;;  %v3888_v8 = vpop.f32.mrf.mxu1 }
 0x3e3   : > { %v6977_v33 = vadd.f32 %v3888_v8, %v6755_v5 }
 0x3e4   : > { %3981 = vmatmul.bf16.gmra.mxu2 %v6551_v45  ;;  %4159 = vmatmul.bf16.gmra.mxu0 %v6577_v63  ;;  %v6981_v9 = vadd.f32 %v3841_v59, %v3753_v28  ;;  %v3580_v59 = vadd.f32 %v6726_v49, %v6806_v46  ;;  %v3583_v46 = vadd.f32 %v6726_v49, %v6817_v56 }
 0x3e5   : > { %4070 = vmatmul.bf16.gmra.mxu3 %v7584_v26  ;;  %3927 = vmatmul.bf16.gmra.mxu1 %v6764_v37 }
 0x3e7   : > { %v3666_v55 = vpop.f32.mrf.mxu2 }
 0x3e8   : > { %v3667_v11 = vadd.f32 %v3666_v55, %v3578_v17  ;;  %v3755_v30 = vpop.f32.mrf.mxu3 }
 0x3e9   : > { %v3846_v5 = vpop.f32.mrf.mxu0 }
 0x3ea   : > { %v3756_v10 = vadd.f32 %v3755_v30, %v3667_v11  ;;  %v3890_v22 = vpop.f32.mrf.mxu1 }
 0x3eb   : > { %v6988_v1 = vadd.f32 %v3890_v22, %v6771_v6 }
 0x3ec   : > { %v6990_v63 = vadd.f32 %v3844_v58, %v3756_v10  ;;  %v7586_v58 = vld [vmem:[#allocation28_spill] sm:$0xff] }
 0x3ef   : > { %v3668_v24 = vpop.f32.mrf.mxu2 }
 0x3f0   : > { %v3669_v43 = vadd.f32 %v3668_v24, %v3580_v59  ;;  %v3757_v21 = vpop.f32.mrf.mxu3 }
 0x3f1   : > { %v3849_v28 = vpop.f32.mrf.mxu0 }
 0x3f2   : > { %v3758_v23 = vadd.f32 %v3757_v21, %v3669_v43  ;;  %v3893_v8 = vpop.f32.mrf.mxu1 }
 0x3f3   : > { %v6995_v26 = vadd.f32 %v3893_v8, %v6783_v29 }
 0x3f4   : > { %3986 = vmatmul.bf16.gmra.mxu2 %v7585_v44  ;;  %4164 = vmatmul.bf16.gmra.mxu0 %v6607_v50  ;;  %v6999_v6 = vadd.f32 %v3846_v5, %v3758_v23  ;;  %v3585_v50 = vadd.f32 %v6726_v49, %v6834_v54  ;;  %v5260_v54 = vld [vmem:[#allocation7 + $0x208] sm:$0xff] }
 0x3f5   : > { %4075 = vmatmul.bf16.gmra.mxu3 %v7586_v58  ;;  %3932 = vmatmul.bf16.gmra.mxu1 %v6792_v38  ;;  %v7587_v58 = vld [vmem:[#allocation44_spill] sm:$0xff] }
 0x3f6   : > { %4241 = vmatpush.bf16.msra.mxu1 %v5260_v54  ;;  %v7589_v54 = vld [vmem:[#allocation42_spill] sm:$0xff] }
 0x3f7   : > { %v3671_v17 = vpop.f32.mrf.mxu2 }
 0x3f8   : > { %v3672_v55 = vadd.f32 %v3671_v17, %v3583_v46  ;;  %v3760_v11 = vpop.f32.mrf.mxu3  ;;  %v3588_v46 = vadd.f32 %v6726_v49, %v6845_v40 }
 0x3f9   : > { %v3851_v30 = vpop.f32.mrf.mxu0 }
 0x3fa   : > { %v3761_v10 = vadd.f32 %v3760_v11, %v3672_v55  ;;  %v3895_v29 = vpop.f32.mrf.mxu1 }
 0x3fb   : > { %v7006_v22 = vadd.f32 %v3895_v29, %v6799_v15 }
 0x3fc   : > { %v7008_v59 = vadd.f32 %v3849_v28, %v3761_v10  ;;  %v7588_v28 = vld [vmem:[#allocation38_spill] sm:$0xff] }
 0x3ff   : > { %v3673_v5 = vpop.f32.mrf.mxu2 }
 0x400   : > { %v3674_v24 = vadd.f32 %v3673_v5, %v3585_v50  ;;  %v3762_v43 = vpop.f32.mrf.mxu3 }
 0x401   : > { %v3854_v21 = vpop.f32.mrf.mxu0 }
 0x402   : > { %v3763_v23 = vadd.f32 %v3762_v43, %v3674_v24  ;;  %v3898_v56 = vpop.f32.mrf.mxu1 }
 0x403   : > { %v7013_v8 = vadd.f32 %v3898_v56, %v6811_v12 }
 0x404   : > { %3991 = vmatmul.bf16.gmra.mxu2 %v7587_v58  ;;  %4169 = vmatmul.bf16.gmra.mxu0 %v6637_v52  ;;  %v7017_v15 = vadd.f32 %v3851_v30, %v3763_v23  ;;  %v3590_v30 = vadd.f32 %v6726_v49, %v6862_v3  ;;  %v3593_v3 = vadd.f32 %v6726_v49, %v6873_v62 }
 0x405   : > { %4080 = vmatmul.bf16.gmra.mxu3 %v7588_v28  ;;  %3937 = vmatmul.bf16.gmra.mxu1 %v6820_v39 }
 0x407   : > { %v3676_v17 = vpop.f32.mrf.mxu2 }
 0x408   : > { %v3677_v55 = vadd.f32 %v3676_v17, %v3588_v46  ;;  %v3765_v11 = vpop.f32.mrf.mxu3 }
 0x409   : > { %v3856_v12 = vpop.f32.mrf.mxu0 }
 0x40a   : > { %v3766_v10 = vadd.f32 %v3765_v11, %v3677_v55  ;;  %v3900_v29 = vpop.f32.mrf.mxu1 }
 0x40b   : > { %v7024_v50 = vadd.f32 %v3900_v29, %v6827_v20  ;;  %v7591_v29 = vld [vmem:[#allocation24_spill] sm:$0xff] }
 0x40c   : > { %v7026_v52 = vadd.f32 %v3854_v21, %v3766_v10  ;;  %v7590_v21 = vld [vmem:[#allocation39_spill] sm:$0xff] }
 0x40f   : > { %v3678_v5 = vpop.f32.mrf.mxu2 }
 0x410   : > { %v3679_v24 = vadd.f32 %v3678_v5, %v3590_v30  ;;  %v3767_v43 = vpop.f32.mrf.mxu3 }
 0x411   : > { %v3859_v23 = vpop.f32.mrf.mxu0 }
 0x412   : > { %v3768_v40 = vadd.f32 %v3767_v43, %v3679_v24  ;;  %v3903_v56 = vpop.f32.mrf.mxu1 }
 0x413   : > { %v7031_v28 = vadd.f32 %v3903_v56, %v6839_v41 }
 0x414   : > { %3996 = vmatmul.bf16.gmra.mxu2 %v7589_v54  ;;  %4174 = vmatmul.bf16.gmra.mxu0 %v6667_v60  ;;  %v7035_v20 = vadd.f32 %v3856_v12, %v3768_v40  ;;  %v3595_v60 = vadd.f32 %v6726_v49, %v6890_v18  ;;  %v5259_v18 = vld [vmem:[#allocation7 + $0x200] sm:$0xff] }
 0x415   : > { %4085 = vmatmul.bf16.gmra.mxu3 %v7590_v21  ;;  %3942 = vmatmul.bf16.gmra.mxu1 %v6848_v53  ;;  %v7592_v21 = vld [vmem:[#allocation30_spill] sm:$0xff] }
 0x416   : > { %4242 = vmatpush.bf16.msra.mxu1 %v5259_v18  ;;  %v7599_v18 = vld [vmem:[#allocation18_spill] sm:$0xff] }
 0x417   : > { %v3681_v46 = vpop.f32.mrf.mxu2 }
 0x418   : > { %v3682_v17 = vadd.f32 %v3681_v46, %v3593_v3  ;;  %v3770_v55 = vpop.f32.mrf.mxu3  ;;  %v7594_v46 = vld [vmem:[#allocation15_spill] sm:$0xff] }
 0x419   : > { %v3861_v11 = vpop.f32.mrf.mxu0 }
 0x41a   : > { %v3771_v10 = vadd.f32 %v3770_v55, %v3682_v17  ;;  %v3905_v41 = vpop.f32.mrf.mxu1  ;;  %v7597_v55 = vld [vmem:[#allocation49_spill] sm:$0xff] }
 0x41b   : > { %v7042_v30 = vadd.f32 %v3905_v41, %v7591_v29 }
 0x41c   : > { %v7044_v5 = vadd.f32 %v3859_v23, %v3771_v10  ;;  %v7596_v23 = vld [vmem:[#allocation29_spill] sm:$0xff]  ;;  %v3598_v10 = vadd.f32 %v6726_v49, %v6901_v27 }
 0x41f   : > { %v3683_v12 = vpop.f32.mrf.mxu2 }
 0x420   : > { %v3684_v24 = vadd.f32 %v3683_v12, %v3595_v60  ;;  %v3772_v43 = vpop.f32.mrf.mxu3 }
 0x421   : > { %v3864_v40 = vpop.f32.mrf.mxu0 }
 0x422   : > { %v3773_v56 = vadd.f32 %v3772_v43, %v3684_v24  ;;  %v3908_v62 = vpop.f32.mrf.mxu1 }
 0x423   : > { %v7049_v3 = vadd.f32 %v3908_v62, %v7592_v21  ;;  %v7598_v62 = vld [vmem:[#allocation48_spill] sm:$0xff] }
 0x424   : > { %4001 = vmatmul.bf16.gmra.mxu2 %v7594_v46  ;;  %4179 = vmatmul.bf16.gmra.mxu0 %v6697_v61  ;;  %v7053_v17 = vadd.f32 %v3861_v11, %v3773_v56  ;;  %v3600_v11 = vadd.f32 %v6726_v49, %v6919_v51  ;;  %v3603_v51 = vadd.f32 %v6726_v49, %v6934_v7 }
 0x425   : > { %7593 = vst [vmem:[#allocation34_spill] sm:$0xff] %v7049_v3  ;;  %4090 = vmatmul.bf16.gmra.mxu3 %v7596_v23  ;;  %3947 = vmatmul.bf16.gmra.mxu1 %v7597_v55 }
 0x426   : > { %7595 = vst [vmem:[#allocation35_spill] sm:$0xff] %v7053_v17 }
 0x427   : > { %v3686_v41 = vpop.f32.mrf.mxu2 }
 0x428   : > { %v3687_v29 = vadd.f32 %v3686_v41, %v3598_v10  ;;  %v3775_v60 = vpop.f32.mrf.mxu3  ;;  %v7600_v41 = vld [vmem:[#allocation45_spill] sm:$0xff] }
 0x429   : > { %v3866_v12 = vpop.f32.mrf.mxu0 }
 0x42a   : > { %v3776_v24 = vadd.f32 %v3775_v60, %v3687_v29  ;;  %v3910_v43 = vpop.f32.mrf.mxu1 }
 0x42b   : > { %v7060_v21 = vadd.f32 %v3910_v43, %v7598_v62 }
 0x42c   : > { %v7062_v61 = vadd.f32 %v3864_v40, %v3776_v24  ;;  %v7601_v40 = vld [vmem:[#allocation31_spill] sm:$0xff] }
 0x42f   : > { %v3688_v56 = vpop.f32.mrf.mxu2 }
 0x430   : > { %v3689_v23 = vadd.f32 %v3688_v56, %v3600_v11  ;;  %v3777_v3 = vpop.f32.mrf.mxu3 }
 0x431   : > { %v3869_v17 = vpop.f32.mrf.mxu0 }
 0x432   : > { %v3778_v27 = vadd.f32 %v3777_v3, %v3689_v23  ;;  %v3913_v46 = vpop.f32.mrf.mxu1 }
 0x433   : > { %v7067_v10 = vadd.f32 %v3913_v46, %v7599_v18 }
 0x434   : > { %4006 = vmatmul.bf16.gmra.mxu2 %v7600_v41  ;;  %4184 = vmatmul.bf16.gmra.mxu0 %v6732_v19  ;;  %v7071_v29 = vadd.f32 %v3866_v12, %v3778_v27  ;;  %v3605_v19 = vadd.f32 %v6726_v49, %v6954_v35  ;;  %v3608_v35 = vadd.f32 %v6726_v49, %v6960_v36 }
 0x435   : > { %4095 = vmatmul.bf16.gmra.mxu3 %v7601_v40  ;;  %3952 = vmatmul.bf16.gmra.mxu1 %v6904_v57  ;;  %v3610_v36 = vadd.f32 %v6726_v49, %v6970_v0 }
 0x437   : > { %v3691_v60 = vpop.f32.mrf.mxu2 }
 0x438   : > { %v3692_v24 = vadd.f32 %v3691_v60, %v3603_v51  ;;  %v3780_v3 = vpop.f32.mrf.mxu3  ;;  %v7602_v60 = vld [vmem:[#allocation46_spill] sm:$0xff] }
 0x439   : > { %v3871_v43 = vpop.f32.mrf.mxu0 }
 0x43a   : > { %v3781_v62 = vadd.f32 %v3780_v3, %v3692_v24  ;;  %v3915_v46 = vpop.f32.mrf.mxu1 }
 0x43b   : > { %v7078_v11 = vadd.f32 %v3915_v46, %v6911_v31  ;;  %v2927_v46 = vshll.u32 %v6941_v13, 16 }
 0x43c   : > { %v7080_v56 = vadd.f32 %v3869_v17, %v3781_v62  ;;  %v7603_v17 = vld [vmem:[#allocation40_spill] sm:$0xff] }
 0x43f   : > { %v3693_v12 = vpop.f32.mrf.mxu2 }
 0x440   : > { %v3694_v23 = vadd.f32 %v3693_v12, %v3605_v19  ;;  %v3782_v27 = vpop.f32.mrf.mxu3 }
 0x441   : > { %v3874_v18 = vpop.f32.mrf.mxu0 }
 0x442   : > { %v3783_v40 = vadd.f32 %v3782_v27, %v3694_v23  ;;  %v3918_v7 = vpop.f32.mrf.mxu1 }
 0x443   : > { %v7085_v51 = vadd.f32 %v3918_v7, %v6926_v16 }
 0x444   : > { %4011 = vmatmul.bf16.gmra.mxu2 %v7602_v60  ;;  %4189 = vmatmul.bf16.gmra.mxu0 %v6764_v37  ;;  %v7089_v31 = vadd.f32 %v3871_v43, %v3783_v40  ;;  %v7102_v37 = vsel %vm5712_vm2, %v6924_v14, 0  ;;  %v2929_v43 = vrot.slane %v2927_v46, 1  ;;  %v2925_v40 = vshrl.u32 %v6941_v13, 16  ;;  %v7605_v46 = vld [vmem:[#allocation13_spill] sm:$0xff] }
 0x445   : > { %4100 = vmatmul.bf16.gmra.mxu3 %v7603_v17  ;;  %3957 = vmatmul.bf16.gmra.mxu1 %v6937_v2  ;;  %v2932_v7 = vshll.u32 %v7102_v37, 16 }
 0x447   : > { %v3696_v24 = vpop.f32.mrf.mxu2  ;;  %v2934_v34 = vrot.slane %v2932_v7, 1 }
 0x448   : > { %v3697_v3 = vadd.f32 %v3696_v24, %v3608_v35  ;;  %v3785_v62 = vpop.f32.mrf.mxu3 }
 0x449   : > { %v3876_v16 = vpop.f32.mrf.mxu0 }
 0x44a   : > { %v3786_v19 = vadd.f32 %v3785_v62, %v3697_v3  ;;  %v3920_v12 = vpop.f32.mrf.mxu1 }
 0x44b   : > { %v7097_v23 = vadd.f32 %v3920_v12, %v6948_v47  ;;  %v2930_v47 = vor.u32 %v2929_v43, %v2925_v40 }
 0x44c   : > { %v7104_v27 = vadd.f32 %v3874_v18, %v3786_v19  ;;  %v7604_v18 = vld [vmem:[#allocation19_spill] sm:$0xff] }
 0x44d   : > { %v7116_v49 = vsel %vm613_vm3, %v2930_v47, %v2934_v34 }
 0x44f   : > { %v3698_v17 = vpop.f32.mrf.mxu2 }
 0x450   : > { %v3699_v35 = vadd.f32 %v3698_v17, %v3610_v36  ;;  %v3787_v24 = vpop.f32.mrf.mxu3 }
 0x451   : > { %v4155_v3 = vpop.f32.mrf.mxu0 }
 0x452   : > { %v3788_v62 = vadd.f32 %v3787_v24, %v3699_v35  ;;  %v3923_v12 = vpop.f32.mrf.mxu1 }
 0x453   : > { %v7111_v14 = vadd.f32 %v3923_v12, %v6956_v42 }
 0x454   : > { %4016 = vmatmul.bf16.gmra.mxu2 %v7604_v18  ;;  %4194 = vmatmul.bf16.gmra.mxu0 %v6792_v38  ;;  %v7118_v0 = vadd.f32 %v3876_v16, %v3788_v62 }
 0x455   : > { %4105 = vmatmul.bf16.gmra.mxu3 %v7605_v46  ;;  %3962 = vmatmul.bf16.gmra.mxu1 %v7116_v49 }
 0x457   : > { %v3977_v19 = vpop.f32.mrf.mxu2 }
 0x458   : > { %v3978_v43 = vadd.f32 %v3977_v19, %v6977_v33  ;;  %v4066_v36 = vpop.f32.mrf.mxu3  ;;  %v7606_v33 = vld [vmem:[#allocation21_spill] sm:$0xff] }
 0x459   : > { %v4157_v40 = vpop.f32.mrf.mxu0 }
 0x45a   : > { %v4067_v42 = vadd.f32 %v4066_v36, %v3978_v43  ;;  %v3925_v7 = vpop.f32.mrf.mxu1 }
 0x45b   : > { %v7124_v17 = vadd.f32 %v3925_v7, %v6964_v48  ;;  %v7607_v48 = vld [vmem:[#allocation14_spill] sm:$0xff] }
 0x45c   : > { %v7126_v38 = vadd.f32 %v4155_v3, %v4067_v42 }
 0x45f   : > { %v3979_v35 = vpop.f32.mrf.mxu2 }
 0x460   : > { %v3980_v16 = vadd.f32 %v3979_v35, %v6988_v1  ;;  %v4068_v24 = vpop.f32.mrf.mxu3 }
 0x461   : > { %v4160_v47 = vpop.f32.mrf.mxu0 }
 0x462   : > { %v4069_v62 = vadd.f32 %v4068_v24, %v3980_v16  ;;  %v3928_v12 = vpop.f32.mrf.mxu1 }
 0x463   : > { %v7130_v34 = vadd.f32 %v3928_v12, %v6972_v4 }
 0x464   : > { %4021 = vmatmul.bf16.gmra.mxu2 %v7606_v33  ;;  %4199 = vmatmul.bf16.gmra.mxu0 %v6820_v39  ;;  %v7134_v46 = vadd.f32 %v4157_v40, %v4069_v62  ;;  %v7608_v62 = vld [vmem:[#allocation25_spill] sm:$0xff] }
 0x465   : > { %4110 = vmatmul.bf16.gmra.mxu3 %v7607_v48  ;;  %4243 = vmatmul.bf16.vlgmr.msra.gmra.mxu1 %v6551_v45 }
 0x467   : > { %v3982_v3 = vpop.f32.mrf.mxu2 }
 0x468   : > { %v3983_v1 = vadd.f32 %v3982_v3, %v6995_v26  ;;  %v4071_v19 = vpop.f32.mrf.mxu3 }
 0x469   : > { %v4162_v42 = vpop.f32.mrf.mxu0 }
 0x46a   : > { %v4072_v43 = vadd.f32 %v4071_v19, %v3983_v1  ;;  %v3930_v36 = vpop.f32.mrf.mxu1 }
 0x46b   : > { %v7140_v4 = vadd.f32 %v3930_v36, %v6981_v9  ;;  %v7609_v9 = vld [vmem:[#allocation43_spill] sm:$0xff] }
 0x46c   : > { %v7142_v7 = vadd.f32 %v4160_v47, %v4072_v43 }
 0x46f   : > { %v3984_v35 = vpop.f32.mrf.mxu2 }
 0x470   : > { %v3985_v39 = vadd.f32 %v3984_v35, %v7006_v22  ;;  %v4073_v40 = vpop.f32.mrf.mxu3 }
 0x471   : > { %v4165_v12 = vpop.f32.mrf.mxu0 }
 0x472   : > { %v4074_v16 = vadd.f32 %v4073_v40, %v3985_v39  ;;  %v3933_v24 = vpop.f32.mrf.mxu1  ;;  %v7610_v40 = vld [vmem:[#allocation20_spill] sm:$0xff] }
 0x473   : > { %v7146_v45 = vadd.f32 %v3933_v24, %v6990_v63 }
 0x474   : > { %4026 = vmatmul.bf16.gmra.mxu2 %v7608_v62  ;;  %4204 = vmatmul.bf16.gmra.mxu0 %v6848_v53  ;;  %v7150_v26 = vadd.f32 %v4162_v42, %v4074_v16 }
 0x475   : > { %4115 = vmatmul.bf16.gmra.mxu3 %v7609_v9  ;;  %4248 = vmatmul.bf16.gmra.mxu1 %v7585_v44 }
 0x477   : > { %v3987_v47 = vpop.f32.mrf.mxu2 }
 0x478   : > { %v3988_v22 = vadd.f32 %v3987_v47, %v7013_v8  ;;  %v4076_v48 = vpop.f32.mrf.mxu3 }
 0x479   : > { %v4167_v43 = vpop.f32.mrf.mxu0 }
 0x47a   : > { %v4077_v3 = vadd.f32 %v4076_v48, %v3988_v22  ;;  %v3935_v1 = vpop.f32.mrf.mxu1 }
 0x47b   : > { %v7156_v63 = vadd.f32 %v3935_v1, %v6999_v6  ;;  %v7611_v6 = vld [vmem:[#allocation17_spill] sm:$0xff] }
 0x47c   : > { %v7158_v19 = vadd.f32 %v4165_v12, %v4077_v3 }
 0x47f   : > { %v3989_v53 = vpop.f32.mrf.mxu2 }
 0x480   : > { %v3990_v36 = vadd.f32 %v3989_v53, %v7024_v50  ;;  %v4078_v42 = vpop.f32.mrf.mxu3 }
 0x481   : > { %v4170_v12 = vpop.f32.mrf.mxu0 }
 0x482   : > { %v4079_v35 = vadd.f32 %v4078_v42, %v3990_v36  ;;  %v3938_v39 = vpop.f32.mrf.mxu1 }
 0x483   : > { %v7162_v44 = vadd.f32 %v3938_v39, %v7008_v59 }
 0x484   : > { %4031 = vmatmul.bf16.gmra.mxu2 %v7610_v40  ;;  %4209 = vmatmul.bf16.gmra.mxu0 %v7597_v55  ;;  %v7166_v8 = vadd.f32 %v4167_v43, %v4079_v35 }
 0x485   : > { %4120 = vmatmul.bf16.gmra.mxu3 %v7611_v6  ;;  %4253 = vmatmul.bf16.gmra.mxu1 %v7587_v58 }
 0x487   : > { %v3992_v16 = vpop.f32.mrf.mxu2 }
 0x488   : > { %v3993_v24 = vadd.f32 %v3992_v16, %v7031_v28  ;;  %v4081_v50 = vpop.f32.mrf.mxu3  ;;  %v7612_v28 = vld [vmem:[#allocation50_spill] sm:$0xff]  ;;  %v7616_v16 = vld [vmem:[#allocation33_spill] sm:$0xff] }
 0x489   : > { %v4172_v53 = vpop.f32.mrf.mxu0 }
 0x48a   : > { %v4082_v9 = vadd.f32 %v4081_v50, %v3993_v24  ;;  %v3940_v47 = vpop.f32.mrf.mxu1  ;;  %v2939_v24 = vrot.slane %v6941_v13, 1  ;;  %v2940_v50 = vrot.slane %v7102_v37, 1 }
 0x48b   : > { %v7172_v59 = vadd.f32 %v3940_v47, %v7017_v15 }
 0x48c   : > { %v7174_v22 = vadd.f32 %v4170_v12, %v4082_v9  ;;  %v7215_v9 = vsel %vm854_vm4, %v2939_v24, %v2940_v50 }
 0x48f   : > { %v3994_v48 = vpop.f32.mrf.mxu2 }
 0x490   : > { %v3995_v55 = vadd.f32 %v3994_v48, %v7042_v30  ;;  %v4083_v3 = vpop.f32.mrf.mxu3 }
 0x492   : > { %v4084_v1 = vadd.f32 %v4083_v3, %v3995_v55  ;;  %v3943_v43 = vpop.f32.mrf.mxu1  ;;  %v5360_v3 = vld [vmem:[%s5695_s16] sm:$0xff] }
 0x493   : > { %v7178_v58 = vadd.f32 %v3943_v43, %v7026_v52  ;;  %v7613_v52 = vld [vmem:[#allocation47_spill] sm:$0xff] }
 0x494   : > { %4036 = vmatmul.bf16.gmra.mxu2 %v7612_v28  ;;  %4214 = vmatmul.bf16.gmra.mxu0 %v6904_v57  ;;  %v7182_v36 = vadd.f32 %v4172_v53, %v4084_v1  ;;  %v7614_v57 = vld [vmem:[#allocation15_spill] sm:$0xff] }
 0x495   : > { %4125 = vmatmul.bf16.gmra.mxu3 %v6706_v25  ;;  %4258 = vmatmul.bf16.gmra.mxu1 %v7589_v54  ;;  %v7615_v25 = vld [vmem:[#allocation35_spill] sm:$0xff] }
 0x497   : > { %v3997_v43 = vpop.f32.mrf.mxu2 }
 0x49a   : > { %v3945_v15 = vpop.f32.mrf.mxu1 }
 0x49b   : > { %v7187_v30 = vadd.f32 %v3945_v15, %v7035_v20 }
 0x4a2   : > { %v3948_v42 = vpop.f32.mrf.mxu1 }
 0x4a3   : > { %v7190_v35 = vadd.f32 %v3948_v42, %v7044_v5  ;;  %v4175_v42 = vpop.f32.mrf.mxu0 }
 0x4a4   : > { %4041 = vmatmul.bf16.gmra.mxu2 %v6908_v32  ;;  %4219 = vmatmul.bf16.gmra.mxu0 %v6937_v2 }
 0x4a5   : > { %4130 = vmatmul.bf16.gmra.mxu3 %v7613_v52  ;;  %4263 = vmatmul.bf16.gmra.mxu1 %v7614_v57 }
 0x4aa   : > { %v3950_v39 = vpop.f32.mrf.mxu1 }
 0x4ab   : > { %v7197_v6 = vadd.f32 %v3950_v39, %v7615_v25  ;;  %v5362_v39 = vld [vmem:[%s5695_s16 + $0x10] sm:$0xff]  ;;  %v4177_v24 = vpop.f32.mrf.mxu0 }
 0x4b2   : > { %v3953_v54 = vpop.f32.mrf.mxu1 }
 0x4b3   : > { %v7200_v20 = vadd.f32 %v3953_v54, %v7062_v61 }
 0x4b4   : > { %4046 = vmatmul.bf16.gmra.mxu2 %v7616_v16  ;;  %4224 = vmatmul.bf16.gmra.mxu0 %v7116_v49  ;;  %v7617_v49 = vld [vmem:[#allocation16_spill] sm:$0xff] }
 0x4b5   : > { %4135 = vmatmul.bf16.gmra.mxu3 %v6941_v13  ;;  %4268 = vmatmul.bf16.gmra.mxu1 %v7600_v41  ;;  %v7618_v41 = vld [vmem:[#allocation12_spill] sm:$0xff] }
 0x4ba   : > { %v3955_v2 = vpop.f32.mrf.mxu1 }
 0x4bb   : > { %v7207_v5 = vadd.f32 %v3955_v2, %v7071_v29 }
 0x4c2   : > { %v3958_v12 = vpop.f32.mrf.mxu1 }
 0x4c3   : > { %v7212_v61 = vadd.f32 %v3958_v12, %v7080_v56 }
 0x4c4   : > { %4051 = vmatmul.bf16.gmra.mxu2 %v7215_v9  ;;  %4229 = vmatmul.bf16.gmra.mxu0 %v7617_v49  ;;  %v5363_v49 = vld [vmem:[%s5695_s16 + $0x18] sm:$0xff] }
 0x4c5   : > { %4273 = vmatmul.bf16.gmra.mxu1 %v7602_v60  ;;  %4140 = vmatmul.bf16.gmra.mxu3 %v7618_v41 }
 0x4ca   : > { %v3960_v13 = vpop.f32.mrf.mxu1 }
 0x4cb   : > { %v7222_v29 = vadd.f32 %v3960_v13, %v7089_v31 }
 0x4d2   : > { %v3963_v37 = vpop.f32.mrf.mxu1 }
 0x4d3   : > { %v7225_v56 = vadd.f32 %v3963_v37, %v7104_v27 }
 0x4d5   : > { %4278 = vmatmul.bf16.gmra.mxu1 %v7604_v18 }
 0x4da   : > { %v3965_v47 = vpop.f32.mrf.mxu1 }
 0x4db   : > { %v7229_v48 = vadd.f32 %v3965_v47, %v7118_v0  ;;  %v5361_v0 = vld [vmem:[%s5695_s16 + $0x8] sm:$0xff] }
 0x4e2   : > { %v4244_v55 = vpop.f32.mrf.mxu1 }
 0x4e3   : > { %v4245_v60 = vadd.f32 %v4244_v55, %v7126_v38  ;;  %v4086_v38 = vpop.f32.mrf.mxu3  ;;  %v5364_v55 = vld [vmem:[%s5695_s16 + $0x20] sm:$0xff] }
 0x4e5   : > { %v4324_v1 = vadd.f32 %v5360_v3, %v4245_v60  ;;  %4283 = vmatmul.bf16.gmra.mxu1 %v7606_v33  ;;  %v3999_v33 = vpop.f32.mrf.mxu2 }
 0x4e7   : > { %v4356_v31 = vmax.f32 %v4324_v1, 0.0 }
 0x4e9   : > { %4388 = vst [vmem:[%s7236_s11] sm:$0xff] %v4356_v31 }
 0x4ea   : > { %v4246_v27 = vpop.f32.mrf.mxu1 }
 0x4eb   : > { %v4247_v18 = vadd.f32 %v4246_v27, %v7134_v46  ;;  %v4088_v2 = vpop.f32.mrf.mxu3 }
 0x4ed   : > { %v4325_v53 = vadd.f32 %v5361_v0, %v4247_v18  ;;  %v4002_v12 = vpop.f32.mrf.mxu2  ;;  %v5365_v18 = vld [vmem:[%s5695_s16 + $0x28] sm:$0xff] }
 0x4ef   : > { %v4357_v15 = vmax.f32 %v4325_v53, 0.0 }
 0x4f1   : > { %4389 = vst [vmem:[%s7236_s11 + $0x8] sm:$0xff] %v4357_v15 }
 0x4f2   : > { %v4249_v52 = vpop.f32.mrf.mxu1 }
 0x4f3   : > { %v4250_v57 = vadd.f32 %v4249_v52, %v7142_v7  ;;  %v4091_v7 = vpop.f32.mrf.mxu3 }
 0x4f5   : > { %v4326_v25 = vadd.f32 %v5362_v39, %v4250_v57  ;;  %4288 = vmatmul.bf16.gmra.mxu1 %v7608_v62  ;;  %v4180_v62 = vpop.f32.mrf.mxu0  ;;  %v4004_v3 = vpop.f32.mrf.mxu2  ;;  %v5366_v39 = vld [vmem:[%s5695_s16 + $0x30] sm:$0xff] }
 0x4f7   : > { %v4358_v54 = vmax.f32 %v4326_v25, 0.0 }
 0x4f9   : > { %4390 = vst [vmem:[%s7236_s11 + $0x10] sm:$0xff] %v4358_v54 }
 0x4fa   : > { %v4251_v46 = vpop.f32.mrf.mxu1 }
 0x4fb   : > { %v4252_v50 = vadd.f32 %v4251_v46, %v7150_v26  ;;  %v4093_v27 = vpop.f32.mrf.mxu3 }
 0x4fd   : > { %v4327_v41 = vadd.f32 %v5363_v49, %v4252_v50  ;;  %v4182_v53 = vpop.f32.mrf.mxu0 }
 0x4ff   : > { %v4359_v13 = vmax.f32 %v4327_v41, 0.0 }
 0x501   : > { %4391 = vst [vmem:[%s7236_s11 + $0x18] sm:$0xff] %v4359_v13 }
 0x502   : > { %v4254_v37 = vpop.f32.mrf.mxu1 }
 0x503   : > { %v4255_v47 = vadd.f32 %v4254_v37, %v7158_v19  ;;  %v4007_v19 = vpop.f32.mrf.mxu2  ;;  %v4096_v25 = vpop.f32.mrf.mxu3 }
 0x505   : > { %v4328_v60 = vadd.f32 %v5364_v55, %v4255_v47  ;;  %4293 = vmatmul.bf16.gmra.mxu1 %v7610_v40  ;;  %v4185_v50 = vpop.f32.mrf.mxu0  ;;  %v5367_v47 = vld [vmem:[%s5695_s16 + $0x38] sm:$0xff] }
 0x507   : > { %v4360_v1 = vmax.f32 %v4328_v60, 0.0 }
 0x509   : > { %4392 = vst [vmem:[%s7236_s11 + $0x20] sm:$0xff] %v4360_v1  ;;  %v4000_v1 = vadd.f32 %v3999_v33, %v7060_v21 }
 0x50a   : > { %v4256_v26 = vpop.f32.mrf.mxu1 }
 0x50b   : > { %v4257_v31 = vadd.f32 %v4256_v26, %v7166_v8  ;;  %v7619_v8 = vld [vmem:[#allocation34_spill] sm:$0xff]  ;;  %v4009_v49 = vpop.f32.mrf.mxu2  ;;  %v4098_v60 = vpop.f32.mrf.mxu3 }
 0x50c   : > { %v3998_v46 = vadd.f32 %v3997_v43, %v7619_v8 }
 0x50d   : > { %v4329_v0 = vadd.f32 %v5365_v18, %v4257_v31  ;;  %v4187_v31 = vpop.f32.mrf.mxu0 }
 0x50e   : > { %v4087_v37 = vadd.f32 %v4086_v38, %v3998_v46  ;;  %v4003_v38 = vadd.f32 %v4002_v12, %v7067_v10 }
 0x50f   : > { %v4361_v15 = vmax.f32 %v4329_v0, 0.0  ;;  %v4089_v0 = vadd.f32 %v4088_v2, %v4000_v1  ;;  %v4008_v1 = vadd.f32 %v4007_v19, %v7085_v51 }
 0x510   : > { %v4092_v33 = vadd.f32 %v4091_v7, %v4003_v38 }
 0x511   : > { %4393 = vst [vmem:[%s7236_s11 + $0x28] sm:$0xff] %v4361_v15  ;;  %v5368_v15 = vld [vmem:[%s5695_s16 + $0x40] sm:$0xff] }
 0x512   : > { %v4259_v52 = vpop.f32.mrf.mxu1 }
 0x513   : > { %v4260_v57 = vadd.f32 %v4259_v52, %v7174_v22  ;;  %v4012_v18 = vpop.f32.mrf.mxu2 }
 0x515   : > { %v4330_v40 = vadd.f32 %v5366_v39, %v4260_v57  ;;  %4298 = vmatmul.bf16.gmra.mxu1 %v7612_v28  ;;  %v4176_v28 = vadd.f32 %v4175_v42, %v4087_v37  ;;  %v4178_v57 = vadd.f32 %v4177_v24, %v4089_v0  ;;  %v4101_v39 = vpop.f32.mrf.mxu3  ;;  %v5370_v37 = vld [vmem:[%s5695_s16 + $0x50] sm:$0xff] }
 0x517   : > { %v4362_v54 = vmax.f32 %v4330_v40, 0.0  ;;  %v4190_v40 = vpop.f32.mrf.mxu0 }
 0x519   : > { %4394 = vst [vmem:[%s7236_s11 + $0x30] sm:$0xff] %v4362_v54  ;;  %v5369_v54 = vld [vmem:[%s5695_s16 + $0x48] sm:$0xff] }
 0x51a   : > { %v4261_v41 = vpop.f32.mrf.mxu1 }
 0x51b   : > { %v4262_v13 = vadd.f32 %v4261_v41, %v7182_v36  ;;  %v4014_v46 = vpop.f32.mrf.mxu2  ;;  %v4005_v41 = vadd.f32 %v4004_v3, %v7078_v11  ;;  %v4097_v3 = vadd.f32 %v4096_v25, %v4008_v1 }
 0x51d   : > { %v4331_v55 = vadd.f32 %v5367_v47, %v4262_v13  ;;  %v4103_v12 = vpop.f32.mrf.mxu3  ;;  %v4094_v24 = vadd.f32 %v4093_v27, %v4005_v41 }
 0x51f   : > { %v4363_v22 = vmax.f32 %v4331_v55, 0.0  ;;  %v4192_v7 = vpop.f32.mrf.mxu0 }
 0x521   : > { %4395 = vst [vmem:[%s7236_s11 + $0x38] sm:$0xff] %v4363_v22 }
 0x522   : > { %v4264_v26 = vpop.f32.mrf.mxu1 }
 0x523   : > { %v4265_v43 = vadd.f32 %v4264_v26, %v4176_v28  ;;  %v4017_v22 = vpop.f32.mrf.mxu2  ;;  %v4183_v28 = vadd.f32 %v4182_v53, %v4094_v24  ;;  %v5371_v26 = vld [vmem:[%s5695_s16 + $0x58] sm:$0xff]  ;;  %v5372_v53 = vld [vmem:[%s5695_s16 + $0x60] sm:$0xff]  ;;  %v5374_v24 = vld [vmem:[%s5695_s16 + $0x70] sm:$0xff] }
 0x524   : > { %v4018_v1 = vadd.f32 %v4017_v22, %v7130_v34 }
 0x525   : > { %v4332_v52 = vadd.f32 %v5368_v15, %v4265_v43  ;;  %4303 = vmatmul.bf16.gmra.mxu1 %v6908_v32  ;;  %v4181_v32 = vadd.f32 %v4180_v62, %v4092_v33  ;;  %v4106_v0 = vpop.f32.mrf.mxu3  ;;  %v4010_v15 = vadd.f32 %v4009_v49, %v7097_v23 }
 0x527   : > { %v4364_v36 = vmax.f32 %v4332_v52, 0.0  ;;  %v4186_v52 = vadd.f32 %v4185_v50, %v4097_v3  ;;  %v4099_v19 = vadd.f32 %v4098_v60, %v4010_v15 }
 0x529   : > { %4396 = vst [vmem:[%s7236_s11 + $0x40] sm:$0xff] %v4364_v36  ;;  %v4188_v33 = vadd.f32 %v4187_v31, %v4099_v19 }
 0x52a   : > { %v4266_v21 = vpop.f32.mrf.mxu1 }
 0x52b   : > { %v4267_v42 = vadd.f32 %v4266_v21, %v4178_v57  ;;  %v4019_v36 = vpop.f32.mrf.mxu2 }
 0x52d   : > { %v4333_v8 = vadd.f32 %v5369_v54, %v4267_v42  ;;  %v4108_v21 = vpop.f32.mrf.mxu3  ;;  %v4013_v42 = vadd.f32 %v4012_v18, %v7111_v14 }
 0x52f   : > { %v4365_v2 = vmax.f32 %v4333_v8, 0.0  ;;  %v4102_v8 = vadd.f32 %v4101_v39, %v4013_v42 }
 0x531   : > { %4397 = vst [vmem:[%s7236_s11 + $0x48] sm:$0xff] %v4365_v2  ;;  %v5373_v2 = vld [vmem:[%s5695_s16 + $0x68] sm:$0xff] }
 0x532   : > { %v4269_v13 = vpop.f32.mrf.mxu1 }
 0x533   : > { %v4270_v10 = vadd.f32 %v4269_v13, %v4181_v32  ;;  %v4022_v54 = vpop.f32.mrf.mxu2  ;;  %v4015_v32 = vadd.f32 %v4014_v46, %v7124_v17 }
 0x535   : > { %v4334_v47 = vadd.f32 %v5370_v37, %v4270_v10  ;;  %4308 = vmatmul.bf16.gmra.mxu1 %v7616_v16  ;;  %v4195_v16 = vpop.f32.mrf.mxu0  ;;  %v4111_v13 = vpop.f32.mrf.mxu3  ;;  %v4104_v18 = vadd.f32 %v4103_v12, %v4015_v32 }
 0x537   : > { %v4366_v55 = vmax.f32 %v4334_v47, 0.0  ;;  %v7620_v47 = vld [vmem:[#allocation32_spill] sm:$0xff] }
 0x539   : > { %4398 = vst [vmem:[%s7236_s11 + $0x50] sm:$0xff] %v4366_v55 }
 0x53a   : > { %v4271_v11 = vpop.f32.mrf.mxu1 }
 0x53b   : > { %v4272_v62 = vadd.f32 %v4271_v11, %v4183_v28  ;;  %v4024_v39 = vpop.f32.mrf.mxu2  ;;  %v4193_v28 = vadd.f32 %v4192_v7, %v4104_v18  ;;  %v4107_v11 = vadd.f32 %v4106_v0, %v4018_v1  ;;  %v5376_v7 = vld [vmem:[%s5695_s16 + $0x80] sm:$0xff]  ;;  %v4023_v0 = vadd.f32 %v4022_v54, %v7146_v45 }
 0x53d   : > { %v4335_v43 = vadd.f32 %v5371_v26, %v4272_v62  ;;  %v4197_v49 = vpop.f32.mrf.mxu0  ;;  %v4113_v46 = vpop.f32.mrf.mxu3  ;;  %v5375_v62 = vld [vmem:[%s5695_s16 + $0x78] sm:$0xff]  ;;  %v4196_v15 = vadd.f32 %v4195_v16, %v4107_v11  ;;  %v5377_v16 = vld [vmem:[%s5695_s16 + $0x88] sm:$0xff]  ;;  %v5380_v11 = vld [vmem:[%s5695_s16 + $0xa0] sm:$0xff] }
 0x53f   : > { %v4367_v27 = vmax.f32 %v4335_v43, 0.0 }
 0x541   : > { %4399 = vst [vmem:[%s7236_s11 + $0x58] sm:$0xff] %v4367_v27  ;;  %v4020_v27 = vadd.f32 %v4019_v36, %v7140_v4  ;;  %v4112_v36 = vadd.f32 %v4111_v13, %v4023_v0 }
 0x542   : > { %v4274_v38 = vpop.f32.mrf.mxu1 }
 0x543   : > { %v4275_v51 = vadd.f32 %v4274_v38, %v4186_v52  ;;  %v4027_v43 = vpop.f32.mrf.mxu2  ;;  %v4109_v22 = vadd.f32 %v4108_v21, %v4020_v27 }
 0x544   : > { %v4028_v13 = vadd.f32 %v4027_v43, %v7162_v44 }
 0x545   : > { %v4336_v57 = vadd.f32 %v5372_v53, %v4275_v51  ;;  %4313 = vmatmul.bf16.gmra.mxu1 %v7215_v9  ;;  %v4191_v9 = vadd.f32 %v4190_v40, %v4102_v8  ;;  %v4200_v31 = vpop.f32.mrf.mxu0  ;;  %v4116_v51 = vpop.f32.mrf.mxu3 }
 0x546   : > { %v4201_v8 = vadd.f32 %v4200_v31, %v4112_v36 }
 0x547   : > { %v4368_v25 = vmax.f32 %v4336_v57, 0.0  ;;  %v4198_v57 = vadd.f32 %v4197_v49, %v4109_v22 }
 0x549   : > { %4400 = vst [vmem:[%s7236_s11 + $0x60] sm:$0xff] %v4368_v25 }
 0x54a   : > { %v4276_v23 = vpop.f32.mrf.mxu1 }
 0x54b   : > { %v4277_v50 = vadd.f32 %v4276_v23, %v4188_v33  ;;  %v4029_v25 = vpop.f32.mrf.mxu2 }
 0x54c   : > { %v4030_v1 = vadd.f32 %v4029_v25, %v7172_v59 }
 0x54d   : > { %v4337_v41 = vadd.f32 %v5373_v2, %v4277_v50  ;;  %v4202_v12 = vpop.f32.mrf.mxu0  ;;  %v4118_v21 = vpop.f32.mrf.mxu3  ;;  %v4025_v50 = vadd.f32 %v4024_v39, %v7156_v63 }
 0x54f   : > { %v4369_v60 = vmax.f32 %v4337_v41, 0.0  ;;  %v4114_v49 = vadd.f32 %v4113_v46, %v4025_v50  ;;  %v4119_v46 = vadd.f32 %v4118_v21, %v4030_v1  ;;  %v5385_v1 = vld [vmem:[%s5695_s16 + $0xc8] sm:$0xff] }
 0x551   : > { %4401 = vst [vmem:[%s7236_s11 + $0x68] sm:$0xff] %v4369_v60  ;;  %v5378_v60 = vld [vmem:[%s5695_s16 + $0x90] sm:$0xff] }
 0x552   : > { %v4279_v10 = vpop.f32.mrf.mxu1 }
 0x553   : > { %v4280_v14 = vadd.f32 %v4279_v10, %v4191_v9  ;;  %v4032_v41 = vpop.f32.mrf.mxu2  ;;  %v4203_v10 = vadd.f32 %v4202_v12, %v4114_v49 }
 0x554   : > { %v4033_v43 = vadd.f32 %v4032_v41, %v7178_v58 }
 0x555   : > { %v4338_v37 = vadd.f32 %v5374_v24, %v4280_v14  ;;  %4318 = vmatmul.bf16.gmra.mxu1 %v7620_v47  ;;  %v4205_v53 = vpop.f32.mrf.mxu0  ;;  %v4121_v14 = vpop.f32.mrf.mxu3  ;;  %v4117_v24 = vadd.f32 %v4116_v51, %v4028_v13 }
 0x557   : > { %v4370_v55 = vmax.f32 %v4338_v37, 0.0  ;;  %v5379_v37 = vld [vmem:[%s5695_s16 + $0x98] sm:$0xff] }
 0x559   : > { %4402 = vst [vmem:[%s7236_s11 + $0x70] sm:$0xff] %v4370_v55 }
 0x55a   : > { %v4281_v17 = vpop.f32.mrf.mxu1 }
 0x55b   : > { %v4282_v40 = vadd.f32 %v4281_v17, %v4193_v28  ;;  %v4034_v39 = vpop.f32.mrf.mxu2  ;;  %v4206_v28 = vadd.f32 %v4205_v53, %v4117_v24 }
 0x55c   : > { %v4035_v51 = vadd.f32 %v4034_v39, %v7187_v30 }
 0x55d   : > { %v4339_v3 = vadd.f32 %v5375_v62, %v4282_v40  ;;  %v4207_v45 = vpop.f32.mrf.mxu0  ;;  %v4123_v40 = vpop.f32.mrf.mxu3 }
 0x55e   : > { %v4208_v27 = vadd.f32 %v4207_v45, %v4119_v46  ;;  %v4124_v25 = vadd.f32 %v4123_v40, %v4035_v51  ;;  %v5383_v45 = vld [vmem:[%s5695_s16 + $0xb8] sm:$0xff] }
 0x55f   : > { %v4371_v26 = vmax.f32 %v4339_v3, 0.0 }
 0x561   : > { %4403 = vst [vmem:[%s7236_s11 + $0x78] sm:$0xff] %v4371_v26 }
 0x562   : > { %v4284_v52 = vpop.f32.mrf.mxu1 }
 0x563   : > { %v4285_v34 = vadd.f32 %v4284_v52, %v4196_v15  ;;  %v4037_v26 = vpop.f32.mrf.mxu2  ;;  %v4122_v52 = vadd.f32 %v4121_v14, %v4033_v43  ;;  %v5384_v14 = vld [vmem:[%s5695_s16 + $0xc0] sm:$0xff] }
 0x565   : > { %v4340_v38 = vadd.f32 %v5376_v7, %v4285_v34  ;;  %v4210_v31 = vpop.f32.mrf.mxu0  ;;  %v5381_v34 = vld [vmem:[%s5695_s16 + $0xa8] sm:$0xff]  ;;  %v4126_v7 = vpop.f32.mrf.mxu3 }
 0x566   : > { %v4211_v0 = vadd.f32 %v4210_v31, %v4122_v52 }
 0x567   : > { %v4372_v19 = vmax.f32 %v4340_v38, 0.0 }
 0x569   : > { %4404 = vst [vmem:[%s7236_s11 + $0x80] sm:$0xff] %v4372_v19 }
 0x56a   : > { %v4286_v42 = vpop.f32.mrf.mxu1 }
 0x56b   : > { %v4287_v4 = vadd.f32 %v4286_v42, %v4198_v57  ;;  %v4039_v53 = vpop.f32.mrf.mxu2  ;;  %v5382_v42 = vld [vmem:[%s5695_s16 + $0xb0] sm:$0xff] }
 0x56c   : > { %v4040_v49 = vadd.f32 %v4039_v53, %v7197_v6 }
 0x56d   : > { %v4341_v33 = vadd.f32 %v5377_v16, %v4287_v4  ;;  %v4212_v3 = vpop.f32.mrf.mxu0  ;;  %v4128_v16 = vpop.f32.mrf.mxu3 }
 0x56e   : > { %v4129_v13 = vadd.f32 %v4128_v16, %v4040_v49 }
 0x56f   : > { %v4373_v23 = vmax.f32 %v4341_v33, 0.0  ;;  %v4038_v33 = vadd.f32 %v4037_v26, %v7190_v35 }
 0x571   : > { %4405 = vst [vmem:[%s7236_s11 + $0x88] sm:$0xff] %v4373_v23  ;;  %v4213_v23 = vadd.f32 %v4212_v3, %v4124_v25 }
 0x572   : > { %v4289_v2 = vpop.f32.mrf.mxu1 }
 0x573   : > { %v4290_v54 = vadd.f32 %v4289_v2, %v4201_v8  ;;  %v4042_v8 = vpop.f32.mrf.mxu2  ;;  %v4127_v2 = vadd.f32 %v4126_v7, %v4038_v33 }
 0x574   : > { %v4043_v31 = vadd.f32 %v4042_v8, %v7200_v20 }
 0x575   : > { %v4342_v32 = vadd.f32 %v5378_v60, %v4290_v54  ;;  %v4215_v19 = vpop.f32.mrf.mxu0 }
 0x576   : > { %v4216_v60 = vadd.f32 %v4215_v19, %v4127_v2 }
 0x577   : > { %v4374_v9 = vmax.f32 %v4342_v32, 0.0  ;;  %v4131_v32 = vpop.f32.mrf.mxu3 }
 0x579   : > { %4406 = vst [vmem:[%s7236_s11 + $0x90] sm:$0xff] %v4374_v9 }
 0x57a   : > { %v4291_v18 = vpop.f32.mrf.mxu1 }
 0x57b   : > { %v4292_v63 = vadd.f32 %v4291_v18, %v4203_v10 }
 0x57d   : > { %v4343_v47 = vadd.f32 %v5379_v37, %v4292_v63  ;;  %v4217_v30 = vpop.f32.mrf.mxu0  ;;  %v4044_v63 = vpop.f32.mrf.mxu2 }
 0x57e   : > { %v4218_v37 = vadd.f32 %v4217_v30, %v4129_v13  ;;  %v4045_v46 = vadd.f32 %v4044_v63, %v7207_v5 }
 0x57f   : > { %v4375_v55 = vmax.f32 %v4343_v47, 0.0  ;;  %v4133_v39 = vpop.f32.mrf.mxu3 }
 0x580   : > { %v4134_v3 = vadd.f32 %v4133_v39, %v4045_v46 }
 0x581   : > { %4407 = vst [vmem:[%s7236_s11 + $0x98] sm:$0xff] %v4375_v55  ;;  %v4132_v55 = vadd.f32 %v4131_v32, %v4043_v31 }
 0x582   : > { %v4294_v17 = vpop.f32.mrf.mxu1 }
 0x583   : > { %v4295_v44 = vadd.f32 %v4294_v17, %v4206_v28 }
 0x585   : > { %v4344_v62 = vadd.f32 %v5380_v11, %v4295_v44  ;;  %v4220_v10 = vpop.f32.mrf.mxu0  ;;  %v4047_v40 = vpop.f32.mrf.mxu2 }
 0x586   : > { %v4221_v11 = vadd.f32 %v4220_v10, %v4132_v55  ;;  %v5390_v10 = vld [vmem:[%s5695_s16 + $0xf0] sm:$0xff] }
 0x587   : > { %v4376_v12 = vmax.f32 %v4344_v62, 0.0  ;;  %v4136_v43 = vpop.f32.mrf.mxu3 }
 0x589   : > { %4408 = vst [vmem:[%s7236_s11 + $0xa0] sm:$0xff] %v4376_v12  ;;  %v5386_v12 = vld [vmem:[%s5695_s16 + $0xd0] sm:$0xff] }
 0x58a   : > { %v4296_v15 = vpop.f32.mrf.mxu1 }
 0x58b   : > { %v4297_v59 = vadd.f32 %v4296_v15, %v4208_v27 }
 0x58d   : > { %v4345_v22 = vadd.f32 %v5381_v34, %v4297_v59  ;;  %v4222_v17 = vpop.f32.mrf.mxu0  ;;  %v4048_v59 = vadd.f32 %v4047_v40, %v7212_v61  ;;  %v4049_v34 = vpop.f32.mrf.mxu2 }
 0x58e   : > { %v4223_v52 = vadd.f32 %v4222_v17, %v4134_v3  ;;  %v4050_v53 = vadd.f32 %v4049_v34, %v7222_v29 }
 0x58f   : > { %v4377_v38 = vmax.f32 %v4345_v22, 0.0  ;;  %v4137_v7 = vadd.f32 %v4136_v43, %v4048_v59 }
 0x591   : > { %4409 = vst [vmem:[%s7236_s11 + $0xa8] sm:$0xff] %v4377_v38  ;;  %v5387_v38 = vld [vmem:[%s5695_s16 + $0xd8] sm:$0xff] }
 0x592   : > { %v4299_v57 = vpop.f32.mrf.mxu1 }
 0x593   : > { %v4300_v58 = vadd.f32 %v4299_v57, %v4211_v0  ;;  %v4138_v0 = vpop.f32.mrf.mxu3 }
 0x595   : > { %v4346_v4 = vadd.f32 %v5382_v42, %v4300_v58  ;;  %v4225_v15 = vpop.f32.mrf.mxu0  ;;  %v4052_v42 = vpop.f32.mrf.mxu2 }
 0x596   : > { %v4226_v57 = vadd.f32 %v4225_v15, %v4137_v7 }
 0x597   : > { %v4378_v36 = vmax.f32 %v4346_v4, 0.0  ;;  %v4139_v4 = vadd.f32 %v4138_v0, %v4050_v53 }
 0x599   : > { %4410 = vst [vmem:[%s7236_s11 + $0xb0] sm:$0xff] %v4378_v36  ;;  %v5388_v36 = vld [vmem:[%s5695_s16 + $0xe0] sm:$0xff] }
 0x59a   : > { %v4301_v21 = vpop.f32.mrf.mxu1 }
 0x59b   : > { %v4302_v50 = vadd.f32 %v4301_v21, %v4213_v23  ;;  %v4141_v23 = vpop.f32.mrf.mxu3  ;;  %v4053_v21 = vadd.f32 %v4052_v42, %v7225_v56 }
 0x59d   : > { %v4347_v54 = vadd.f32 %v5383_v45, %v4302_v50  ;;  %v4227_v61 = vpop.f32.mrf.mxu0  ;;  %v4142_v2 = vadd.f32 %v4141_v23, %v4053_v21  ;;  %v5389_v45 = vld [vmem:[%s5695_s16 + $0xe8] sm:$0xff] }
 0x59e   : > { %v4228_v30 = vadd.f32 %v4227_v61, %v4139_v4 }
 0x59f   : > { %v4379_v41 = vmax.f32 %v4347_v54, 0.0 }
 0x5a1   : > { %4411 = vst [vmem:[%s7236_s11 + $0xb8] sm:$0xff] %v4379_v41  ;;  %v4054_v41 = vpop.f32.mrf.mxu2 }
 0x5a2   : > { %v4304_v9 = vpop.f32.mrf.mxu1  ;;  %v4055_v32 = vadd.f32 %v4054_v41, %v7229_v48 }
 0x5a3   : > { %v4305_v35 = vadd.f32 %v4304_v9, %v4216_v60  ;;  %v4143_v9 = vpop.f32.mrf.mxu3 }
 0x5a4   : > { %v4144_v13 = vadd.f32 %v4143_v9, %v4055_v32 }
 0x5a5   : > { %v4348_v18 = vadd.f32 %v5384_v14, %v4305_v35  ;;  %v4230_v8 = vpop.f32.mrf.mxu0 }
 0x5a6   : > { %v4231_v60 = vadd.f32 %v4230_v8, %v4142_v2 }
 0x5a7   : > { %v4380_v24 = vmax.f32 %v4348_v18, 0.0 }
 0x5a9   : > { %4412 = vst [vmem:[%s7236_s11 + $0xc0] sm:$0xff] %v4380_v24 }
 0x5aa   : > { %v4306_v47 = vpop.f32.mrf.mxu1 }
 0x5ab   : > { %v4307_v6 = vadd.f32 %v4306_v47, %v4218_v37  ;;  %v5391_v37 = vld [vmem:[%s5695_s16 + $0xf8] sm:$0xff] }
 0x5ad   : > { %v4349_v28 = vadd.f32 %v5385_v1, %v4307_v6  ;;  %v4232_v18 = vpop.f32.mrf.mxu0 }
 0x5ae   : > { %v4233_v24 = vadd.f32 %v4232_v18, %v4144_v13 }
 0x5af   : > { %v4381_v44 = vmax.f32 %v4349_v28, 0.0 }
 0x5b1   : > { %4413 = vst [vmem:[%s7236_s11 + $0xc8] sm:$0xff] %v4381_v44 }
 0x5b2   : > { %v4309_v62 = vpop.f32.mrf.mxu1 }
 0x5b3   : > { %v4310_v20 = vadd.f32 %v4309_v62, %v4221_v11 }
 0x5b5   : > { %v4350_v26 = vadd.f32 %v5386_v12, %v4310_v20 }
 0x5b7   : > { %v4382_v27 = vmax.f32 %v4350_v26, 0.0 }
 0x5b9   : > { %4414 = vst [vmem:[%s7236_s11 + $0xd0] sm:$0xff] %v4382_v27 }
 0x5ba   : > { %v4311_v22 = vpop.f32.mrf.mxu1 }
 0x5bb   : > { %v4312_v5 = vadd.f32 %v4311_v22, %v4223_v52 }
 0x5bd   : > { %v4351_v51 = vadd.f32 %v5387_v38, %v4312_v5 }
 0x5bf   : > { %v4383_v19 = vmax.f32 %v4351_v51, 0.0 }
 0x5c1   : > { %4415 = vst [vmem:[%s7236_s11 + $0xd8] sm:$0xff] %v4383_v19 }
 0x5c2   : > { %v4314_v58 = vpop.f32.mrf.mxu1 }
 0x5c3   : > { %v4315_v25 = vadd.f32 %v4314_v58, %v4226_v57 }
 0x5c5   : > { %v4352_v16 = vadd.f32 %v5388_v36, %v4315_v25 }
 0x5c7   : > { %v4384_v33 = vmax.f32 %v4352_v16, 0.0 }
 0x5c9   : > { %4416 = vst [vmem:[%s7236_s11 + $0xe0] sm:$0xff] %v4384_v33 }
 0x5ca   : > { %v4316_v50 = vpop.f32.mrf.mxu1 }
 0x5cb   : > { %v4317_v29 = vadd.f32 %v4316_v50, %v4228_v30 }
 0x5cd   : > { %v4353_v54 = vadd.f32 %v5389_v45, %v4317_v29 }
 0x5cf   : > { %v4385_v49 = vmax.f32 %v4353_v54, 0.0 }
 0x5d1   : > { %4417 = vst [vmem:[%s7236_s11 + $0xe8] sm:$0xff] %v4385_v49 }
 0x5d2   : > { %v4319_v56 = vpop.f32.mrf.mxu1 }
 0x5d3   : > { %v4320_v35 = vadd.f32 %v4319_v56, %v4231_v60 }
 0x5d5   : > { %v4354_v14 = vadd.f32 %v5390_v10, %v4320_v35 }
 0x5d7   : > { %v4386_v63 = vmax.f32 %v4354_v14, 0.0 }
 0x5d9   : > { %4418 = vst [vmem:[%s7236_s11 + $0xf0] sm:$0xff] %v4386_v63 }
 0x5da   : > { %v4321_v48 = vpop.f32.mrf.mxu1 }
 0x5db   : > { %v4322_v31 = vadd.f32 %v4321_v48, %v4233_v24 }
 0x5dd   : > { %v4355_v47 = vadd.f32 %v5391_v37, %v4322_v31 }
 0x5df   : > { %v4387_v6 = vmax.f32 %v4355_v47, 0.0 }
 0x5e1   : > { %4419 = vst [vmem:[%s7236_s11 + $0xf8] sm:$0xff] %v4387_v6 }
 0x5e2   : > { %5509 = shalt.err (!%p5506_p10)
}
 0x5e3   : > { %s5561_s8 = smov 128   ;;  %s5562_s16 = smov 8  }
 0x5e4   : > { %5294 = dma.vmem_to_hbm [thread:$0]  (%p5659_p3), %s4434_s6, 4096, %s4436_s26, %s4421_s22, %s5561_s8, %s5561_s8, %s5562_s16  }
 0x5e5 PF: > { %s4450_s11 = sand.u32 1, %s5540_s18   ;;  %p7621_p12 = scmp.ge.s32.totalorder %s5552_s21, 2 }
 0x5e6   : > { %s4451_s12 = scalar_lea.sflag [#allocation4], %s4450_s11 }
 0x5e7   : > { %p5308_p13 = pnand %p7621_p12, %p5628_p6 }
 0x5e9   : > { %p5309_p0 = pneg %p5308_p13 }
 0x5eb   : > { %5535 = dma.done.wait (%p5309_p0), %s4451_s12, 4096  }
 0x5ec   : > { %5537 = vsyncadd (%p5309_p0), %s4451_s12, 4294963200  ;;  %p19_p5 = scmp.ge.s32.totalorder %s5649_s14, 4   ;;  %s7622_s18 = smov %s5544_s19 }
 0x5ed   : > { %s7623_s19 = smov %s5548_s20  ;;  %s7624_s20 = smov %s5665_s23 }
 0x5ee   : > { %s7625_s21 = smov %s5649_s14  ;;  %21 = sbr.rel (!%p19_p5) target bundleno = 6 (0x6), region = 93 }
 0x5f3   :  { %4457 = vsyncpa [#allocation3], 1 }
 0x5f4   :  { %4459 = vsyncpa [#allocation3 + $0x1], 1 }
 0x5f5   :  { %4460 = vsyncpa [#allocation6], 1 }
 0x5f6   :  { %4461 = vsyncpa [#allocation4], 1 }
 0x5f7   :  { %4463 = vsyncpa [#allocation4 + $0x1], 1 }

</bundles_post_ra>
